<compile_context>
chip_gen: v5e
topology: v5e:2x2
jax: 0.10.0
libtpu: 0.0.40
codegen_flags: <defaults>
</compile_context>

<pallas_src>
import functools
import math

import jax
import jax.numpy as jnp
from jax.experimental import pallas as pl
from jax.experimental.pallas import tpu as pltpu


# MXU operand dtype. bf16 is the native MXU operand type on v6e/v7x and halves
# operand bytes; accumulation is always f32.  Use jnp.float32 for bit-closer
# parity with the f32 PyTorch reference.
MXU_DTYPE = jnp.bfloat16


# ----------------------------------------------------------------------------
# Traced helpers used inside kernels
# ----------------------------------------------------------------------------

def _mm(a, b, dtype):
    return jnp.dot(a.astype(dtype), b.astype(dtype),
                   preferred_element_type=jnp.float32)


def _layernorm(x, g, b, eps):
    mu = jnp.mean(x, axis=-1, keepdims=True)
    xc = x - mu
    var = jnp.mean(xc * xc, axis=-1, keepdims=True)
    return xc * jax.lax.rsqrt(var + eps) * g + b


def _erf_approx(z):
    # Abramowitz & Stegun 7.1.26, |err| <= 1.5e-7.  Guarantees Mosaic lowering
    # of the exact-erf GELU (F.gelu default) inside the fused kernel.
    a = jnp.abs(z)
    t = 1.0 / (1.0 + 0.3275911 * a)
    poly = t * (0.254829592 + t * (-0.284496736 + t * (1.421413741
             + t * (-1.453152027 + t * 1.061405429))))
    r = 1.0 - poly * jnp.exp(-a * a)
    return jnp.where(z >= 0, r, -r)


def _gelu_exact(x):
    return 0.5 * x * (1.0 + _erf_approx(x * (1.0 / math.sqrt(2.0))))


# ----------------------------------------------------------------------------
# Kernel 1: fused per-branch condition encoder (projection + 2 encoder layers)
# ----------------------------------------------------------------------------

def _branch_encoder_kernel(cond_ref, cos_ref, sin_ref, rotm_ref,
                           pw_ref, pb_ref,
                           ln1g_ref, ln1b_ref, ln2g_ref, ln2b_ref,
                           wqk_ref, bqk_ref, wv_ref, bv_ref, wo_ref, bo_ref,
                           f1w_ref, f1b_ref, f2w_ref, f2b_ref,
                           tok_ref, *, num_layers, num_heads, batch, seq_len,
                           eps, mxu_dtype):
    E = pw_ref.shape[-1]
    H = num_heads
    Dh = E // H
    scale = 1.0 / math.sqrt(Dh)

    cos = cos_ref[...]          # (B*T, E), positions tiled batch-major
    sin = sin_ref[...]
    rotm = rotm_ref[...]        # (E, E) interleaved-pair sign permutation

    # Condition projection: rows are the folded (batch * time) dimension.
    x = _mm(cond_ref[0], pw_ref[0], mxu_dtype) + pb_ref[0]            # (BT, E)

    for l in range(num_layers):
        # -------- pre-norm self-attention block --------
        xn = _layernorm(x, ln1g_ref[0, l], ln1b_ref[0, l], eps)
        # Rotary (lucidrains RotaryEmbedding(dim=latent_dim), interleaved
        # pairs) applied to the q/k input only; the pair swap runs as one tiny
        # (E, E) sign-permutation matmul on the MXU (exact, no lane shuffles).
        # TODO(synk): could be replaced by pltpu.roll(+/-1) + even/odd select.
        qk_in = xn * cos + _mm(xn, rotm, mxu_dtype) * sin

        # Merged Q/K in-projection (one (E, 2E) matmul) + V in-projection.
        qk = _mm(qk_in, wqk_ref[0, l], mxu_dtype) + bqk_ref[0, l]     # (BT, 2E)
        v = _mm(xn, wv_ref[0, l], mxu_dtype) + bv_ref[0, l]           # (BT, E)

        # Per-(batch, head) scores/softmax/PV via static loops; heads are
        # reassembled by lane concat, batches by row concat, and then a single
        # (E, E) output-projection matmul handles all heads at once.
        rows = []
        for b in range(batch):
            r0 = b * seq_len
            heads = []
            for h in range(H):
                q_bh = qk[r0:r0 + seq_len, h * Dh:(h + 1) * Dh]
                k_bh = qk[r0:r0 + seq_len, E + h * Dh:E + (h + 1) * Dh]
                v_bh = v[r0:r0 + seq_len, h * Dh:(h + 1) * Dh]
                s = jax.lax.dot_general(
                    q_bh.astype(mxu_dtype), k_bh.astype(mxu_dtype),
                    (((1,), (1,)), ((), ())),
                    preferred_element_type=jnp.float32) * scale
                mx = jnp.max(s, axis=-1, keepdims=True)
                e = jnp.exp(s - mx)
                p = e / jnp.sum(e, axis=-1, keepdims=True)            # exact div
                heads.append(_mm(p, v_bh, mxu_dtype))                 # (T, Dh)
            rows.append(jnp.concatenate(heads, axis=-1))              # (T, E)
        attn_heads = jnp.concatenate(rows, axis=0)                    # (BT, E)
        x = x + _mm(attn_heads, wo_ref[0, l], mxu_dtype) + bo_ref[0, l]

        # -------- pre-norm feed-forward block (exact-erf GELU) --------
        xn2 = _layernorm(x, ln2g_ref[0, l], ln2b_ref[0, l], eps)
        h1 = _gelu_exact(_mm(xn2, f1w_ref[0, l], mxu_dtype) + f1b_ref[0, l])
        x = x + _mm(h1, f2w_ref[0, l], mxu_dtype) + f2b_ref[0, l]

    tok_ref[0] = x


def branch_encoders(cond_stacked, cos_t, sin_t, rotm, bp, *, num_heads,
                    batch, seq_len, eps=1e-5, mxu_dtype=MXU_DTYPE):
    BT, E = cos_t.shape
    assert E % num_heads == 0
    L = bp["wqk"].shape[1]

    def per_branch(a):
        nd = a.ndim
        return pl.BlockSpec((1,) + a.shape[1:],
                            lambda g: (g,) + (0,) * (nd - 1))

    def shared(a):
        nd = a.ndim
        return pl.BlockSpec(a.shape, lambda g: (0,) * nd)

    # (array, is_per_branch) in the exact order of the kernel signature.
    operands = [
        (cond_stacked, True),
        (cos_t, False), (sin_t, False), (rotm, False),
        (bp["proj_w"], True), (bp["proj_b"], True),
        (bp["ln1_g"], True), (bp["ln1_b"], True),
        (bp["ln2_g"], True), (bp["ln2_b"], True),
        (bp["wqk"], True), (bp["bqk"], True),
        (bp["wv"], True), (bp["bv"], True),
        (bp["wo"], True), (bp["bo"], True),
        (bp["ff1_w"], True), (bp["ff1_b"], True),
        (bp["ff2_w"], True), (bp["ff2_b"], True),
    ]
    arrays = [a for a, _ in operands]
    in_specs = [per_branch(a) if pb else shared(a) for a, pb in operands]
    # NOTE: constant-index weight blocks are tiny here (<1 MiB total), so the
    # default double-buffering is a non-issue; revisit (pl.Buffered) if dims grow.

    kernel = functools.partial(
        _branch_encoder_kernel, num_layers=L, num_heads=num_heads,
        batch=batch, seq_len=seq_len, eps=eps, mxu_dtype=mxu_dtype)

    return pl.pallas_call(
        kernel,
        out_shape=jax.ShapeDtypeStruct((2, BT, E), jnp.float32),
        grid=(2,),
        in_specs=in_specs,
        out_specs=pl.BlockSpec((1, BT, E), lambda g: (g, 0, 0)),
        compiler_params=pltpu.CompilerParams(
            dimension_semantics=("parallel",)),
    )(*arrays)


# ----------------------------------------------------------------------------
# Kernel 2: fuse_pm_tokens + norm_cond + (identity decoder) + keyframe_layer
# ----------------------------------------------------------------------------

def _fuse_head_kernel(tok_ref, wfp_ref, wfm_ref, bf_ref, ng_ref, nb_ref,
                      wk_ref, bk_ref, o_ref, *, eps, mxu_dtype):
    # fuse_pm_tokens(concat([p, m], -1)) expressed as two dots (no concat).
    fused = (_mm(tok_ref[0], wfp_ref[...], mxu_dtype)
             + _mm(tok_ref[1], wfm_ref[...], mxu_dtype)
             + bf_ref[...])
    cond = _layernorm(fused, ng_ref[...], nb_ref[...], eps)
    # History2KeyframeDecoder (norm_first=True) returns its input unchanged,
    # so the keyframe head applies directly to cond_tokens; fusing it here
    # makes the narrow vocab-wide store a one-off.
    o_ref[...] = _mm(cond, wk_ref[...], mxu_dtype) + bk_ref[...]


def fuse_and_head(tokens, hp, *, eps=1e-5, mxu_dtype=MXU_DTYPE):
    _, BT, _ = tokens.shape
    V = hp["keyframe_w"].shape[-1]
    return pl.pallas_call(
        functools.partial(_fuse_head_kernel, eps=eps, mxu_dtype=mxu_dtype),
        out_shape=jax.ShapeDtypeStruct((BT, V), jnp.float32),
    )(tokens, hp["fuse_w_p"], hp["fuse_w_m"], hp["fuse_b"],
      hp["norm_g"], hp["norm_b"], hp["keyframe_w"], hp["keyframe_b"])


# ----------------------------------------------------------------------------
# Rotary tables (lucidrains RotaryEmbedding(dim=latent_dim), interleaved pairs)
# ----------------------------------------------------------------------------

def rotary_tables(batch, seq_len, dim, theta=10000.0):
    inv_freq = 1.0 / (theta ** (jnp.arange(0, dim, 2, dtype=jnp.float32) / dim))
    freqs = jnp.arange(seq_len, dtype=jnp.float32)[:, None] * inv_freq[None, :]
    freqs = jnp.repeat(freqs, 2, axis=-1)                 # [f0,f0,f1,f1,...]
    cos = jnp.tile(jnp.cos(freqs), (batch, 1))            # (B*T, E), batch-major
    sin = jnp.tile(jnp.sin(freqs), (batch, 1))
    # Sign-permutation R with (x @ R)[:, 2i] = -x[:, 2i+1], (x @ R)[:, 2i+1] = x[:, 2i].
    col = jnp.arange(dim)
    row = jnp.where(col % 2 == 0, col + 1, col - 1)
    val = jnp.where(col % 2 == 0, -1.0, 1.0).astype(jnp.float32)
    rotm = jnp.zeros((dim, dim), jnp.float32).at[row, col].set(val)
    return cos, sin, rotm


# ----------------------------------------------------------------------------
# Forward pass (live path only; see faithfulness note at the top)
# ----------------------------------------------------------------------------

def forward(params, x_tokens, padding_mask, p_cond_embed, m_cond_embed, *,
            num_heads, history_len=None, mxu_dtype=MXU_DTYPE):
    # x_tokens / padding_mask / history_len only feed the dead c_history branch
    # (decoder memory that the reference decoder layer never uses).
    del x_tokens, padding_mask, history_len
    B, T, Pc = p_cond_embed.shape
    Mc = m_cond_embed.shape[-1]
    bp = params["branches"]
    C = bp["proj_w"].shape[1]
    BT = B * T

    # Stack the p/m condition inputs into one (2, B*T, Cpad) operand so both
    # branches run as the two "parallel" grid steps of a single fused kernel.
    p2 = jnp.pad(p_cond_embed.reshape(BT, Pc), ((0, 0), (0, C - Pc)))
    m2 = jnp.pad(m_cond_embed.reshape(BT, Mc), ((0, 0), (0, C - Mc)))
    cond_stacked = jnp.stack([p2, m2], axis=0)

    cos_t, sin_t, rotm = params["rope"]
    tokens = branch_encoders(cond_stacked, cos_t, sin_t, rotm, bp,
                             num_heads=num_heads, batch=B, seq_len=T,
                             mxu_dtype=mxu_dtype)                 # (2, BT, E)
    out = fuse_and_head(tokens, params["head"], mxu_dtype=mxu_dtype)  # (BT, V)
    return out.reshape(B, T, out.shape[-1])


# ----------------------------------------------------------------------------
# Deterministic synthetic parameters (stored directly in the stacked layout)
# ----------------------------------------------------------------------------

def init_params(key, *, batch, seq_len, latent_dim, ff_size, num_heads,
                p_cond_dim, m_cond_dim, vocab_size, num_layers=2):
    E, Fh = latent_dim, ff_size
    C = max(p_cond_dim, m_cond_dim)
    keys = iter(jax.random.split(key, 64))

    def rand(shape, scale=0.05):
        return scale * jax.random.normal(next(keys), shape, jnp.float32)

    # p/m condition projections, zero-padded on the unused input rows so both
    # branches stack into one (2, Cpad, E) operand.
    proj_w = jnp.zeros((2, C, E), jnp.float32)
    proj_w = proj_w.at[0, :p_cond_dim].set(rand((p_cond_dim, E)))
    proj_w = proj_w.at[1, :m_cond_dim].set(rand((m_cond_dim, E)))

    branches = {
        "proj_w": proj_w,
        "proj_b": rand((2, 1, E)),
        "ln1_g": jnp.ones((2, num_layers, 1, E), jnp.float32),
        "ln1_b": jnp.zeros((2, num_layers, 1, E), jnp.float32),
        "ln2_g": jnp.ones((2, num_layers, 1, E), jnp.float32),
        "ln2_b": jnp.zeros((2, num_layers, 1, E), jnp.float32),
        # merged Q/K in-projection ([..., :E] = Wq, [..., E:] = Wk),
        # separate V in-projection, full (all-heads) output projection.
        "wqk": rand((2, num_layers, E, 2 * E)),
        "bqk": rand((2, num_layers, 1, 2 * E), 0.01),
        "wv": rand((2, num_layers, E, E)),
        "bv": rand((2, num_layers, 1, E), 0.01),
        "wo": rand((2, num_layers, E, E)),
        "bo": rand((2, num_layers, 1, E), 0.01),
        "ff1_w": rand((2, num_layers, E, Fh)),
        "ff1_b": rand((2, num_layers, 1, Fh), 0.01),
        "ff2_w": rand((2, num_layers, Fh, E)),
        "ff2_b": rand((2, num_layers, 1, E), 0.01),
    }
    head = {
        # fuse_pm_tokens: Linear(2E, E) split into its p-half and m-half.
        "fuse_w_p": rand((E, E)),
        "fuse_w_m": rand((E, E)),
        "fuse_b": rand((1, E), 0.01),
        "norm_g": jnp.ones((1, E), jnp.float32),
        "norm_b": jnp.zeros((1, E), jnp.float32),
        "keyframe_w": rand((E, vocab_size)),
        "keyframe_b": rand((1, vocab_size), 0.01),
    }
    # keyframe_embed / input_projection / c_history_encoder / decoder-stack
    # weights are intentionally omitted: they cannot affect the output.
    rope = rotary_tables(batch, seq_len, E)
    return {"branches": branches, "head": head, "rope": rope}


# ----------------------------------------------------------------------------

if __name__ == "__main__":
    B, T, HL = 2, 16, 4
    LATENT, FF, NHEADS = 32, 64, 4
    VOCAB = 2
    P_COND_DIM, M_COND_DIM = 12, 8

    key = jax.random.PRNGKey(0)
    k_x, k_mask, k_p, k_m, k_params = jax.random.split(key, 5)
    x_tokens = jax.random.randint(k_x, (B, T), 0, VOCAB, jnp.int32)
    padding_mask = (jax.random.uniform(k_mask, (B, T, 1)) > 0.1).astype(jnp.float32)
    p_cond_embed = jax.random.normal(k_p, (B, T, P_COND_DIM), jnp.float32)
    m_cond_embed = jax.random.normal(k_m, (B, T, M_COND_DIM), jnp.float32)

    params = init_params(
        k_params, batch=B, seq_len=T, latent_dim=LATENT, ff_size=FF,
        num_heads=NHEADS, p_cond_dim=P_COND_DIM, m_cond_dim=M_COND_DIM,
        vocab_size=VOCAB)

    fwd = jax.jit(functools.partial(forward, num_heads=NHEADS, history_len=HL))
    out = fwd(params, x_tokens, padding_mask, p_cond_embed, m_cond_embed)
    jax.block_until_ready(out)

    assert out.shape == (B, T, VOCAB), out.shape
    assert bool(jnp.all(jnp.isfinite(out)))
    print("KERNEL_OK")
</pallas_src>

<mosaic_0001>
module attributes {stable_mosaic.version = 11 : i64} {
  func.func @_fuse_head_kernel(%arg0: memref<2x32x32xf32, #tpu.memory_space<vmem>>, %arg1: memref<32x32xf32, #tpu.memory_space<vmem>>, %arg2: memref<32x32xf32, #tpu.memory_space<vmem>>, %arg3: memref<1x32xf32, #tpu.memory_space<vmem>>, %arg4: memref<1x32xf32, #tpu.memory_space<vmem>>, %arg5: memref<1x32xf32, #tpu.memory_space<vmem>>, %arg6: memref<32x2xf32, #tpu.memory_space<vmem>>, %arg7: memref<1x2xf32, #tpu.memory_space<vmem>>, %arg8: memref<32x2xf32, #tpu.memory_space<vmem>>) attributes {dimension_semantics = [], scalar_prefetch = 0 : i64, scratch_operands = 0 : i64, tpu.core_type = #tpu.core_type<tc>} {
    %c0 = arith.constant 0 : index
    %c0_0 = arith.constant 0 : index
    %c0_1 = arith.constant 0 : index
    %0 = vector.load %arg0[%c0, %c0_0, %c0_1] : memref<2x32x32xf32, #tpu.memory_space<vmem>>, vector<1x32x32xf32>
    %1 = vector.shape_cast %0 : vector<1x32x32xf32> to vector<32x32xf32>
    %c0_2 = arith.constant 0 : index
    %c0_3 = arith.constant 0 : index
    %2 = vector.load %arg1[%c0_2, %c0_3] : memref<32x32xf32, #tpu.memory_space<vmem>>, vector<32x32xf32>
    %3 = arith.truncf %1 : vector<32x32xf32> to vector<32x32xbf16>
    %4 = arith.truncf %2 : vector<32x32xf32> to vector<32x32xbf16>
    %cst = arith.constant dense<0.000000e+00> : vector<32x32xf32>
    %5 = tpu.matmul %3, %4, %cst {dimension_numbers = #tpu.dot_dimension_numbers<[1], [0], [0], [1], [0, 0, 1, 1], [], []>} : vector<32x32xbf16>, vector<32x32xbf16>, vector<32x32xf32> -> vector<32x32xf32>
    %c1 = arith.constant 1 : index
    %c0_4 = arith.constant 0 : index
    %c0_5 = arith.constant 0 : index
    %6 = vector.load %arg0[%c1, %c0_4, %c0_5] : memref<2x32x32xf32, #tpu.memory_space<vmem>>, vector<1x32x32xf32>
    %7 = vector.shape_cast %6 : vector<1x32x32xf32> to vector<32x32xf32>
    %c0_6 = arith.constant 0 : index
    %c0_7 = arith.constant 0 : index
    %8 = vector.load %arg2[%c0_6, %c0_7] : memref<32x32xf32, #tpu.memory_space<vmem>>, vector<32x32xf32>
    %9 = arith.truncf %7 : vector<32x32xf32> to vector<32x32xbf16>
    %10 = arith.truncf %8 : vector<32x32xf32> to vector<32x32xbf16>
    %cst_8 = arith.constant dense<0.000000e+00> : vector<32x32xf32>
    %11 = tpu.matmul %9, %10, %cst_8 {dimension_numbers = #tpu.dot_dimension_numbers<[1], [0], [0], [1], [0, 0, 1, 1], [], []>} : vector<32x32xbf16>, vector<32x32xbf16>, vector<32x32xf32> -> vector<32x32xf32>
    %12 = arith.addf %5, %11 : vector<32x32xf32>
    %c0_9 = arith.constant 0 : index
    %c0_10 = arith.constant 0 : index
    %13 = vector.load %arg3[%c0_9, %c0_10] : memref<1x32xf32, #tpu.memory_space<vmem>>, vector<1x32xf32>
    %14 = vector.broadcast %13 : vector<1x32xf32> to vector<32x32xf32>
    %15 = arith.addf %12, %14 : vector<32x32xf32>
    %c0_11 = arith.constant 0 : index
    %c0_12 = arith.constant 0 : index
    %16 = vector.load %arg4[%c0_11, %c0_12] : memref<1x32xf32, #tpu.memory_space<vmem>>, vector<1x32xf32>
    %c0_13 = arith.constant 0 : index
    %c0_14 = arith.constant 0 : index
    %17 = vector.load %arg5[%c0_13, %c0_14] : memref<1x32xf32, #tpu.memory_space<vmem>>, vector<1x32xf32>
    %cst_15 = arith.constant dense<0.000000e+00> : vector<32xf32>
    %18 = vector.multi_reduction <add>, %15, %cst_15 [1] : vector<32x32xf32> to vector<32xf32>
    %19 = vector.shape_cast %18 : vector<32xf32> to vector<32x1xf32>
    %cst_16 = arith.constant 3.200000e+01 : f32
    %20 = vector.broadcast %cst_16 : f32 to vector<32x1xf32>
    %21 = arith.divf %19, %20 : vector<32x1xf32>
    %22 = vector.broadcast %21 : vector<32x1xf32> to vector<32x32xf32>
    %23 = arith.subf %15, %22 : vector<32x32xf32>
    %24 = arith.mulf %23, %23 : vector<32x32xf32>
    %cst_17 = arith.constant dense<0.000000e+00> : vector<32xf32>
    %25 = vector.multi_reduction <add>, %24, %cst_17 [1] : vector<32x32xf32> to vector<32xf32>
    %26 = vector.shape_cast %25 : vector<32xf32> to vector<32x1xf32>
    %cst_18 = arith.constant 3.200000e+01 : f32
    %27 = vector.broadcast %cst_18 : f32 to vector<32x1xf32>
    %28 = arith.divf %26, %27 : vector<32x1xf32>
    %cst_19 = arith.constant 9.99999974E-6 : f32
    %29 = vector.broadcast %cst_19 : f32 to vector<32x1xf32>
    %30 = arith.addf %28, %29 : vector<32x1xf32>
    %31 = math.rsqrt %30 : vector<32x1xf32>
    %32 = vector.broadcast %31 : vector<32x1xf32> to vector<32x32xf32>
    %33 = arith.mulf %23, %32 : vector<32x32xf32>
    %34 = vector.broadcast %16 : vector<1x32xf32> to vector<32x32xf32>
    %35 = arith.mulf %33, %34 : vector<32x32xf32>
    %36 = vector.broadcast %17 : vector<1x32xf32> to vector<32x32xf32>
    %37 = arith.addf %35, %36 : vector<32x32xf32>
    %c0_20 = arith.constant 0 : index
    %c0_21 = arith.constant 0 : index
    %38 = vector.load %arg6[%c0_20, %c0_21] : memref<32x2xf32, #tpu.memory_space<vmem>>, vector<32x2xf32>
    %39 = arith.truncf %37 : vector<32x32xf32> to vector<32x32xbf16>
    %40 = arith.truncf %38 : vector<32x2xf32> to vector<32x2xbf16>
    %cst_22 = arith.constant dense<0.000000e+00> : vector<32x2xf32>
    %41 = tpu.matmul %39, %40, %cst_22 {dimension_numbers = #tpu.dot_dimension_numbers<[1], [0], [0], [1], [0, 0, 1, 1], [], []>} : vector<32x32xbf16>, vector<32x2xbf16>, vector<32x2xf32> -> vector<32x2xf32>
    %c0_23 = arith.constant 0 : index
    %c0_24 = arith.constant 0 : index
    %42 = vector.load %arg7[%c0_23, %c0_24] : memref<1x2xf32, #tpu.memory_space<vmem>>, vector<1x2xf32>
    %43 = vector.broadcast %42 : vector<1x2xf32> to vector<32x2xf32>
    %44 = arith.addf %41, %43 : vector<32x2xf32>
    %c0_25 = arith.constant 0 : index
    %c0_26 = arith.constant 0 : index
    %45 = vector.load %arg8[%c0_25, %c0_26] : memref<32x2xf32, #tpu.memory_space<vmem>>, vector<32x2xf32>
    tpu.vector_store %arg8[%c0_25, %c0_26], %44 {strides = array<i32>} : memref<32x2xf32, #tpu.memory_space<vmem>>, vector<32x2xf32>,
    return
  }
}

module attributes {stable_mosaic.version = 11 : i64} {
  func.func @_branch_encoder_kernel(%arg0: i32, %arg1: memref<1x32x12xf32, #tpu.memory_space<vmem>>, %arg2: memref<32x32xf32, #tpu.memory_space<vmem>>, %arg3: memref<32x32xf32, #tpu.memory_space<vmem>>, %arg4: memref<32x32xf32, #tpu.memory_space<vmem>>, %arg5: memref<1x12x32xf32, #tpu.memory_space<vmem>>, %arg6: memref<1x1x32xf32, #tpu.memory_space<vmem>>, %arg7: memref<1x2x1x32xf32, #tpu.memory_space<vmem>>, %arg8: memref<1x2x1x32xf32, #tpu.memory_space<vmem>>, %arg9: memref<1x2x1x32xf32, #tpu.memory_space<vmem>>, %arg10: memref<1x2x1x32xf32, #tpu.memory_space<vmem>>, %arg11: memref<1x2x32x64xf32, #tpu.memory_space<vmem>>, %arg12: memref<1x2x1x64xf32, #tpu.memory_space<vmem>>, %arg13: memref<1x2x32x32xf32, #tpu.memory_space<vmem>>, %arg14: memref<1x2x1x32xf32, #tpu.memory_space<vmem>>, %arg15: memref<1x2x32x32xf32, #tpu.memory_space<vmem>>, %arg16: memref<1x2x1x32xf32, #tpu.memory_space<vmem>>, %arg17: memref<1x2x32x64xf32, #tpu.memory_space<vmem>>, %arg18: memref<1x2x1x64xf32, #tpu.memory_space<vmem>>, %arg19: memref<1x2x64x32xf32, #tpu.memory_space<vmem>>, %arg20: memref<1x2x1x32xf32, #tpu.memory_space<vmem>>, %arg21: memref<1x32x32xf32, #tpu.memory_space<vmem>>) attributes {dimension_semantics = [#tpu.dimension_semantics<parallel>], iteration_bounds = array<i64: 2>, scalar_prefetch = 0 : i64, scratch_operands = 0 : i64, tpu.core_type = #tpu.core_type<tc>, window_params = [{transform_indices = @transform_0, window_bounds = array<i64: 1, 32, 12>}, {pipeline_mode = #tpu.pipeline_mode<synchronous>, transform_indices = @transform_1, window_bounds = array<i64: 32, 32>}, {pipeline_mode = #tpu.pipeline_mode<synchronous>, transform_indices = @transform_2, window_bounds = array<i64: 32, 32>}, {pipeline_mode = #tpu.pipeline_mode<synchronous>, transform_indices = @transform_3, window_bounds = array<i64: 32, 32>}, {transform_indices = @transform_4, window_bounds = array<i64: 1, 12, 32>}, {transform_indices = @transform_5, window_bounds = array<i64: 1, 1, 32>}, {transform_indices = @transform_6, window_bounds = array<i64: 1, 2, 1, 32>}, {transform_indices = @transform_7, window_bounds = array<i64: 1, 2, 1, 32>}, {transform_indices = @transform_8, window_bounds = array<i64: 1, 2, 1, 32>}, {transform_indices = @transform_9, window_bounds = array<i64: 1, 2, 1, 32>}, {transform_indices = @transform_10, window_bounds = array<i64: 1, 2, 32, 64>}, {transform_indices = @transform_11, window_bounds = array<i64: 1, 2, 1, 64>}, {transform_indices = @transform_12, window_bounds = array<i64: 1, 2, 32, 32>}, {transform_indices = @transform_13, window_bounds = array<i64: 1, 2, 1, 32>}, {transform_indices = @transform_14, window_bounds = array<i64: 1, 2, 32, 32>}, {transform_indices = @transform_15, window_bounds = array<i64: 1, 2, 1, 32>}, {transform_indices = @transform_16, window_bounds = array<i64: 1, 2, 32, 64>}, {transform_indices = @transform_17, window_bounds = array<i64: 1, 2, 1, 64>}, {transform_indices = @transform_18, window_bounds = array<i64: 1, 2, 64, 32>}, {transform_indices = @transform_19, window_bounds = array<i64: 1, 2, 1, 32>}, {transform_indices = @transform_20, window_bounds = array<i64: 1, 32, 32>}]} {
    %c0 = arith.constant 0 : index
    %c0_0 = arith.constant 0 : index
    %0 = vector.load %arg2[%c0, %c0_0] : memref<32x32xf32, #tpu.memory_space<vmem>>, vector<32x32xf32>
    %c0_1 = arith.constant 0 : index
    %c0_2 = arith.constant 0 : index
    %1 = vector.load %arg3[%c0_1, %c0_2] : memref<32x32xf32, #tpu.memory_space<vmem>>, vector<32x32xf32>
    %c0_3 = arith.constant 0 : index
    %c0_4 = arith.constant 0 : index
    %2 = vector.load %arg4[%c0_3, %c0_4] : memref<32x32xf32, #tpu.memory_space<vmem>>, vector<32x32xf32>
    %c0_5 = arith.constant 0 : index
    %c0_6 = arith.constant 0 : index
    %c0_7 = arith.constant 0 : index
    %3 = vector.load %arg1[%c0_5, %c0_6, %c0_7] : memref<1x32x12xf32, #tpu.memory_space<vmem>>, vector<1x32x12xf32>
    %4 = vector.shape_cast %3 : vector<1x32x12xf32> to vector<32x12xf32>
    %c0_8 = arith.constant 0 : index
    %c0_9 = arith.constant 0 : index
    %c0_10 = arith.constant 0 : index
    %5 = vector.load %arg5[%c0_8, %c0_9, %c0_10] : memref<1x12x32xf32, #tpu.memory_space<vmem>>, vector<1x12x32xf32>
    %6 = vector.shape_cast %5 : vector<1x12x32xf32> to vector<12x32xf32>
    %7 = arith.truncf %4 : vector<32x12xf32> to vector<32x12xbf16>
    %8 = arith.truncf %6 : vector<12x32xf32> to vector<12x32xbf16>
    %cst = arith.constant dense<0.000000e+00> : vector<32x32xf32>
    %9 = tpu.matmul %7, %8, %cst {dimension_numbers = #tpu.dot_dimension_numbers<[1], [0], [0], [1], [0, 0, 1, 1], [], []>} : vector<32x12xbf16>, vector<12x32xbf16>, vector<32x32xf32> -> vector<32x32xf32>
    %c0_11 = arith.constant 0 : index
    %c0_12 = arith.constant 0 : index
    %c0_13 = arith.constant 0 : index
    %10 = vector.load %arg6[%c0_11, %c0_12, %c0_13] : memref<1x1x32xf32, #tpu.memory_space<vmem>>, vector<1x1x32xf32>
    %11 = vector.shape_cast %10 : vector<1x1x32xf32> to vector<1x32xf32>
    %12 = vector.broadcast %11 : vector<1x32xf32> to vector<32x32xf32>
    %13 = arith.addf %9, %12 : vector<32x32xf32>
    %c0_14 = arith.constant 0 : index
    %c0_15 = arith.constant 0 : index
    %c0_16 = arith.constant 0 : index
    %c0_17 = arith.constant 0 : index
    %14 = vector.load %arg7[%c0_14, %c0_15, %c0_16, %c0_17] : memref<1x2x1x32xf32, #tpu.memory_space<vmem>>, vector<1x1x1x32xf32>
    %15 = vector.shape_cast %14 : vector<1x1x1x32xf32> to vector<1x32xf32>
    %c0_18 = arith.constant 0 : index
    %c0_19 = arith.constant 0 : index
    %c0_20 = arith.constant 0 : index
    %c0_21 = arith.constant 0 : index
    %16 = vector.load %arg8[%c0_18, %c0_19, %c0_20, %c0_21] : memref<1x2x1x32xf32, #tpu.memory_space<vmem>>, vector<1x1x1x32xf32>
    %17 = vector.shape_cast %16 : vector<1x1x1x32xf32> to vector<1x32xf32>
    %cst_22 = arith.constant dense<0.000000e+00> : vector<32xf32>
    %18 = vector.multi_reduction <add>, %13, %cst_22 [1] : vector<32x32xf32> to vector<32xf32>
    %19 = vector.shape_cast %18 : vector<32xf32> to vector<32x1xf32>
    %cst_23 = arith.constant 3.200000e+01 : f32
    %20 = vector.broadcast %cst_23 : f32 to vector<32x1xf32>
    %21 = arith.divf %19, %20 : vector<32x1xf32>
    %22 = vector.broadcast %21 : vector<32x1xf32> to vector<32x32xf32>
    %23 = arith.subf %13, %22 : vector<32x32xf32>
    %24 = arith.mulf %23, %23 : vector<32x32xf32>
    %cst_24 = arith.constant dense<0.000000e+00> : vector<32xf32>
    %25 = vector.multi_reduction <add>, %24, %cst_24 [1] : vector<32x32xf32> to vector<32xf32>
    %26 = vector.shape_cast %25 : vector<32xf32> to vector<32x1xf32>
    %cst_25 = arith.constant 3.200000e+01 : f32
    %27 = vector.broadcast %cst_25 : f32 to vector<32x1xf32>
    %28 = arith.divf %26, %27 : vector<32x1xf32>
    %cst_26 = arith.constant 9.99999974E-6 : f32
    %29 = vector.broadcast %cst_26 : f32 to vector<32x1xf32>
    %30 = arith.addf %28, %29 : vector<32x1xf32>
    %31 = math.rsqrt %30 : vector<32x1xf32>
    %32 = vector.broadcast %31 : vector<32x1xf32> to vector<32x32xf32>
    %33 = arith.mulf %23, %32 : vector<32x32xf32>
    %34 = vector.broadcast %15 : vector<1x32xf32> to vector<32x32xf32>
    %35 = arith.mulf %33, %34 : vector<32x32xf32>
    %36 = vector.broadcast %17 : vector<1x32xf32> to vector<32x32xf32>
    %37 = arith.addf %35, %36 : vector<32x32xf32>
    %38 = arith.mulf %37, %0 : vector<32x32xf32>
    %39 = arith.truncf %37 : vector<32x32xf32> to vector<32x32xbf16>
    %40 = arith.truncf %2 : vector<32x32xf32> to vector<32x32xbf16>
    %cst_27 = arith.constant dense<0.000000e+00> : vector<32x32xf32>
    %41 = tpu.matmul %39, %40, %cst_27 {dimension_numbers = #tpu.dot_dimension_numbers<[1], [0], [0], [1], [0, 0, 1, 1], [], []>} : vector<32x32xbf16>, vector<32x32xbf16>, vector<32x32xf32> -> vector<32x32xf32>
    %42 = arith.mulf %41, %1 : vector<32x32xf32>
    %43 = arith.addf %38, %42 : vector<32x32xf32>
    %c0_28 = arith.constant 0 : index
    %c0_29 = arith.constant 0 : index
    %c0_30 = arith.constant 0 : index
    %c0_31 = arith.constant 0 : index
    %44 = vector.load %arg11[%c0_28, %c0_29, %c0_30, %c0_31] : memref<1x2x32x64xf32, #tpu.memory_space<vmem>>, vector<1x1x32x64xf32>
    %45 = vector.shape_cast %44 : vector<1x1x32x64xf32> to vector<32x64xf32>
    %46 = arith.truncf %43 : vector<32x32xf32> to vector<32x32xbf16>
    %47 = arith.truncf %45 : vector<32x64xf32> to vector<32x64xbf16>
    %cst_32 = arith.constant dense<0.000000e+00> : vector<32x64xf32>
    %48 = tpu.matmul %46, %47, %cst_32 {dimension_numbers = #tpu.dot_dimension_numbers<[1], [0], [0], [1], [0, 0, 1, 1], [], []>} : vector<32x32xbf16>, vector<32x64xbf16>, vector<32x64xf32> -> vector<32x64xf32>
    %c0_33 = arith.constant 0 : index
    %c0_34 = arith.constant 0 : index
    %c0_35 = arith.constant 0 : index
    %c0_36 = arith.constant 0 : index
    %49 = vector.load %arg12[%c0_33, %c0_34, %c0_35, %c0_36] : memref<1x2x1x64xf32, #tpu.memory_space<vmem>>, vector<1x1x1x64xf32>
    %50 = vector.shape_cast %49 : vector<1x1x1x64xf32> to vector<1x64xf32>
    %51 = vector.broadcast %50 : vector<1x64xf32> to vector<32x64xf32>
    %52 = arith.addf %48, %51 : vector<32x64xf32>
    %c0_37 = arith.constant 0 : index
    %c0_38 = arith.constant 0 : index
    %c0_39 = arith.constant 0 : index
    %c0_40 = arith.constant 0 : index
    %53 = vector.load %arg13[%c0_37, %c0_38, %c0_39, %c0_40] : memref<1x2x32x32xf32, #tpu.memory_space<vmem>>, vector<1x1x32x32xf32>
    %54 = vector.shape_cast %53 : vector<1x1x32x32xf32> to vector<32x32xf32>
    %55 = arith.truncf %37 : vector<32x32xf32> to vector<32x32xbf16>
    %56 = arith.truncf %54 : vector<32x32xf32> to vector<32x32xbf16>
    %cst_41 = arith.constant dense<0.000000e+00> : vector<32x32xf32>
    %57 = tpu.matmul %55, %56, %cst_41 {dimension_numbers = #tpu.dot_dimension_numbers<[1], [0], [0], [1], [0, 0, 1, 1], [], []>} : vector<32x32xbf16>, vector<32x32xbf16>, vector<32x32xf32> -> vector<32x32xf32>
    %c0_42 = arith.constant 0 : index
    %c0_43 = arith.constant 0 : index
    %c0_44 = arith.constant 0 : index
    %c0_45 = arith.constant 0 : index
    %58 = vector.load %arg14[%c0_42, %c0_43, %c0_44, %c0_45] : memref<1x2x1x32xf32, #tpu.memory_space<vmem>>, vector<1x1x1x32xf32>
    %59 = vector.shape_cast %58 : vector<1x1x1x32xf32> to vector<1x32xf32>
    %60 = vector.broadcast %59 : vector<1x32xf32> to vector<32x32xf32>
    %61 = arith.addf %57, %60 : vector<32x32xf32>
    %62 = vector.extract_strided_slice %52 {offsets = [0, 0], sizes = [16, 8], strides = [1, 1]} : vector<32x64xf32> to vector<16x8xf32>
    %63 = vector.extract_strided_slice %52 {offsets = [0, 32], sizes = [16, 8], strides = [1, 1]} : vector<32x64xf32> to vector<16x8xf32>
    %64 = vector.extract_strided_slice %61 {offsets = [0, 0], sizes = [16, 8], strides = [1, 1]} : vector<32x32xf32> to vector<16x8xf32>
    %65 = arith.truncf %62 : vector<16x8xf32> to vector<16x8xbf16>
    %66 = arith.truncf %63 : vector<16x8xf32> to vector<16x8xbf16>
    %cst_46 = arith.constant dense<0.000000e+00> : vector<16x16xf32>
    %67 = tpu.matmul %65, %66, %cst_46 {dimension_numbers = #tpu.dot_dimension_numbers<[1], [1], [0], [0], [0, 0, 1, 0], [], []>} : vector<16x8xbf16>, vector<16x8xbf16>, vector<16x16xf32> -> vector<16x16xf32>
    %cst_47 = arith.constant 0.353553385 : f32
    %68 = vector.broadcast %cst_47 : f32 to vector<16x16xf32>
    %69 = arith.mulf %67, %68 : vector<16x16xf32>
    %cst_48 = arith.constant dense<0xFF800000> : vector<16xf32>
    %70 = vector.multi_reduction <maximumf>, %69, %cst_48 [1] : vector<16x16xf32> to vector<16xf32>
    %71 = vector.shape_cast %70 : vector<16xf32> to vector<16x1xf32>
    %72 = vector.broadcast %71 : vector<16x1xf32> to vector<16x16xf32>
    %73 = arith.subf %69, %72 : vector<16x16xf32>
    %74 = math.exp %73 : vector<16x16xf32>
    %cst_49 = arith.constant dense<0.000000e+00> : vector<16xf32>
    %75 = vector.multi_reduction <add>, %74, %cst_49 [1] : vector<16x16xf32> to vector<16xf32>
    %76 = vector.shape_cast %75 : vector<16xf32> to vector<16x1xf32>
    %77 = vector.broadcast %76 : vector<16x1xf32> to vector<16x16xf32>
    %78 = arith.divf %74, %77 : vector<16x16xf32>
    %79 = arith.truncf %78 : vector<16x16xf32> to vector<16x16xbf16>
    %80 = arith.truncf %64 : vector<16x8xf32> to vector<16x8xbf16>
    %cst_50 = arith.constant dense<0.000000e+00> : vector<16x8xf32>
    %81 = tpu.matmul %79, %80, %cst_50 {dimension_numbers = #tpu.dot_dimension_numbers<[1], [0], [0], [1], [0, 0, 1, 1], [], []>} : vector<16x16xbf16>, vector<16x8xbf16>, vector<16x8xf32> -> vector<16x8xf32>
    %82 = vector.extract_strided_slice %52 {offsets = [0, 8], sizes = [16, 8], strides = [1, 1]} : vector<32x64xf32> to vector<16x8xf32>
    %83 = vector.extract_strided_slice %52 {offsets = [0, 40], sizes = [16, 8], strides = [1, 1]} : vector<32x64xf32> to vector<16x8xf32>
    %84 = vector.extract_strided_slice %61 {offsets = [0, 8], sizes = [16, 8], strides = [1, 1]} : vector<32x32xf32> to vector<16x8xf32>
    %85 = arith.truncf %82 : vector<16x8xf32> to vector<16x8xbf16>
    %86 = arith.truncf %83 : vector<16x8xf32> to vector<16x8xbf16>
    %cst_51 = arith.constant dense<0.000000e+00> : vector<16x16xf32>
    %87 = tpu.matmul %85, %86, %cst_51 {dimension_numbers = #tpu.dot_dimension_numbers<[1], [1], [0], [0], [0, 0, 1, 0], [], []>} : vector<16x8xbf16>, vector<16x8xbf16>, vector<16x16xf32> -> vector<16x16xf32>
    %cst_52 = arith.constant 0.353553385 : f32
    %88 = vector.broadcast %cst_52 : f32 to vector<16x16xf32>
    %89 = arith.mulf %87, %88 : vector<16x16xf32>
    %cst_53 = arith.constant dense<0xFF800000> : vector<16xf32>
    %90 = vector.multi_reduction <maximumf>, %89, %cst_53 [1] : vector<16x16xf32> to vector<16xf32>
    %91 = vector.shape_cast %90 : vector<16xf32> to vector<16x1xf32>
    %92 = vector.broadcast %91 : vector<16x1xf32> to vector<16x16xf32>
    %93 = arith.subf %89, %92 : vector<16x16xf32>
    %94 = math.exp %93 : vector<16x16xf32>
    %cst_54 = arith.constant dense<0.000000e+00> : vector<16xf32>
    %95 = vector.multi_reduction <add>, %94, %cst_54 [1] : vector<16x16xf32> to vector<16xf32>
    %96 = vector.shape_cast %95 : vector<16xf32> to vector<16x1xf32>
    %97 = vector.broadcast %96 : vector<16x1xf32> to vector<16x16xf32>
    %98 = arith.divf %94, %97 : vector<16x16xf32>
    %99 = arith.truncf %98 : vector<16x16xf32> to vector<16x16xbf16>
    %100 = arith.truncf %84 : vector<16x8xf32> to vector<16x8xbf16>
    %cst_55 = arith.constant dense<0.000000e+00> : vector<16x8xf32>
    %101 = tpu.matmul %99, %100, %cst_55 {dimension_numbers = #tpu.dot_dimension_numbers<[1], [0], [0], [1], [0, 0, 1, 1], [], []>} : vector<16x16xbf16>, vector<16x8xbf16>, vector<16x8xf32> -> vector<16x8xf32>
    %102 = vector.extract_strided_slice %52 {offsets = [0, 16], sizes = [16, 8], strides = [1, 1]} : vector<32x64xf32> to vector<16x8xf32>
    %103 = vector.extract_strided_slice %52 {offsets = [0, 48], sizes = [16, 8], strides = [1, 1]} : vector<32x64xf32> to vector<16x8xf32>
    %104 = vector.extract_strided_slice %61 {offsets = [0, 16], sizes = [16, 8], strides = [1, 1]} : vector<32x32xf32> to vector<16x8xf32>
    %105 = arith.truncf %102 : vector<16x8xf32> to vector<16x8xbf16>
    %106 = arith.truncf %103 : vector<16x8xf32> to vector<16x8xbf16>
    %cst_56 = arith.constant dense<0.000000e+00> : vector<16x16xf32>
    %107 = tpu.matmul %105, %106, %cst_56 {dimension_numbers = #tpu.dot_dimension_numbers<[1], [1], [0], [0], [0, 0, 1, 0], [], []>} : vector<16x8xbf16>, vector<16x8xbf16>, vector<16x16xf32> -> vector<16x16xf32>
    %cst_57 = arith.constant 0.353553385 : f32
    %108 = vector.broadcast %cst_57 : f32 to vector<16x16xf32>
    %109 = arith.mulf %107, %108 : vector<16x16xf32>
    %cst_58 = arith.constant dense<0xFF800000> : vector<16xf32>
    %110 = vector.multi_reduction <maximumf>, %109, %cst_58 [1] : vector<16x16xf32> to vector<16xf32>
    %111 = vector.shape_cast %110 : vector<16xf32> to vector<16x1xf32>
    %112 = vector.broadcast %111 : vector<16x1xf32> to vector<16x16xf32>
    %113 = arith.subf %109, %112 : vector<16x16xf32>
    %114 = math.exp %113 : vector<16x16xf32>
    %cst_59 = arith.constant dense<0.000000e+00> : vector<16xf32>
    %115 = vector.multi_reduction <add>, %114, %cst_59 [1] : vector<16x16xf32> to vector<16xf32>
    %116 = vector.shape_cast %115 : vector<16xf32> to vector<16x1xf32>
    %117 = vector.broadcast %116 : vector<16x1xf32> to vector<16x16xf32>
    %118 = arith.divf %114, %117 : vector<16x16xf32>
    %119 = arith.truncf %118 : vector<16x16xf32> to vector<16x16xbf16>
    %120 = arith.truncf %104 : vector<16x8xf32> to vector<16x8xbf16>
    %cst_60 = arith.constant dense<0.000000e+00> : vector<16x8xf32>
    %121 = tpu.matmul %119, %120, %cst_60 {dimension_numbers = #tpu.dot_dimension_numbers<[1], [0], [0], [1], [0, 0, 1, 1], [], []>} : vector<16x16xbf16>, vector<16x8xbf16>, vector<16x8xf32> -> vector<16x8xf32>
    %122 = vector.extract_strided_slice %52 {offsets = [0, 24], sizes = [16, 8], strides = [1, 1]} : vector<32x64xf32> to vector<16x8xf32>
    %123 = vector.extract_strided_slice %52 {offsets = [0, 56], sizes = [16, 8], strides = [1, 1]} : vector<32x64xf32> to vector<16x8xf32>
    %124 = vector.extract_strided_slice %61 {offsets = [0, 24], sizes = [16, 8], strides = [1, 1]} : vector<32x32xf32> to vector<16x8xf32>
    %125 = arith.truncf %122 : vector<16x8xf32> to vector<16x8xbf16>
    %126 = arith.truncf %123 : vector<16x8xf32> to vector<16x8xbf16>
    %cst_61 = arith.constant dense<0.000000e+00> : vector<16x16xf32>
    %127 = tpu.matmul %125, %126, %cst_61 {dimension_numbers = #tpu.dot_dimension_numbers<[1], [1], [0], [0], [0, 0, 1, 0], [], []>} : vector<16x8xbf16>, vector<16x8xbf16>, vector<16x16xf32> -> vector<16x16xf32>
    %cst_62 = arith.constant 0.353553385 : f32
    %128 = vector.broadcast %cst_62 : f32 to vector<16x16xf32>
    %129 = arith.mulf %127, %128 : vector<16x16xf32>
    %cst_63 = arith.constant dense<0xFF800000> : vector<16xf32>
    %130 = vector.multi_reduction <maximumf>, %129, %cst_63 [1] : vector<16x16xf32> to vector<16xf32>
    %131 = vector.shape_cast %130 : vector<16xf32> to vector<16x1xf32>
    %132 = vector.broadcast %131 : vector<16x1xf32> to vector<16x16xf32>
    %133 = arith.subf %129, %132 : vector<16x16xf32>
    %134 = math.exp %133 : vector<16x16xf32>
    %cst_64 = arith.constant dense<0.000000e+00> : vector<16xf32>
    %135 = vector.multi_reduction <add>, %134, %cst_64 [1] : vector<16x16xf32> to vector<16xf32>
    %136 = vector.shape_cast %135 : vector<16xf32> to vector<16x1xf32>
    %137 = vector.broadcast %136 : vector<16x1xf32> to vector<16x16xf32>
    %138 = arith.divf %134, %137 : vector<16x16xf32>
    %139 = arith.truncf %138 : vector<16x16xf32> to vector<16x16xbf16>
    %140 = arith.truncf %124 : vector<16x8xf32> to vector<16x8xbf16>
    %cst_65 = arith.constant dense<0.000000e+00> : vector<16x8xf32>
    %141 = tpu.matmul %139, %140, %cst_65 {dimension_numbers = #tpu.dot_dimension_numbers<[1], [0], [0], [1], [0, 0, 1, 1], [], []>} : vector<16x16xbf16>, vector<16x8xbf16>, vector<16x8xf32> -> vector<16x8xf32>
    %142 = tpu.concatenate %81, %101, %121, %141 in 1 : vector<16x8xf32>, vector<16x8xf32>, vector<16x8xf32>, vector<16x8xf32> -> vector<16x32xf32>
    %143 = vector.extract_strided_slice %52 {offsets = [16, 0], sizes = [16, 8], strides = [1, 1]} : vector<32x64xf32> to vector<16x8xf32>
    %144 = vector.extract_strided_slice %52 {offsets = [16, 32], sizes = [16, 8], strides = [1, 1]} : vector<32x64xf32> to vector<16x8xf32>
    %145 = vector.extract_strided_slice %61 {offsets = [16, 0], sizes = [16, 8], strides = [1, 1]} : vector<32x32xf32> to vector<16x8xf32>
    %146 = arith.truncf %143 : vector<16x8xf32> to vector<16x8xbf16>
    %147 = arith.truncf %144 : vector<16x8xf32> to vector<16x8xbf16>
    %cst_66 = arith.constant dense<0.000000e+00> : vector<16x16xf32>
    %148 = tpu.matmul %146, %147, %cst_66 {dimension_numbers = #tpu.dot_dimension_numbers<[1], [1], [0], [0], [0, 0, 1, 0], [], []>} : vector<16x8xbf16>, vector<16x8xbf16>, vector<16x16xf32> -> vector<16x16xf32>
    %cst_67 = arith.constant 0.353553385 : f32
    %149 = vector.broadcast %cst_67 : f32 to vector<16x16xf32>
    %150 = arith.mulf %148, %149 : vector<16x16xf32>
    %cst_68 = arith.constant dense<0xFF800000> : vector<16xf32>
    %151 = vector.multi_reduction <maximumf>, %150, %cst_68 [1] : vector<16x16xf32> to vector<16xf32>
    %152 = vector.shape_cast %151 : vector<16xf32> to vector<16x1xf32>
    %153 = vector.broadcast %152 : vector<16x1xf32> to vector<16x16xf32>
    %154 = arith.subf %150, %153 : vector<16x16xf32>
    %155 = math.exp %154 : vector<16x16xf32>
    %cst_69 = arith.constant dense<0.000000e+00> : vector<16xf32>
    %156 = vector.multi_reduction <add>, %155, %cst_69 [1] : vector<16x16xf32> to vector<16xf32>
    %157 = vector.shape_cast %156 : vector<16xf32> to vector<16x1xf32>
    %158 = vector.broadcast %157 : vector<16x1xf32> to vector<16x16xf32>
    %159 = arith.divf %155, %158 : vector<16x16xf32>
    %160 = arith.truncf %159 : vector<16x16xf32> to vector<16x16xbf16>
    %161 = arith.truncf %145 : vector<16x8xf32> to vector<16x8xbf16>
    %cst_70 = arith.constant dense<0.000000e+00> : vector<16x8xf32>
    %162 = tpu.matmul %160, %161, %cst_70 {dimension_numbers = #tpu.dot_dimension_numbers<[1], [0], [0], [1], [0, 0, 1, 1], [], []>} : vector<16x16xbf16>, vector<16x8xbf16>, vector<16x8xf32> -> vector<16x8xf32>
    %163 = vector.extract_strided_slice %52 {offsets = [16, 8], sizes = [16, 8], strides = [1, 1]} : vector<32x64xf32> to vector<16x8xf32>
    %164 = vector.extract_strided_slice %52 {offsets = [16, 40], sizes = [16, 8], strides = [1, 1]} : vector<32x64xf32> to vector<16x8xf32>
    %165 = vector.extract_strided_slice %61 {offsets = [16, 8], sizes = [16, 8], strides = [1, 1]} : vector<32x32xf32> to vector<16x8xf32>
    %166 = arith.truncf %163 : vector<16x8xf32> to vector<16x8xbf16>
    %167 = arith.truncf %164 : vector<16x8xf32> to vector<16x8xbf16>
    %cst_71 = arith.constant dense<0.000000e+00> : vector<16x16xf32>
    %168 = tpu.matmul %166, %167, %cst_71 {dimension_numbers = #tpu.dot_dimension_numbers<[1], [1], [0], [0], [0, 0, 1, 0], [], []>} : vector<16x8xbf16>, vector<16x8xbf16>, vector<16x16xf32> -> vector<16x16xf32>
    %cst_72 = arith.constant 0.353553385 : f32
    %169 = vector.broadcast %cst_72 : f32 to vector<16x16xf32>
    %170 = arith.mulf %168, %169 : vector<16x16xf32>
    %cst_73 = arith.constant dense<0xFF800000> : vector<16xf32>
    %171 = vector.multi_reduction <maximumf>, %170, %cst_73 [1] : vector<16x16xf32> to vector<16xf32>
    %172 = vector.shape_cast %171 : vector<16xf32> to vector<16x1xf32>
    %173 = vector.broadcast %172 : vector<16x1xf32> to vector<16x16xf32>
    %174 = arith.subf %170, %173 : vector<16x16xf32>
    %175 = math.exp %174 : vector<16x16xf32>
    %cst_74 = arith.constant dense<0.000000e+00> : vector<16xf32>
    %176 = vector.multi_reduction <add>, %175, %cst_74 [1] : vector<16x16xf32> to vector<16xf32>
    %177 = vector.shape_cast %176 : vector<16xf32> to vector<16x1xf32>
    %178 = vector.broadcast %177 : vector<16x1xf32> to vector<16x16xf32>
    %179 = arith.divf %175, %178 : vector<16x16xf32>
    %180 = arith.truncf %179 : vector<16x16xf32> to vector<16x16xbf16>
    %181 = arith.truncf %165 : vector<16x8xf32> to vector<16x8xbf16>
    %cst_75 = arith.constant dense<0.000000e+00> : vector<16x8xf32>
    %182 = tpu.matmul %180, %181, %cst_75 {dimension_numbers = #tpu.dot_dimension_numbers<[1], [0], [0], [1], [0, 0, 1, 1], [], []>} : vector<16x16xbf16>, vector<16x8xbf16>, vector<16x8xf32> -> vector<16x8xf32>
    %183 = vector.extract_strided_slice %52 {offsets = [16, 16], sizes = [16, 8], strides = [1, 1]} : vector<32x64xf32> to vector<16x8xf32>
    %184 = vector.extract_strided_slice %52 {offsets = [16, 48], sizes = [16, 8], strides = [1, 1]} : vector<32x64xf32> to vector<16x8xf32>
    %185 = vector.extract_strided_slice %61 {offsets = [16, 16], sizes = [16, 8], strides = [1, 1]} : vector<32x32xf32> to vector<16x8xf32>
    %186 = arith.truncf %183 : vector<16x8xf32> to vector<16x8xbf16>
    %187 = arith.truncf %184 : vector<16x8xf32> to vector<16x8xbf16>
    %cst_76 = arith.constant dense<0.000000e+00> : vector<16x16xf32>
    %188 = tpu.matmul %186, %187, %cst_76 {dimension_numbers = #tpu.dot_dimension_numbers<[1], [1], [0], [0], [0, 0, 1, 0], [], []>} : vector<16x8xbf16>, vector<16x8xbf16>, vector<16x16xf32> -> vector<16x16xf32>
    %cst_77 = arith.constant 0.353553385 : f32
    %189 = vector.broadcast %cst_77 : f32 to vector<16x16xf32>
    %190 = arith.mulf %188, %189 : vector<16x16xf32>
    %cst_78 = arith.constant dense<0xFF800000> : vector<16xf32>
    %191 = vector.multi_reduction <maximumf>, %190, %cst_78 [1] : vector<16x16xf32> to vector<16xf32>
    %192 = vector.shape_cast %191 : vector<16xf32> to vector<16x1xf32>
    %193 = vector.broadcast %192 : vector<16x1xf32> to vector<16x16xf32>
    %194 = arith.subf %190, %193 : vector<16x16xf32>
    %195 = math.exp %194 : vector<16x16xf32>
    %cst_79 = arith.constant dense<0.000000e+00> : vector<16xf32>
    %196 = vector.multi_reduction <add>, %195, %cst_79 [1] : vector<16x16xf32> to vector<16xf32>
    %197 = vector.shape_cast %196 : vector<16xf32> to vector<16x1xf32>
    %198 = vector.broadcast %197 : vector<16x1xf32> to vector<16x16xf32>
    %199 = arith.divf %195, %198 : vector<16x16xf32>
    %200 = arith.truncf %199 : vector<16x16xf32> to vector<16x16xbf16>
    %201 = arith.truncf %185 : vector<16x8xf32> to vector<16x8xbf16>
    %cst_80 = arith.constant dense<0.000000e+00> : vector<16x8xf32>
    %202 = tpu.matmul %200, %201, %cst_80 {dimension_numbers = #tpu.dot_dimension_numbers<[1], [0], [0], [1], [0, 0, 1, 1], [], []>} : vector<16x16xbf16>, vector<16x8xbf16>, vector<16x8xf32> -> vector<16x8xf32>
    %203 = vector.extract_strided_slice %52 {offsets = [16, 24], sizes = [16, 8], strides = [1, 1]} : vector<32x64xf32> to vector<16x8xf32>
    %204 = vector.extract_strided_slice %52 {offsets = [16, 56], sizes = [16, 8], strides = [1, 1]} : vector<32x64xf32> to vector<16x8xf32>
    %205 = vector.extract_strided_slice %61 {offsets = [16, 24], sizes = [16, 8], strides = [1, 1]} : vector<32x32xf32> to vector<16x8xf32>
    %206 = arith.truncf %203 : vector<16x8xf32> to vector<16x8xbf16>
    %207 = arith.truncf %204 : vector<16x8xf32> to vector<16x8xbf16>
    %cst_81 = arith.constant dense<0.000000e+00> : vector<16x16xf32>
    %208 = tpu.matmul %206, %207, %cst_81 {dimension_numbers = #tpu.dot_dimension_numbers<[1], [1], [0], [0], [0, 0, 1, 0], [], []>} : vector<16x8xbf16>, vector<16x8xbf16>, vector<16x16xf32> -> vector<16x16xf32>
    %cst_82 = arith.constant 0.353553385 : f32
    %209 = vector.broadcast %cst_82 : f32 to vector<16x16xf32>
    %210 = arith.mulf %208, %209 : vector<16x16xf32>
    %cst_83 = arith.constant dense<0xFF800000> : vector<16xf32>
    %211 = vector.multi_reduction <maximumf>, %210, %cst_83 [1] : vector<16x16xf32> to vector<16xf32>
    %212 = vector.shape_cast %211 : vector<16xf32> to vector<16x1xf32>
    %213 = vector.broadcast %212 : vector<16x1xf32> to vector<16x16xf32>
    %214 = arith.subf %210, %213 : vector<16x16xf32>
    %215 = math.exp %214 : vector<16x16xf32>
    %cst_84 = arith.constant dense<0.000000e+00> : vector<16xf32>
    %216 = vector.multi_reduction <add>, %215, %cst_84 [1] : vector<16x16xf32> to vector<16xf32>
    %217 = vector.shape_cast %216 : vector<16xf32> to vector<16x1xf32>
    %218 = vector.broadcast %217 : vector<16x1xf32> to vector<16x16xf32>
    %219 = arith.divf %215, %218 : vector<16x16xf32>
    %220 = arith.truncf %219 : vector<16x16xf32> to vector<16x16xbf16>
    %221 = arith.truncf %205 : vector<16x8xf32> to vector<16x8xbf16>
    %cst_85 = arith.constant dense<0.000000e+00> : vector<16x8xf32>
    %222 = tpu.matmul %220, %221, %cst_85 {dimension_numbers = #tpu.dot_dimension_numbers<[1], [0], [0], [1], [0, 0, 1, 1], [], []>} : vector<16x16xbf16>, vector<16x8xbf16>, vector<16x8xf32> -> vector<16x8xf32>
    %223 = tpu.concatenate %162, %182, %202, %222 in 1 : vector<16x8xf32>, vector<16x8xf32>, vector<16x8xf32>, vector<16x8xf32> -> vector<16x32xf32>
    %224 = tpu.concatenate %142, %223 in 0 : vector<16x32xf32>, vector<16x32xf32> -> vector<32x32xf32>
    %c0_86 = arith.constant 0 : index
    %c0_87 = arith.constant 0 : index
    %c0_88 = arith.constant 0 : index
    %c0_89 = arith.constant 0 : index
    %225 = vector.load %arg15[%c0_86, %c0_87, %c0_88, %c0_89] : memref<1x2x32x32xf32, #tpu.memory_space<vmem>>, vector<1x1x32x32xf32>
    %226 = vector.shape_cast %225 : vector<1x1x32x32xf32> to vector<32x32xf32>
    %227 = arith.truncf %224 : vector<32x32xf32> to vector<32x32xbf16>
    %228 = arith.truncf %226 : vector<32x32xf32> to vector<32x32xbf16>
    %cst_90 = arith.constant dense<0.000000e+00> : vector<32x32xf32>
    %229 = tpu.matmul %227, %228, %cst_90 {dimension_numbers = #tpu.dot_dimension_numbers<[1], [0], [0], [1], [0, 0, 1, 1], [], []>} : vector<32x32xbf16>, vector<32x32xbf16>, vector<32x32xf32> -> vector<32x32xf32>
    %230 = arith.addf %13, %229 : vector<32x32xf32>
    %c0_91 = arith.constant 0 : index
    %c0_92 = arith.constant 0 : index
    %c0_93 = arith.constant 0 : index
    %c0_94 = arith.constant 0 : index
    %231 = vector.load %arg16[%c0_91, %c0_92, %c0_93, %c0_94] : memref<1x2x1x32xf32, #tpu.memory_space<vmem>>, vector<1x1x1x32xf32>
    %232 = vector.shape_cast %231 : vector<1x1x1x32xf32> to vector<1x32xf32>
    %233 = vector.broadcast %232 : vector<1x32xf32> to vector<32x32xf32>
    %234 = arith.addf %230, %233 : vector<32x32xf32>
    %c0_95 = arith.constant 0 : index
    %c0_96 = arith.constant 0 : index
    %c0_97 = arith.constant 0 : index
    %c0_98 = arith.constant 0 : index
    %235 = vector.load %arg9[%c0_95, %c0_96, %c0_97, %c0_98] : memref<1x2x1x32xf32, #tpu.memory_space<vmem>>, vector<1x1x1x32xf32>
    %236 = vector.shape_cast %235 : vector<1x1x1x32xf32> to vector<1x32xf32>
    %c0_99 = arith.constant 0 : index
    %c0_100 = arith.constant 0 : index
    %c0_101 = arith.constant 0 : index
    %c0_102 = arith.constant 0 : index
    %237 = vector.load %arg10[%c0_99, %c0_100, %c0_101, %c0_102] : memref<1x2x1x32xf32, #tpu.memory_space<vmem>>, vector<1x1x1x32xf32>
    %238 = vector.shape_cast %237 : vector<1x1x1x32xf32> to vector<1x32xf32>
    %cst_103 = arith.constant dense<0.000000e+00> : vector<32xf32>
    %239 = vector.multi_reduction <add>, %234, %cst_103 [1] : vector<32x32xf32> to vector<32xf32>
    %240 = vector.shape_cast %239 : vector<32xf32> to vector<32x1xf32>
    %cst_104 = arith.constant 3.200000e+01 : f32
    %241 = vector.broadcast %cst_104 : f32 to vector<32x1xf32>
    %242 = arith.divf %240, %241 : vector<32x1xf32>
    %243 = vector.broadcast %242 : vector<32x1xf32> to vector<32x32xf32>
    %244 = arith.subf %234, %243 : vector<32x32xf32>
    %245 = arith.mulf %244, %244 : vector<32x32xf32>
    %cst_105 = arith.constant dense<0.000000e+00> : vector<32xf32>
    %246 = vector.multi_reduction <add>, %245, %cst_105 [1] : vector<32x32xf32> to vector<32xf32>
    %247 = vector.shape_cast %246 : vector<32xf32> to vector<32x1xf32>
    %cst_106 = arith.constant 3.200000e+01 : f32
    %248 = vector.broadcast %cst_106 : f32 to vector<32x1xf32>
    %249 = arith.divf %247, %248 : vector<32x1xf32>
    %cst_107 = arith.constant 9.99999974E-6 : f32
    %250 = vector.broadcast %cst_107 : f32 to vector<32x1xf32>
    %251 = arith.addf %249, %250 : vector<32x1xf32>
    %252 = math.rsqrt %251 : vector<32x1xf32>
    %253 = vector.broadcast %252 : vector<32x1xf32> to vector<32x32xf32>
    %254 = arith.mulf %244, %253 : vector<32x32xf32>
    %255 = vector.broadcast %236 : vector<1x32xf32> to vector<32x32xf32>
    %256 = arith.mulf %254, %255 : vector<32x32xf32>
    %257 = vector.broadcast %238 : vector<1x32xf32> to vector<32x32xf32>
    %258 = arith.addf %256, %257 : vector<32x32xf32>
    %c0_108 = arith.constant 0 : index
    %c0_109 = arith.constant 0 : index
    %c0_110 = arith.constant 0 : index
    %c0_111 = arith.constant 0 : index
    %259 = vector.load %arg17[%c0_108, %c0_109, %c0_110, %c0_111] : memref<1x2x32x64xf32, #tpu.memory_space<vmem>>, vector<1x1x32x64xf32>
    %260 = vector.shape_cast %259 : vector<1x1x32x64xf32> to vector<32x64xf32>
    %261 = arith.truncf %258 : vector<32x32xf32> to vector<32x32xbf16>
    %262 = arith.truncf %260 : vector<32x64xf32> to vector<32x64xbf16>
    %cst_112 = arith.constant dense<0.000000e+00> : vector<32x64xf32>
    %263 = tpu.matmul %261, %262, %cst_112 {dimension_numbers = #tpu.dot_dimension_numbers<[1], [0], [0], [1], [0, 0, 1, 1], [], []>} : vector<32x32xbf16>, vector<32x64xbf16>, vector<32x64xf32> -> vector<32x64xf32>
    %c0_113 = arith.constant 0 : index
    %c0_114 = arith.constant 0 : index
    %c0_115 = arith.constant 0 : index
    %c0_116 = arith.constant 0 : index
    %264 = vector.load %arg18[%c0_113, %c0_114, %c0_115, %c0_116] : memref<1x2x1x64xf32, #tpu.memory_space<vmem>>, vector<1x1x1x64xf32>
    %265 = vector.shape_cast %264 : vector<1x1x1x64xf32> to vector<1x64xf32>
    %266 = vector.broadcast %265 : vector<1x64xf32> to vector<32x64xf32>
    %267 = arith.addf %263, %266 : vector<32x64xf32>
    %cst_117 = arith.constant 5.000000e-01 : f32
    %268 = vector.broadcast %cst_117 : f32 to vector<32x64xf32>
    %269 = arith.mulf %268, %267 : vector<32x64xf32>
    %cst_118 = arith.constant 0.707106769 : f32
    %270 = vector.broadcast %cst_118 : f32 to vector<32x64xf32>
    %271 = arith.mulf %267, %270 : vector<32x64xf32>
    %272 = math.absf %271 : vector<32x64xf32>
    %cst_119 = arith.constant 0.327591091 : f32
    %273 = vector.broadcast %cst_119 : f32 to vector<32x64xf32>
    %274 = arith.mulf %273, %272 : vector<32x64xf32>
    %cst_120 = arith.constant 1.000000e+00 : f32
    %275 = vector.broadcast %cst_120 : f32 to vector<32x64xf32>
    %276 = arith.addf %275, %274 : vector<32x64xf32>
    %cst_121 = arith.constant 1.000000e+00 : f32
    %277 = vector.broadcast %cst_121 : f32 to vector<32x64xf32>
    %278 = arith.divf %277, %276 : vector<32x64xf32>
    %cst_122 = arith.constant 1.06140542 : f32
    %279 = vector.broadcast %cst_122 : f32 to vector<32x64xf32>
    %280 = arith.mulf %278, %279 : vector<32x64xf32>
    %cst_123 = arith.constant -1.45315206 : f32
    %281 = vector.broadcast %cst_123 : f32 to vector<32x64xf32>
    %282 = arith.addf %281, %280 : vector<32x64xf32>
    %283 = arith.mulf %278, %282 : vector<32x64xf32>
    %cst_124 = arith.constant 1.42141378 : f32
    %284 = vector.broadcast %cst_124 : f32 to vector<32x64xf32>
    %285 = arith.addf %284, %283 : vector<32x64xf32>
    %286 = arith.mulf %278, %285 : vector<32x64xf32>
    %cst_125 = arith.constant -0.284496725 : f32
    %287 = vector.broadcast %cst_125 : f32 to vector<32x64xf32>
    %288 = arith.addf %287, %286 : vector<32x64xf32>
    %289 = arith.mulf %278, %288 : vector<32x64xf32>
    %cst_126 = arith.constant 0.254829586 : f32
    %290 = vector.broadcast %cst_126 : f32 to vector<32x64xf32>
    %291 = arith.addf %290, %289 : vector<32x64xf32>
    %292 = arith.mulf %278, %291 : vector<32x64xf32>
    %cst_127 = arith.constant 0.000000e+00 : f32
    %293 = vector.broadcast %cst_127 : f32 to vector<32x64xf32>
    %294 = arith.subf %293, %272 : vector<32x64xf32>
    %295 = arith.mulf %294, %272 : vector<32x64xf32>
    %296 = math.exp %295 : vector<32x64xf32>
    %297 = arith.mulf %292, %296 : vector<32x64xf32>
    %cst_128 = arith.constant 1.000000e+00 : f32
    %298 = vector.broadcast %cst_128 : f32 to vector<32x64xf32>
    %299 = arith.subf %298, %297 : vector<32x64xf32>
    %cst_129 = arith.constant 0.000000e+00 : f32
    %300 = vector.broadcast %cst_129 : f32 to vector<32x64xf32>
    %301 = arith.cmpf oge, %271, %300 : vector<32x64xf32>
    %cst_130 = arith.constant 0.000000e+00 : f32
    %302 = vector.broadcast %cst_130 : f32 to vector<32x64xf32>
    %303 = arith.subf %302, %299 : vector<32x64xf32>
    %304 = arith.select %301, %299, %303 : vector<32x64xi1>, vector<32x64xf32>
    %cst_131 = arith.constant 1.000000e+00 : f32
    %305 = vector.broadcast %cst_131 : f32 to vector<32x64xf32>
    %306 = arith.addf %305, %304 : vector<32x64xf32>
    %307 = arith.mulf %269, %306 : vector<32x64xf32>
    %c0_132 = arith.constant 0 : index
    %c0_133 = arith.constant 0 : index
    %c0_134 = arith.constant 0 : index
    %c0_135 = arith.constant 0 : index
    %308 = vector.load %arg19[%c0_132, %c0_133, %c0_134, %c0_135] : memref<1x2x64x32xf32, #tpu.memory_space<vmem>>, vector<1x1x64x32xf32>
    %309 = vector.shape_cast %308 : vector<1x1x64x32xf32> to vector<64x32xf32>
    %310 = arith.truncf %307 : vector<32x64xf32> to vector<32x64xbf16>
    %311 = arith.truncf %309 : vector<64x32xf32> to vector<64x32xbf16>
    %cst_136 = arith.constant dense<0.000000e+00> : vector<32x32xf32>
    %312 = tpu.matmul %310, %311, %cst_136 {dimension_numbers = #tpu.dot_dimension_numbers<[1], [0], [0], [1], [0, 0, 1, 1], [], []>} : vector<32x64xbf16>, vector<64x32xbf16>, vector<32x32xf32> -> vector<32x32xf32>
    %313 = arith.addf %234, %312 : vector<32x32xf32>
    %c0_137 = arith.constant 0 : index
    %c0_138 = arith.constant 0 : index
    %c0_139 = arith.constant 0 : index
    %c0_140 = arith.constant 0 : index
    %314 = vector.load %arg20[%c0_137, %c0_138, %c0_139, %c0_140] : memref<1x2x1x32xf32, #tpu.memory_space<vmem>>, vector<1x1x1x32xf32>
    %315 = vector.shape_cast %314 : vector<1x1x1x32xf32> to vector<1x32xf32>
    %316 = vector.broadcast %315 : vector<1x32xf32> to vector<32x32xf32>
    %317 = arith.addf %313, %316 : vector<32x32xf32>
    %c0_141 = arith.constant 0 : index
    %c1 = arith.constant 1 : index
    %c0_142 = arith.constant 0 : index
    %c0_143 = arith.constant 0 : index
    %318 = vector.load %arg7[%c0_141, %c1, %c0_142, %c0_143] : memref<1x2x1x32xf32, #tpu.memory_space<vmem>>, vector<1x1x1x32xf32>
    %319 = vector.shape_cast %318 : vector<1x1x1x32xf32> to vector<1x32xf32>
    %c0_144 = arith.constant 0 : index
    %c1_145 = arith.constant 1 : index
    %c0_146 = arith.constant 0 : index
    %c0_147 = arith.constant 0 : index
    %320 = vector.load %arg8[%c0_144, %c1_145, %c0_146, %c0_147] : memref<1x2x1x32xf32, #tpu.memory_space<vmem>>, vector<1x1x1x32xf32>
    %321 = vector.shape_cast %320 : vector<1x1x1x32xf32> to vector<1x32xf32>
    %cst_148 = arith.constant dense<0.000000e+00> : vector<32xf32>
    %322 = vector.multi_reduction <add>, %317, %cst_148 [1] : vector<32x32xf32> to vector<32xf32>
    %323 = vector.shape_cast %322 : vector<32xf32> to vector<32x1xf32>
    %cst_149 = arith.constant 3.200000e+01 : f32
    %324 = vector.broadcast %cst_149 : f32 to vector<32x1xf32>
    %325 = arith.divf %323, %324 : vector<32x1xf32>
    %326 = vector.broadcast %325 : vector<32x1xf32> to vector<32x32xf32>
    %327 = arith.subf %317, %326 : vector<32x32xf32>
    %328 = arith.mulf %327, %327 : vector<32x32xf32>
    %cst_150 = arith.constant dense<0.000000e+00> : vector<32xf32>
    %329 = vector.multi_reduction <add>, %328, %cst_150 [1] : vector<32x32xf32> to vector<32xf32>
    %330 = vector.shape_cast %329 : vector<32xf32> to vector<32x1xf32>
    %cst_151 = arith.constant 3.200000e+01 : f32
    %331 = vector.broadcast %cst_151 : f32 to vector<32x1xf32>
    %332 = arith.divf %330, %331 : vector<32x1xf32>
    %cst_152 = arith.constant 9.99999974E-6 : f32
    %333 = vector.broadcast %cst_152 : f32 to vector<32x1xf32>
    %334 = arith.addf %332, %333 : vector<32x1xf32>
    %335 = math.rsqrt %334 : vector<32x1xf32>
    %336 = vector.broadcast %335 : vector<32x1xf32> to vector<32x32xf32>
    %337 = arith.mulf %327, %336 : vector<32x32xf32>
    %338 = vector.broadcast %319 : vector<1x32xf32> to vector<32x32xf32>
    %339 = arith.mulf %337, %338 : vector<32x32xf32>
    %340 = vector.broadcast %321 : vector<1x32xf32> to vector<32x32xf32>
    %341 = arith.addf %339, %340 : vector<32x32xf32>
    %342 = arith.mulf %341, %0 : vector<32x32xf32>
    %343 = arith.truncf %341 : vector<32x32xf32> to vector<32x32xbf16>
    %344 = arith.truncf %2 : vector<32x32xf32> to vector<32x32xbf16>
    %cst_153 = arith.constant dense<0.000000e+00> : vector<32x32xf32>
    %345 = tpu.matmul %343, %344, %cst_153 {dimension_numbers = #tpu.dot_dimension_numbers<[1], [0], [0], [1], [0, 0, 1, 1], [], []>} : vector<32x32xbf16>, vector<32x32xbf16>, vector<32x32xf32> -> vector<32x32xf32>
    %346 = arith.mulf %345, %1 : vector<32x32xf32>
    %347 = arith.addf %342, %346 : vector<32x32xf32>
    %c0_154 = arith.constant 0 : index
    %c1_155 = arith.constant 1 : index
    %c0_156 = arith.constant 0 : index
    %c0_157 = arith.constant 0 : index
    %348 = vector.load %arg11[%c0_154, %c1_155, %c0_156, %c0_157] : memref<1x2x32x64xf32, #tpu.memory_space<vmem>>, vector<1x1x32x64xf32>
    %349 = vector.shape_cast %348 : vector<1x1x32x64xf32> to vector<32x64xf32>
    %350 = arith.truncf %347 : vector<32x32xf32> to vector<32x32xbf16>
    %351 = arith.truncf %349 : vector<32x64xf32> to vector<32x64xbf16>
    %cst_158 = arith.constant dense<0.000000e+00> : vector<32x64xf32>
    %352 = tpu.matmul %350, %351, %cst_158 {dimension_numbers = #tpu.dot_dimension_numbers<[1], [0], [0], [1], [0, 0, 1, 1], [], []>} : vector<32x32xbf16>, vector<32x64xbf16>, vector<32x64xf32> -> vector<32x64xf32>
    %c0_159 = arith.constant 0 : index
    %c1_160 = arith.constant 1 : index
    %c0_161 = arith.constant 0 : index
    %c0_162 = arith.constant 0 : index
    %353 = vector.load %arg12[%c0_159, %c1_160, %c0_161, %c0_162] : memref<1x2x1x64xf32, #tpu.memory_space<vmem>>, vector<1x1x1x64xf32>
    %354 = vector.shape_cast %353 : vector<1x1x1x64xf32> to vector<1x64xf32>
    %355 = vector.broadcast %354 : vector<1x64xf32> to vector<32x64xf32>
    %356 = arith.addf %352, %355 : vector<32x64xf32>
    %c0_163 = arith.constant 0 : index
    %c1_164 = arith.constant 1 : index
    %c0_165 = arith.constant 0 : index
    %c0_166 = arith.constant 0 : index
    %357 = vector.load %arg13[%c0_163, %c1_164, %c0_165, %c0_166] : memref<1x2x32x32xf32, #tpu.memory_space<vmem>>, vector<1x1x32x32xf32>
    %358 = vector.shape_cast %357 : vector<1x1x32x32xf32> to vector<32x32xf32>
    %359 = arith.truncf %341 : vector<32x32xf32> to vector<32x32xbf16>
    %360 = arith.truncf %358 : vector<32x32xf32> to vector<32x32xbf16>
    %cst_167 = arith.constant dense<0.000000e+00> : vector<32x32xf32>
    %361 = tpu.matmul %359, %360, %cst_167 {dimension_numbers = #tpu.dot_dimension_numbers<[1], [0], [0], [1], [0, 0, 1, 1], [], []>} : vector<32x32xbf16>, vector<32x32xbf16>, vector<32x32xf32> -> vector<32x32xf32>
    %c0_168 = arith.constant 0 : index
    %c1_169 = arith.constant 1 : index
    %c0_170 = arith.constant 0 : index
    %c0_171 = arith.constant 0 : index
    %362 = vector.load %arg14[%c0_168, %c1_169, %c0_170, %c0_171] : memref<1x2x1x32xf32, #tpu.memory_space<vmem>>, vector<1x1x1x32xf32>
    %363 = vector.shape_cast %362 : vector<1x1x1x32xf32> to vector<1x32xf32>
    %364 = vector.broadcast %363 : vector<1x32xf32> to vector<32x32xf32>
    %365 = arith.addf %361, %364 : vector<32x32xf32>
    %366 = vector.extract_strided_slice %356 {offsets = [0, 0], sizes = [16, 8], strides = [1, 1]} : vector<32x64xf32> to vector<16x8xf32>
    %367 = vector.extract_strided_slice %356 {offsets = [0, 32], sizes = [16, 8], strides = [1, 1]} : vector<32x64xf32> to vector<16x8xf32>
    %368 = vector.extract_strided_slice %365 {offsets = [0, 0], sizes = [16, 8], strides = [1, 1]} : vector<32x32xf32> to vector<16x8xf32>
    %369 = arith.truncf %366 : vector<16x8xf32> to vector<16x8xbf16>
    %370 = arith.truncf %367 : vector<16x8xf32> to vector<16x8xbf16>
    %cst_172 = arith.constant dense<0.000000e+00> : vector<16x16xf32>
    %371 = tpu.matmul %369, %370, %cst_172 {dimension_numbers = #tpu.dot_dimension_numbers<[1], [1], [0], [0], [0, 0, 1, 0], [], []>} : vector<16x8xbf16>, vector<16x8xbf16>, vector<16x16xf32> -> vector<16x16xf32>
    %cst_173 = arith.constant 0.353553385 : f32
    %372 = vector.broadcast %cst_173 : f32 to vector<16x16xf32>
    %373 = arith.mulf %371, %372 : vector<16x16xf32>
    %cst_174 = arith.constant dense<0xFF800000> : vector<16xf32>
    %374 = vector.multi_reduction <maximumf>, %373, %cst_174 [1] : vector<16x16xf32> to vector<16xf32>
    %375 = vector.shape_cast %374 : vector<16xf32> to vector<16x1xf32>
    %376 = vector.broadcast %375 : vector<16x1xf32> to vector<16x16xf32>
    %377 = arith.subf %373, %376 : vector<16x16xf32>
    %378 = math.exp %377 : vector<16x16xf32>
    %cst_175 = arith.constant dense<0.000000e+00> : vector<16xf32>
    %379 = vector.multi_reduction <add>, %378, %cst_175 [1] : vector<16x16xf32> to vector<16xf32>
    %380 = vector.shape_cast %379 : vector<16xf32> to vector<16x1xf32>
    %381 = vector.broadcast %380 : vector<16x1xf32> to vector<16x16xf32>
    %382 = arith.divf %378, %381 : vector<16x16xf32>
    %383 = arith.truncf %382 : vector<16x16xf32> to vector<16x16xbf16>
    %384 = arith.truncf %368 : vector<16x8xf32> to vector<16x8xbf16>
    %cst_176 = arith.constant dense<0.000000e+00> : vector<16x8xf32>
    %385 = tpu.matmul %383, %384, %cst_176 {dimension_numbers = #tpu.dot_dimension_numbers<[1], [0], [0], [1], [0, 0, 1, 1], [], []>} : vector<16x16xbf16>, vector<16x8xbf16>, vector<16x8xf32> -> vector<16x8xf32>
    %386 = vector.extract_strided_slice %356 {offsets = [0, 8], sizes = [16, 8], strides = [1, 1]} : vector<32x64xf32> to vector<16x8xf32>
    %387 = vector.extract_strided_slice %356 {offsets = [0, 40], sizes = [16, 8], strides = [1, 1]} : vector<32x64xf32> to vector<16x8xf32>
    %388 = vector.extract_strided_slice %365 {offsets = [0, 8], sizes = [16, 8], strides = [1, 1]} : vector<32x32xf32> to vector<16x8xf32>
    %389 = arith.truncf %386 : vector<16x8xf32> to vector<16x8xbf16>
    %390 = arith.truncf %387 : vector<16x8xf32> to vector<16x8xbf16>
    %cst_177 = arith.constant dense<0.000000e+00> : vector<16x16xf32>
    %391 = tpu.matmul %389, %390, %cst_177 {dimension_numbers = #tpu.dot_dimension_numbers<[1], [1], [0], [0], [0, 0, 1, 0], [], []>} : vector<16x8xbf16>, vector<16x8xbf16>, vector<16x16xf32> -> vector<16x16xf32>
    %cst_178 = arith.constant 0.353553385 : f32
    %392 = vector.broadcast %cst_178 : f32 to vector<16x16xf32>
    %393 = arith.mulf %391, %392 : vector<16x16xf32>
    %cst_179 = arith.constant dense<0xFF800000> : vector<16xf32>
    %394 = vector.multi_reduction <maximumf>, %393, %cst_179 [1] : vector<16x16xf32> to vector<16xf32>
    %395 = vector.shape_cast %394 : vector<16xf32> to vector<16x1xf32>
    %396 = vector.broadcast %395 : vector<16x1xf32> to vector<16x16xf32>
    %397 = arith.subf %393, %396 : vector<16x16xf32>
    %398 = math.exp %397 : vector<16x16xf32>
    %cst_180 = arith.constant dense<0.000000e+00> : vector<16xf32>
    %399 = vector.multi_reduction <add>, %398, %cst_180 [1] : vector<16x16xf32> to vector<16xf32>
    %400 = vector.shape_cast %399 : vector<16xf32> to vector<16x1xf32>
    %401 = vector.broadcast %400 : vector<16x1xf32> to vector<16x16xf32>
    %402 = arith.divf %398, %401 : vector<16x16xf32>
    %403 = arith.truncf %402 : vector<16x16xf32> to vector<16x16xbf16>
    %404 = arith.truncf %388 : vector<16x8xf32> to vector<16x8xbf16>
    %cst_181 = arith.constant dense<0.000000e+00> : vector<16x8xf32>
    %405 = tpu.matmul %403, %404, %cst_181 {dimension_numbers = #tpu.dot_dimension_numbers<[1], [0], [0], [1], [0, 0, 1, 1], [], []>} : vector<16x16xbf16>, vector<16x8xbf16>, vector<16x8xf32> -> vector<16x8xf32>
    %406 = vector.extract_strided_slice %356 {offsets = [0, 16], sizes = [16, 8], strides = [1, 1]} : vector<32x64xf32> to vector<16x8xf32>
    %407 = vector.extract_strided_slice %356 {offsets = [0, 48], sizes = [16, 8], strides = [1, 1]} : vector<32x64xf32> to vector<16x8xf32>
    %408 = vector.extract_strided_slice %365 {offsets = [0, 16], sizes = [16, 8], strides = [1, 1]} : vector<32x32xf32> to vector<16x8xf32>
    %409 = arith.truncf %406 : vector<16x8xf32> to vector<16x8xbf16>
    %410 = arith.truncf %407 : vector<16x8xf32> to vector<16x8xbf16>
    %cst_182 = arith.constant dense<0.000000e+00> : vector<16x16xf32>
    %411 = tpu.matmul %409, %410, %cst_182 {dimension_numbers = #tpu.dot_dimension_numbers<[1], [1], [0], [0], [0, 0, 1, 0], [], []>} : vector<16x8xbf16>, vector<16x8xbf16>, vector<16x16xf32> -> vector<16x16xf32>
    %cst_183 = arith.constant 0.353553385 : f32
    %412 = vector.broadcast %cst_183 : f32 to vector<16x16xf32>
    %413 = arith.mulf %411, %412 : vector<16x16xf32>
    %cst_184 = arith.constant dense<0xFF800000> : vector<16xf32>
    %414 = vector.multi_reduction <maximumf>, %413, %cst_184 [1] : vector<16x16xf32> to vector<16xf32>
    %415 = vector.shape_cast %414 : vector<16xf32> to vector<16x1xf32>
    %416 = vector.broadcast %415 : vector<16x1xf32> to vector<16x16xf32>
    %417 = arith.subf %413, %416 : vector<16x16xf32>
    %418 = math.exp %417 : vector<16x16xf32>
    %cst_185 = arith.constant dense<0.000000e+00> : vector<16xf32>
    %419 = vector.multi_reduction <add>, %418, %cst_185 [1] : vector<16x16xf32> to vector<16xf32>
    %420 = vector.shape_cast %419 : vector<16xf32> to vector<16x1xf32>
    %421 = vector.broadcast %420 : vector<16x1xf32> to vector<16x16xf32>
    %422 = arith.divf %418, %421 : vector<16x16xf32>
    %423 = arith.truncf %422 : vector<16x16xf32> to vector<16x16xbf16>
    %424 = arith.truncf %408 : vector<16x8xf32> to vector<16x8xbf16>
    %cst_186 = arith.constant dense<0.000000e+00> : vector<16x8xf32>
    %425 = tpu.matmul %423, %424, %cst_186 {dimension_numbers = #tpu.dot_dimension_numbers<[1], [0], [0], [1], [0, 0, 1, 1], [], []>} : vector<16x16xbf16>, vector<16x8xbf16>, vector<16x8xf32> -> vector<16x8xf32>
    %426 = vector.extract_strided_slice %356 {offsets = [0, 24], sizes = [16, 8], strides = [1, 1]} : vector<32x64xf32> to vector<16x8xf32>
    %427 = vector.extract_strided_slice %356 {offsets = [0, 56], sizes = [16, 8], strides = [1, 1]} : vector<32x64xf32> to vector<16x8xf32>
    %428 = vector.extract_strided_slice %365 {offsets = [0, 24], sizes = [16, 8], strides = [1, 1]} : vector<32x32xf32> to vector<16x8xf32>
    %429 = arith.truncf %426 : vector<16x8xf32> to vector<16x8xbf16>
    %430 = arith.truncf %427 : vector<16x8xf32> to vector<16x8xbf16>
    %cst_187 = arith.constant dense<0.000000e+00> : vector<16x16xf32>
    %431 = tpu.matmul %429, %430, %cst_187 {dimension_numbers = #tpu.dot_dimension_numbers<[1], [1], [0], [0], [0, 0, 1, 0], [], []>} : vector<16x8xbf16>, vector<16x8xbf16>, vector<16x16xf32> -> vector<16x16xf32>
    %cst_188 = arith.constant 0.353553385 : f32
    %432 = vector.broadcast %cst_188 : f32 to vector<16x16xf32>
    %433 = arith.mulf %431, %432 : vector<16x16xf32>
    %cst_189 = arith.constant dense<0xFF800000> : vector<16xf32>
    %434 = vector.multi_reduction <maximumf>, %433, %cst_189 [1] : vector<16x16xf32> to vector<16xf32>
    %435 = vector.shape_cast %434 : vector<16xf32> to vector<16x1xf32>
    %436 = vector.broadcast %435 : vector<16x1xf32> to vector<16x16xf32>
    %437 = arith.subf %433, %436 : vector<16x16xf32>
    %438 = math.exp %437 : vector<16x16xf32>
    %cst_190 = arith.constant dense<0.000000e+00> : vector<16xf32>
    %439 = vector.multi_reduction <add>, %438, %cst_190 [1] : vector<16x16xf32> to vector<16xf32>
    %440 = vector.shape_cast %439 : vector<16xf32> to vector<16x1xf32>
    %441 = vector.broadcast %440 : vector<16x1xf32> to vector<16x16xf32>
    %442 = arith.divf %438, %441 : vector<16x16xf32>
    %443 = arith.truncf %442 : vector<16x16xf32> to vector<16x16xbf16>
    %444 = arith.truncf %428 : vector<16x8xf32> to vector<16x8xbf16>
    %cst_191 = arith.constant dense<0.000000e+00> : vector<16x8xf32>
    %445 = tpu.matmul %443, %444, %cst_191 {dimension_numbers = #tpu.dot_dimension_numbers<[1], [0], [0], [1], [0, 0, 1, 1], [], []>} : vector<16x16xbf16>, vector<16x8xbf16>, vector<16x8xf32> -> vector<16x8xf32>
    %446 = tpu.concatenate %385, %405, %425, %445 in 1 : vector<16x8xf32>, vector<16x8xf32>, vector<16x8xf32>, vector<16x8xf32> -> vector<16x32xf32>
    %447 = vector.extract_strided_slice %356 {offsets = [16, 0], sizes = [16, 8], strides = [1, 1]} : vector<32x64xf32> to vector<16x8xf32>
    %448 = vector.extract_strided_slice %356 {offsets = [16, 32], sizes = [16, 8], strides = [1, 1]} : vector<32x64xf32> to vector<16x8xf32>
    %449 = vector.extract_strided_slice %365 {offsets = [16, 0], sizes = [16, 8], strides = [1, 1]} : vector<32x32xf32> to vector<16x8xf32>
    %450 = arith.truncf %447 : vector<16x8xf32> to vector<16x8xbf16>
    %451 = arith.truncf %448 : vector<16x8xf32> to vector<16x8xbf16>
    %cst_192 = arith.constant dense<0.000000e+00> : vector<16x16xf32>
    %452 = tpu.matmul %450, %451, %cst_192 {dimension_numbers = #tpu.dot_dimension_numbers<[1], [1], [0], [0], [0, 0, 1, 0], [], []>} : vector<16x8xbf16>, vector<16x8xbf16>, vector<16x16xf32> -> vector<16x16xf32>
    %cst_193 = arith.constant 0.353553385 : f32
    %453 = vector.broadcast %cst_193 : f32 to vector<16x16xf32>
    %454 = arith.mulf %452, %453 : vector<16x16xf32>
    %cst_194 = arith.constant dense<0xFF800000> : vector<16xf32>
    %455 = vector.multi_reduction <maximumf>, %454, %cst_194 [1] : vector<16x16xf32> to vector<16xf32>
    %456 = vector.shape_cast %455 : vector<16xf32> to vector<16x1xf32>
    %457 = vector.broadcast %456 : vector<16x1xf32> to vector<16x16xf32>
    %458 = arith.subf %454, %457 : vector<16x16xf32>
    %459 = math.exp %458 : vector<16x16xf32>
    %cst_195 = arith.constant dense<0.000000e+00> : vector<16xf32>
    %460 = vector.multi_reduction <add>, %459, %cst_195 [1] : vector<16x16xf32> to vector<16xf32>
    %461 = vector.shape_cast %460 : vector<16xf32> to vector<16x1xf32>
    %462 = vector.broadcast %461 : vector<16x1xf32> to vector<16x16xf32>
    %463 = arith.divf %459, %462 : vector<16x16xf32>
    %464 = arith.truncf %463 : vector<16x16xf32> to vector<16x16xbf16>
    %465 = arith.truncf %449 : vector<16x8xf32> to vector<16x8xbf16>
    %cst_196 = arith.constant dense<0.000000e+00> : vector<16x8xf32>
    %466 = tpu.matmul %464, %465, %cst_196 {dimension_numbers = #tpu.dot_dimension_numbers<[1], [0], [0], [1], [0, 0, 1, 1], [], []>} : vector<16x16xbf16>, vector<16x8xbf16>, vector<16x8xf32> -> vector<16x8xf32>
    %467 = vector.extract_strided_slice %356 {offsets = [16, 8], sizes = [16, 8], strides = [1, 1]} : vector<32x64xf32> to vector<16x8xf32>
    %468 = vector.extract_strided_slice %356 {offsets = [16, 40], sizes = [16, 8], strides = [1, 1]} : vector<32x64xf32> to vector<16x8xf32>
    %469 = vector.extract_strided_slice %365 {offsets = [16, 8], sizes = [16, 8], strides = [1, 1]} : vector<32x32xf32> to vector<16x8xf32>
    %470 = arith.truncf %467 : vector<16x8xf32> to vector<16x8xbf16>
    %471 = arith.truncf %468 : vector<16x8xf32> to vector<16x8xbf16>
    %cst_197 = arith.constant dense<0.000000e+00> : vector<16x16xf32>
    %472 = tpu.matmul %470, %471, %cst_197 {dimension_numbers = #tpu.dot_dimension_numbers<[1], [1], [0], [0], [0, 0, 1, 0], [], []>} : vector<16x8xbf16>, vector<16x8xbf16>, vector<16x16xf32> -> vector<16x16xf32>
    %cst_198 = arith.constant 0.353553385 : f32
    %473 = vector.broadcast %cst_198 : f32 to vector<16x16xf32>
    %474 = arith.mulf %472, %473 : vector<16x16xf32>
    %cst_199 = arith.constant dense<0xFF800000> : vector<16xf32>
    %475 = vector.multi_reduction <maximumf>, %474, %cst_199 [1] : vector<16x16xf32> to vector<16xf32>
    %476 = vector.shape_cast %475 : vector<16xf32> to vector<16x1xf32>
    %477 = vector.broadcast %476 : vector<16x1xf32> to vector<16x16xf32>
    %478 = arith.subf %474, %477 : vector<16x16xf32>
    %479 = math.exp %478 : vector<16x16xf32>
    %cst_200 = arith.constant dense<0.000000e+00> : vector<16xf32>
    %480 = vector.multi_reduction <add>, %479, %cst_200 [1] : vector<16x16xf32> to vector<16xf32>
    %481 = vector.shape_cast %480 : vector<16xf32> to vector<16x1xf32>
    %482 = vector.broadcast %481 : vector<16x1xf32> to vector<16x16xf32>
    %483 = arith.divf %479, %482 : vector<16x16xf32>
    %484 = arith.truncf %483 : vector<16x16xf32> to vector<16x16xbf16>
    %485 = arith.truncf %469 : vector<16x8xf32> to vector<16x8xbf16>
    %cst_201 = arith.constant dense<0.000000e+00> : vector<16x8xf32>
    %486 = tpu.matmul %484, %485, %cst_201 {dimension_numbers = #tpu.dot_dimension_numbers<[1], [0], [0], [1], [0, 0, 1, 1], [], []>} : vector<16x16xbf16>, vector<16x8xbf16>, vector<16x8xf32> -> vector<16x8xf32>
    %487 = vector.extract_strided_slice %356 {offsets = [16, 16], sizes = [16, 8], strides = [1, 1]} : vector<32x64xf32> to vector<16x8xf32>
    %488 = vector.extract_strided_slice %356 {offsets = [16, 48], sizes = [16, 8], strides = [1, 1]} : vector<32x64xf32> to vector<16x8xf32>
    %489 = vector.extract_strided_slice %365 {offsets = [16, 16], sizes = [16, 8], strides = [1, 1]} : vector<32x32xf32> to vector<16x8xf32>
    %490 = arith.truncf %487 : vector<16x8xf32> to vector<16x8xbf16>
    %491 = arith.truncf %488 : vector<16x8xf32> to vector<16x8xbf16>
    %cst_202 = arith.constant dense<0.000000e+00> : vector<16x16xf32>
    %492 = tpu.matmul %490, %491, %cst_202 {dimension_numbers = #tpu.dot_dimension_numbers<[1], [1], [0], [0], [0, 0, 1, 0], [], []>} : vector<16x8xbf16>, vector<16x8xbf16>, vector<16x16xf32> -> vector<16x16xf32>
    %cst_203 = arith.constant 0.353553385 : f32
    %493 = vector.broadcast %cst_203 : f32 to vector<16x16xf32>
    %494 = arith.mulf %492, %493 : vector<16x16xf32>
    %cst_204 = arith.constant dense<0xFF800000> : vector<16xf32>
    %495 = vector.multi_reduction <maximumf>, %494, %cst_204 [1] : vector<16x16xf32> to vector<16xf32>
    %496 = vector.shape_cast %495 : vector<16xf32> to vector<16x1xf32>
    %497 = vector.broadcast %496 : vector<16x1xf32> to vector<16x16xf32>
    %498 = arith.subf %494, %497 : vector<16x16xf32>
    %499 = math.exp %498 : vector<16x16xf32>
    %cst_205 = arith.constant dense<0.000000e+00> : vector<16xf32>
    %500 = vector.multi_reduction <add>, %499, %cst_205 [1] : vector<16x16xf32> to vector<16xf32>
    %501 = vector.shape_cast %500 : vector<16xf32> to vector<16x1xf32>
    %502 = vector.broadcast %501 : vector<16x1xf32> to vector<16x16xf32>
    %503 = arith.divf %499, %502 : vector<16x16xf32>
    %504 = arith.truncf %503 : vector<16x16xf32> to vector<16x16xbf16>
    %505 = arith.truncf %489 : vector<16x8xf32> to vector<16x8xbf16>
    %cst_206 = arith.constant dense<0.000000e+00> : vector<16x8xf32>
    %506 = tpu.matmul %504, %505, %cst_206 {dimension_numbers = #tpu.dot_dimension_numbers<[1], [0], [0], [1], [0, 0, 1, 1], [], []>} : vector<16x16xbf16>, vector<16x8xbf16>, vector<16x8xf32> -> vector<16x8xf32>
    %507 = vector.extract_strided_slice %356 {offsets = [16, 24], sizes = [16, 8], strides = [1, 1]} : vector<32x64xf32> to vector<16x8xf32>
    %508 = vector.extract_strided_slice %356 {offsets = [16, 56], sizes = [16, 8], strides = [1, 1]} : vector<32x64xf32> to vector<16x8xf32>
    %509 = vector.extract_strided_slice %365 {offsets = [16, 24], sizes = [16, 8], strides = [1, 1]} : vector<32x32xf32> to vector<16x8xf32>
    %510 = arith.truncf %507 : vector<16x8xf32> to vector<16x8xbf16>
    %511 = arith.truncf %508 : vector<16x8xf32> to vector<16x8xbf16>
    %cst_207 = arith.constant dense<0.000000e+00> : vector<16x16xf32>
    %512 = tpu.matmul %510, %511, %cst_207 {dimension_numbers = #tpu.dot_dimension_numbers<[1], [1], [0], [0], [0, 0, 1, 0], [], []>} : vector<16x8xbf16>, vector<16x8xbf16>, vector<16x16xf32> -> vector<16x16xf32>
    %cst_208 = arith.constant 0.353553385 : f32
    %513 = vector.broadcast %cst_208 : f32 to vector<16x16xf32>
    %514 = arith.mulf %512, %513 : vector<16x16xf32>
    %cst_209 = arith.constant dense<0xFF800000> : vector<16xf32>
    %515 = vector.multi_reduction <maximumf>, %514, %cst_209 [1] : vector<16x16xf32> to vector<16xf32>
    %516 = vector.shape_cast %515 : vector<16xf32> to vector<16x1xf32>
    %517 = vector.broadcast %516 : vector<16x1xf32> to vector<16x16xf32>
    %518 = arith.subf %514, %517 : vector<16x16xf32>
    %519 = math.exp %518 : vector<16x16xf32>
    %cst_210 = arith.constant dense<0.000000e+00> : vector<16xf32>
    %520 = vector.multi_reduction <add>, %519, %cst_210 [1] : vector<16x16xf32> to vector<16xf32>
    %521 = vector.shape_cast %520 : vector<16xf32> to vector<16x1xf32>
    %522 = vector.broadcast %521 : vector<16x1xf32> to vector<16x16xf32>
    %523 = arith.divf %519, %522 : vector<16x16xf32>
    %524 = arith.truncf %523 : vector<16x16xf32> to vector<16x16xbf16>
    %525 = arith.truncf %509 : vector<16x8xf32> to vector<16x8xbf16>
    %cst_211 = arith.constant dense<0.000000e+00> : vector<16x8xf32>
    %526 = tpu.matmul %524, %525, %cst_211 {dimension_numbers = #tpu.dot_dimension_numbers<[1], [0], [0], [1], [0, 0, 1, 1], [], []>} : vector<16x16xbf16>, vector<16x8xbf16>, vector<16x8xf32> -> vector<16x8xf32>
    %527 = tpu.concatenate %466, %486, %506, %526 in 1 : vector<16x8xf32>, vector<16x8xf32>, vector<16x8xf32>, vector<16x8xf32> -> vector<16x32xf32>
    %528 = tpu.concatenate %446, %527 in 0 : vector<16x32xf32>, vector<16x32xf32> -> vector<32x32xf32>
    %c0_212 = arith.constant 0 : index
    %c1_213 = arith.constant 1 : index
    %c0_214 = arith.constant 0 : index
    %c0_215 = arith.constant 0 : index
    %529 = vector.load %arg15[%c0_212, %c1_213, %c0_214, %c0_215] : memref<1x2x32x32xf32, #tpu.memory_space<vmem>>, vector<1x1x32x32xf32>
    %530 = vector.shape_cast %529 : vector<1x1x32x32xf32> to vector<32x32xf32>
    %531 = arith.truncf %528 : vector<32x32xf32> to vector<32x32xbf16>
    %532 = arith.truncf %530 : vector<32x32xf32> to vector<32x32xbf16>
    %cst_216 = arith.constant dense<0.000000e+00> : vector<32x32xf32>
    %533 = tpu.matmul %531, %532, %cst_216 {dimension_numbers = #tpu.dot_dimension_numbers<[1], [0], [0], [1], [0, 0, 1, 1], [], []>} : vector<32x32xbf16>, vector<32x32xbf16>, vector<32x32xf32> -> vector<32x32xf32>
    %534 = arith.addf %317, %533 : vector<32x32xf32>
    %c0_217 = arith.constant 0 : index
    %c1_218 = arith.constant 1 : index
    %c0_219 = arith.constant 0 : index
    %c0_220 = arith.constant 0 : index
    %535 = vector.load %arg16[%c0_217, %c1_218, %c0_219, %c0_220] : memref<1x2x1x32xf32, #tpu.memory_space<vmem>>, vector<1x1x1x32xf32>
    %536 = vector.shape_cast %535 : vector<1x1x1x32xf32> to vector<1x32xf32>
    %537 = vector.broadcast %536 : vector<1x32xf32> to vector<32x32xf32>
    %538 = arith.addf %534, %537 : vector<32x32xf32>
    %c0_221 = arith.constant 0 : index
    %c1_222 = arith.constant 1 : index
    %c0_223 = arith.constant 0 : index
    %c0_224 = arith.constant 0 : index
    %539 = vector.load %arg9[%c0_221, %c1_222, %c0_223, %c0_224] : memref<1x2x1x32xf32, #tpu.memory_space<vmem>>, vector<1x1x1x32xf32>
    %540 = vector.shape_cast %539 : vector<1x1x1x32xf32> to vector<1x32xf32>
    %c0_225 = arith.constant 0 : index
    %c1_226 = arith.constant 1 : index
    %c0_227 = arith.constant 0 : index
    %c0_228 = arith.constant 0 : index
    %541 = vector.load %arg10[%c0_225, %c1_226, %c0_227, %c0_228] : memref<1x2x1x32xf32, #tpu.memory_space<vmem>>, vector<1x1x1x32xf32>
    %542 = vector.shape_cast %541 : vector<1x1x1x32xf32> to vector<1x32xf32>
    %cst_229 = arith.constant dense<0.000000e+00> : vector<32xf32>
    %543 = vector.multi_reduction <add>, %538, %cst_229 [1] : vector<32x32xf32> to vector<32xf32>
    %544 = vector.shape_cast %543 : vector<32xf32> to vector<32x1xf32>
    %cst_230 = arith.constant 3.200000e+01 : f32
    %545 = vector.broadcast %cst_230 : f32 to vector<32x1xf32>
    %546 = arith.divf %544, %545 : vector<32x1xf32>
    %547 = vector.broadcast %546 : vector<32x1xf32> to vector<32x32xf32>
    %548 = arith.subf %538, %547 : vector<32x32xf32>
    %549 = arith.mulf %548, %548 : vector<32x32xf32>
    %cst_231 = arith.constant dense<0.000000e+00> : vector<32xf32>
    %550 = vector.multi_reduction <add>, %549, %cst_231 [1] : vector<32x32xf32> to vector<32xf32>
    %551 = vector.shape_cast %550 : vector<32xf32> to vector<32x1xf32>
    %cst_232 = arith.constant 3.200000e+01 : f32
    %552 = vector.broadcast %cst_232 : f32 to vector<32x1xf32>
    %553 = arith.divf %551, %552 : vector<32x1xf32>
    %cst_233 = arith.constant 9.99999974E-6 : f32
    %554 = vector.broadcast %cst_233 : f32 to vector<32x1xf32>
    %555 = arith.addf %553, %554 : vector<32x1xf32>
    %556 = math.rsqrt %555 : vector<32x1xf32>
    %557 = vector.broadcast %556 : vector<32x1xf32> to vector<32x32xf32>
    %558 = arith.mulf %548, %557 : vector<32x32xf32>
    %559 = vector.broadcast %540 : vector<1x32xf32> to vector<32x32xf32>
    %560 = arith.mulf %558, %559 : vector<32x32xf32>
    %561 = vector.broadcast %542 : vector<1x32xf32> to vector<32x32xf32>
    %562 = arith.addf %560, %561 : vector<32x32xf32>
    %c0_234 = arith.constant 0 : index
    %c1_235 = arith.constant 1 : index
    %c0_236 = arith.constant 0 : index
    %c0_237 = arith.constant 0 : index
    %563 = vector.load %arg17[%c0_234, %c1_235, %c0_236, %c0_237] : memref<1x2x32x64xf32, #tpu.memory_space<vmem>>, vector<1x1x32x64xf32>
    %564 = vector.shape_cast %563 : vector<1x1x32x64xf32> to vector<32x64xf32>
    %565 = arith.truncf %562 : vector<32x32xf32> to vector<32x32xbf16>
    %566 = arith.truncf %564 : vector<32x64xf32> to vector<32x64xbf16>
    %cst_238 = arith.constant dense<0.000000e+00> : vector<32x64xf32>
    %567 = tpu.matmul %565, %566, %cst_238 {dimension_numbers = #tpu.dot_dimension_numbers<[1], [0], [0], [1], [0, 0, 1, 1], [], []>} : vector<32x32xbf16>, vector<32x64xbf16>, vector<32x64xf32> -> vector<32x64xf32>
    %c0_239 = arith.constant 0 : index
    %c1_240 = arith.constant 1 : index
    %c0_241 = arith.constant 0 : index
    %c0_242 = arith.constant 0 : index
    %568 = vector.load %arg18[%c0_239, %c1_240, %c0_241, %c0_242] : memref<1x2x1x64xf32, #tpu.memory_space<vmem>>, vector<1x1x1x64xf32>
    %569 = vector.shape_cast %568 : vector<1x1x1x64xf32> to vector<1x64xf32>
    %570 = vector.broadcast %569 : vector<1x64xf32> to vector<32x64xf32>
    %571 = arith.addf %567, %570 : vector<32x64xf32>
    %cst_243 = arith.constant 5.000000e-01 : f32
    %572 = vector.broadcast %cst_243 : f32 to vector<32x64xf32>
    %573 = arith.mulf %572, %571 : vector<32x64xf32>
    %cst_244 = arith.constant 0.707106769 : f32
    %574 = vector.broadcast %cst_244 : f32 to vector<32x64xf32>
    %575 = arith.mulf %571, %574 : vector<32x64xf32>
    %576 = math.absf %575 : vector<32x64xf32>
    %cst_245 = arith.constant 0.327591091 : f32
    %577 = vector.broadcast %cst_245 : f32 to vector<32x64xf32>
    %578 = arith.mulf %577, %576 : vector<32x64xf32>
    %cst_246 = arith.constant 1.000000e+00 : f32
    %579 = vector.broadcast %cst_246 : f32 to vector<32x64xf32>
    %580 = arith.addf %579, %578 : vector<32x64xf32>
    %cst_247 = arith.constant 1.000000e+00 : f32
    %581 = vector.broadcast %cst_247 : f32 to vector<32x64xf32>
    %582 = arith.divf %581, %580 : vector<32x64xf32>
    %cst_248 = arith.constant 1.06140542 : f32
    %583 = vector.broadcast %cst_248 : f32 to vector<32x64xf32>
    %584 = arith.mulf %582, %583 : vector<32x64xf32>
    %cst_249 = arith.constant -1.45315206 : f32
    %585 = vector.broadcast %cst_249 : f32 to vector<32x64xf32>
    %586 = arith.addf %585, %584 : vector<32x64xf32>
    %587 = arith.mulf %582, %586 : vector<32x64xf32>
    %cst_250 = arith.constant 1.42141378 : f32
    %588 = vector.broadcast %cst_250 : f32 to vector<32x64xf32>
    %589 = arith.addf %588, %587 : vector<32x64xf32>
    %590 = arith.mulf %582, %589 : vector<32x64xf32>
    %cst_251 = arith.constant -0.284496725 : f32
    %591 = vector.broadcast %cst_251 : f32 to vector<32x64xf32>
    %592 = arith.addf %591, %590 : vector<32x64xf32>
    %593 = arith.mulf %582, %592 : vector<32x64xf32>
    %cst_252 = arith.constant 0.254829586 : f32
    %594 = vector.broadcast %cst_252 : f32 to vector<32x64xf32>
    %595 = arith.addf %594, %593 : vector<32x64xf32>
    %596 = arith.mulf %582, %595 : vector<32x64xf32>
    %cst_253 = arith.constant 0.000000e+00 : f32
    %597 = vector.broadcast %cst_253 : f32 to vector<32x64xf32>
    %598 = arith.subf %597, %576 : vector<32x64xf32>
    %599 = arith.mulf %598, %576 : vector<32x64xf32>
    %600 = math.exp %599 : vector<32x64xf32>
    %601 = arith.mulf %596, %600 : vector<32x64xf32>
    %cst_254 = arith.constant 1.000000e+00 : f32
    %602 = vector.broadcast %cst_254 : f32 to vector<32x64xf32>
    %603 = arith.subf %602, %601 : vector<32x64xf32>
    %cst_255 = arith.constant 0.000000e+00 : f32
    %604 = vector.broadcast %cst_255 : f32 to vector<32x64xf32>
    %605 = arith.cmpf oge, %575, %604 : vector<32x64xf32>
    %cst_256 = arith.constant 0.000000e+00 : f32
    %606 = vector.broadcast %cst_256 : f32 to vector<32x64xf32>
    %607 = arith.subf %606, %603 : vector<32x64xf32>
    %608 = arith.select %605, %603, %607 : vector<32x64xi1>, vector<32x64xf32>
    %cst_257 = arith.constant 1.000000e+00 : f32
    %609 = vector.broadcast %cst_257 : f32 to vector<32x64xf32>
    %610 = arith.addf %609, %608 : vector<32x64xf32>
    %611 = arith.mulf %573, %610 : vector<32x64xf32>
    %c0_258 = arith.constant 0 : index
    %c1_259 = arith.constant 1 : index
    %c0_260 = arith.constant 0 : index
    %c0_261 = arith.constant 0 : index
    %612 = vector.load %arg19[%c0_258, %c1_259, %c0_260, %c0_261] : memref<1x2x64x32xf32, #tpu.memory_space<vmem>>, vector<1x1x64x32xf32>
    %613 = vector.shape_cast %612 : vector<1x1x64x32xf32> to vector<64x32xf32>
    %614 = arith.truncf %611 : vector<32x64xf32> to vector<32x64xbf16>
    %615 = arith.truncf %613 : vector<64x32xf32> to vector<64x32xbf16>
    %cst_262 = arith.constant dense<0.000000e+00> : vector<32x32xf32>
    %616 = tpu.matmul %614, %615, %cst_262 {dimension_numbers = #tpu.dot_dimension_numbers<[1], [0], [0], [1], [0, 0, 1, 1], [], []>} : vector<32x64xbf16>, vector<64x32xbf16>, vector<32x32xf32> -> vector<32x32xf32>
    %617 = arith.addf %538, %616 : vector<32x32xf32>
    %c0_263 = arith.constant 0 : index
    %c1_264 = arith.constant 1 : index
    %c0_265 = arith.constant 0 : index
    %c0_266 = arith.constant 0 : index
    %618 = vector.load %arg20[%c0_263, %c1_264, %c0_265, %c0_266] : memref<1x2x1x32xf32, #tpu.memory_space<vmem>>, vector<1x1x1x32xf32>
    %619 = vector.shape_cast %618 : vector<1x1x1x32xf32> to vector<1x32xf32>
    %620 = vector.broadcast %619 : vector<1x32xf32> to vector<32x32xf32>
    %621 = arith.addf %617, %620 : vector<32x32xf32>
    %c0_267 = arith.constant 0 : index
    %c0_268 = arith.constant 0 : index
    %c0_269 = arith.constant 0 : index
    %622 = vector.load %arg21[%c0_267, %c0_268, %c0_269] : memref<1x32x32xf32, #tpu.memory_space<vmem>>, vector<1x32x32xf32>
    %623 = vector.shape_cast %622 : vector<1x32x32xf32> to vector<32x32xf32>
    %624 = vector.shape_cast %621 : vector<32x32xf32> to vector<1x32x32xf32>
    tpu.vector_store %arg21[%c0_267, %c0_268, %c0_269], %624 {strides = array<i32>} : memref<1x32x32xf32, #tpu.memory_space<vmem>>, vector<1x32x32xf32>,
    return
  }
  func.func @transform_0(%arg0: i32) -> (i32, i32, i32) {
    %c0_i32 = arith.constant 0 : i32
    %c0_i32_0 = arith.constant 0 : i32
    %c0_i32_1 = arith.constant 0 : i32
    return %arg0, %c0_i32, %c0_i32_0 : i32, i32, i32
  }
  func.func @transform_1(%arg0: i32) -> (i32, i32) {
    %c0_i32 = arith.constant 0 : i32
    %c0_i32_0 = arith.constant 0 : i32
    %c0_i32_1 = arith.constant 0 : i32
    return %c0_i32, %c0_i32_0 : i32, i32
  }
  func.func @transform_2(%arg0: i32) -> (i32, i32) {
    %c0_i32 = arith.constant 0 : i32
    %c0_i32_0 = arith.constant 0 : i32
    %c0_i32_1 = arith.constant 0 : i32
    return %c0_i32, %c0_i32_0 : i32, i32
  }
  func.func @transform_3(%arg0: i32) -> (i32, i32) {
    %c0_i32 = arith.constant 0 : i32
    %c0_i32_0 = arith.constant 0 : i32
    %c0_i32_1 = arith.constant 0 : i32
    return %c0_i32, %c0_i32_0 : i32, i32
  }
  func.func @transform_4(%arg0: i32) -> (i32, i32, i32) {
    %c0_i32 = arith.constant 0 : i32
    %c0_i32_0 = arith.constant 0 : i32
    %c0_i32_1 = arith.constant 0 : i32
    return %arg0, %c0_i32, %c0_i32_0 : i32, i32, i32
  }
  func.func @transform_5(%arg0: i32) -> (i32, i32, i32) {
    %c0_i32 = arith.constant 0 : i32
    %c0_i32_0 = arith.constant 0 : i32
    %c0_i32_1 = arith.constant 0 : i32
    return %arg0, %c0_i32, %c0_i32_0 : i32, i32, i32
  }
  func.func @transform_6(%arg0: i32) -> (i32, i32, i32, i32) {
    %c0_i32 = arith.constant 0 : i32
    %c0_i32_0 = arith.constant 0 : i32
    %c0_i32_1 = arith.constant 0 : i32
    %c0_i32_2 = arith.constant 0 : i32
    return %arg0, %c0_i32, %c0_i32_0, %c0_i32_1 : i32, i32, i32, i32
  }
  func.func @transform_7(%arg0: i32) -> (i32, i32, i32, i32) {
    %c0_i32 = arith.constant 0 : i32
    %c0_i32_0 = arith.constant 0 : i32
    %c0_i32_1 = arith.constant 0 : i32
    %c0_i32_2 = arith.constant 0 : i32
    return %arg0, %c0_i32, %c0_i32_0, %c0_i32_1 : i32, i32, i32, i32
  }
  func.func @transform_8(%arg0: i32) -> (i32, i32, i32, i32) {
    %c0_i32 = arith.constant 0 : i32
    %c0_i32_0 = arith.constant 0 : i32
    %c0_i32_1 = arith.constant 0 : i32
    %c0_i32_2 = arith.constant 0 : i32
    return %arg0, %c0_i32, %c0_i32_0, %c0_i32_1 : i32, i32, i32, i32
  }
  func.func @transform_9(%arg0: i32) -> (i32, i32, i32, i32) {
    %c0_i32 = arith.constant 0 : i32
    %c0_i32_0 = arith.constant 0 : i32
    %c0_i32_1 = arith.constant 0 : i32
    %c0_i32_2 = arith.constant 0 : i32
    return %arg0, %c0_i32, %c0_i32_0, %c0_i32_1 : i32, i32, i32, i32
  }
  func.func @transform_10(%arg0: i32) -> (i32, i32, i32, i32) {
    %c0_i32 = arith.constant 0 : i32
    %c0_i32_0 = arith.constant 0 : i32
    %c0_i32_1 = arith.constant 0 : i32
    %c0_i32_2 = arith.constant 0 : i32
    return %arg0, %c0_i32, %c0_i32_0, %c0_i32_1 : i32, i32, i32, i32
  }
  func.func @transform_11(%arg0: i32) -> (i32, i32, i32, i32) {
    %c0_i32 = arith.constant 0 : i32
    %c0_i32_0 = arith.constant 0 : i32
    %c0_i32_1 = arith.constant 0 : i32
    %c0_i32_2 = arith.constant 0 : i32
    return %arg0, %c0_i32, %c0_i32_0, %c0_i32_1 : i32, i32, i32, i32
  }
  func.func @transform_12(%arg0: i32) -> (i32, i32, i32, i32) {
    %c0_i32 = arith.constant 0 : i32
    %c0_i32_0 = arith.constant 0 : i32
    %c0_i32_1 = arith.constant 0 : i32
    %c0_i32_2 = arith.constant 0 : i32
    return %arg0, %c0_i32, %c0_i32_0, %c0_i32_1 : i32, i32, i32, i32
  }
  func.func @transform_13(%arg0: i32) -> (i32, i32, i32, i32) {
    %c0_i32 = arith.constant 0 : i32
    %c0_i32_0 = arith.constant 0 : i32
    %c0_i32_1 = arith.constant 0 : i32
    %c0_i32_2 = arith.constant 0 : i32
    return %arg0, %c0_i32, %c0_i32_0, %c0_i32_1 : i32, i32, i32, i32
  }
  func.func @transform_14(%arg0: i32) -> (i32, i32, i32, i32) {
    %c0_i32 = arith.constant 0 : i32
    %c0_i32_0 = arith.constant 0 : i32
    %c0_i32_1 = arith.constant 0 : i32
    %c0_i32_2 = arith.constant 0 : i32
    return %arg0, %c0_i32, %c0_i32_0, %c0_i32_1 : i32, i32, i32, i32
  }
  func.func @transform_15(%arg0: i32) -> (i32, i32, i32, i32) {
    %c0_i32 = arith.constant 0 : i32
    %c0_i32_0 = arith.constant 0 : i32
    %c0_i32_1 = arith.constant 0 : i32
    %c0_i32_2 = arith.constant 0 : i32
    return %arg0, %c0_i32, %c0_i32_0, %c0_i32_1 : i32, i32, i32, i32
  }
  func.func @transform_16(%arg0: i32) -> (i32, i32, i32, i32) {
    %c0_i32 = arith.constant 0 : i32
    %c0_i32_0 = arith.constant 0 : i32
    %c0_i32_1 = arith.constant 0 : i32
    %c0_i32_2 = arith.constant 0 : i32
    return %arg0, %c0_i32, %c0_i32_0, %c0_i32_1 : i32, i32, i32, i32
  }
  func.func @transform_17(%arg0: i32) -> (i32, i32, i32, i32) {
    %c0_i32 = arith.constant 0 : i32
    %c0_i32_0 = arith.constant 0 : i32
    %c0_i32_1 = arith.constant 0 : i32
    %c0_i32_2 = arith.constant 0 : i32
    return %arg0, %c0_i32, %c0_i32_0, %c0_i32_1 : i32, i32, i32, i32
  }
  func.func @transform_18(%arg0: i32) -> (i32, i32, i32, i32) {
    %c0_i32 = arith.constant 0 : i32
    %c0_i32_0 = arith.constant 0 : i32
    %c0_i32_1 = arith.constant 0 : i32
    %c0_i32_2 = arith.constant 0 : i32
    return %arg0, %c0_i32, %c0_i32_0, %c0_i32_1 : i32, i32, i32, i32
  }
  func.func @transform_19(%arg0: i32) -> (i32, i32, i32, i32) {
    %c0_i32 = arith.constant 0 : i32
    %c0_i32_0 = arith.constant 0 : i32
    %c0_i32_1 = arith.constant 0 : i32
    %c0_i32_2 = arith.constant 0 : i32
    return %arg0, %c0_i32, %c0_i32_0, %c0_i32_1 : i32, i32, i32, i32
  }
  func.func @transform_20(%arg0: i32) -> (i32, i32, i32) {
    %c0_i32 = arith.constant 0 : i32
    %c0_i32_0 = arith.constant 0 : i32
    %c0_i32_1 = arith.constant 0 : i32
    return %arg0, %c0_i32, %c0_i32_0 : i32, i32, i32
  }
}

</mosaic_0001>

<bundles_post_ra>
// kernel: forward.3
= control target key start
LH: loop header
LB: loop body
LE: loop exit
PB: predicated region body
PF: predicated region fallthrough
CT: control target
= control target key end

     0   :  { %13 = vsyncpa [#allocation3], 0  ;;  %s543_s0 = inlined_call_operand.vmem [shape: f32[2,32,32], index: 0, kind: input, shape index: {}]   ;;  %s544_s1 = inlined_call_operand.vmem [shape: f32[32,32], index: 1, kind: input, shape index: {}]   ;;  %s545_s2 = inlined_call_operand.vmem [shape: f32[32,32], index: 2, kind: input, shape index: {}]   ;;  %s546_s3 = inlined_call_operand.vmem [shape: f32[1,32], index: 3, kind: input, shape index: {}]   ;;  %s547_s4 = inlined_call_operand.vmem [shape: f32[1,32], index: 4, kind: input, shape index: {}]   ;;  %s548_s5 = inlined_call_operand.hbm [shape: f32[1,32], index: 5, kind: input, shape index: {}]   ;;  %s549_s6 = inlined_call_operand.vmem [shape: f32[32,2], index: 6, kind: input, shape index: {}]   ;;  %s550_s7 = inlined_call_operand.hbm [shape: f32[1,2], index: 7, kind: input, shape index: {}]   ;;  %s551_s8 = inlined_call_operand.vmem [shape: f32[32,2], index: 8, kind: output, shape index: {}]  }
   0x1   :  { %s30_s29 = sshll.u32 %s548_s5, 4  ;;  %s31_s29 = int_to_ptr.hbm [resolvable:$true] %s30_s29 }
   0x2   :  { %14 = vsyncpa [#allocation5], 0  ;;  %s382_s30 = smov [#allocation2]   ;;  %s43_s12 = sshll.u32 %s550_s7, 4  ;;  %s44_s12 = int_to_ptr.hbm [resolvable:$true] %s43_s12 }
   0x3   :  { %s32_s9 = sshll.u32 %s382_s30, 4  ;;  %s383_s13 = smov [#allocation4]   ;;  %s33_s9 = int_to_ptr.vmem [resolvable:$true] %s32_s9 }
   0x4   :  { %35 = dma.hbm_to_vmem [thread:$0]  %s31_s29, 16, %s33_s9, [#allocation3]  }
   0x5   :  { %s45_s14 = sshll.u32 %s383_s13, 4  ;;  %s46_s14 = int_to_ptr.vmem [resolvable:$true] %s45_s14 }
   0x6   :  { %48 = dma.hbm_to_vmem [thread:$0]  %s44_s12, 16, %s46_s14, [#allocation5]  }
   0x7   :  { %378 = dma.done.wait [#allocation3], 16  }
   0x8   :  { %379 = vsyncadd [#allocation3], 4294967280 }
   0x9   :  { %380 = dma.done.wait [#allocation5], 16  }
   0xa   :  { %381 = vsyncadd [#allocation5], 4294967280  ;;  %v77_v0 = vld [vmem:[%s545_s2 + $0x10] sm:$0xff]  ;;  %v78_v1 = vld [vmem:[%s545_s2 + $0x18] sm:$0xff]  ;;  %vm83_vm0 = vcmask 261120   ;;  %v384_v45 = vmov 32.0  }
   0xb   :  { %v64_v2 = vld [vmem:[%s544_s1 + $0x10] sm:$0xff]  ;;  %v82_v3 = vpack.c.bf16 %v78_v1, %v77_v0  ;;  %v65_v4 = vld [vmem:[%s544_s1 + $0x18] sm:$0xff]  ;;  %v75_v5 = vld [vmem:[%s545_s2] sm:$0xff]  ;;  %320 = vrcp.f32 %v384_v45  ;;  %vm290_vm14 = vcmask 15360  }
   0xc   :  { %v76_v6 = vld [vmem:[%s545_s2 + $0x8] sm:$0xff]  ;;  %v69_v7 = vpack.c.bf16 %v65_v4, %v64_v2  ;;  %v62_v8 = vld [vmem:[%s544_s1] sm:$0xff]  ;;  %v303_v16 = vld [vmem:[%s543_s0 + $0x30] sm:$0xff] }
   0xd   :  { %v63_v9 = vld [vmem:[%s544_s1 + $0x8] sm:$0xff]  ;;  %96 = vmatpush.bf16.msra.mxu0 %v82_v3  ;;  %311 = vmatpush.bf16.msra.mxu3 %v82_v3  ;;  %v81_v10 = vpack.c.bf16 %v76_v6, %v75_v5  ;;  %v301_v11 = vld [vmem:[%s543_s0 + $0x20] sm:$0xff]  ;;  %v304_v17 = vld [vmem:[%s543_s0 + $0x38] sm:$0xff] }
   0xe   :  { %v302_v12 = vld [vmem:[%s543_s0 + $0x28] sm:$0xff]  ;;  %v58_v13 = vld [vmem:[%s543_s0] sm:$0xff]  ;;  %121 = vmatpush.bf16.msra.mxu1 %v69_v7  ;;  %v68_v14 = vpack.c.bf16 %v63_v9, %v62_v8  ;;  %v80_v19 = vpack.c.bf16 %v304_v17, %v303_v16  ;;  %v60_v21 = vld [vmem:[%s543_s0 + $0x10] sm:$0xff] }
   0xf   :  { %v59_v15 = vld [vmem:[%s543_s0 + $0x8] sm:$0xff]  ;;  %v79_v18 = vpack.c.bf16 %v302_v12, %v301_v11  ;;  %v61_v22 = vld [vmem:[%s543_s0 + $0x18] sm:$0xff]  ;;  %v316_v25 = vld [vmem:[%s546_s3] ss:$0 sm:$0xff] }
  0x10   :  { %v66_v20 = vpack.c.bf16 %v59_v15, %v58_v13  ;;  %v67_v23 = vpack.c.bf16 %v61_v22, %v60_v21  ;;  %v255_v8 = vld [vmem:[%s549_s6 + $0x10] sm:$0xff]  ;;  %v256_v9 = vld [vmem:[%s549_s6 + $0x18] sm:$0xff]  ;;  %v253_v13 = vld [vmem:[%s549_s6] sm:$0xff] }
  0x11   :  { %97 = vmatpush.bf16.msra.mxu0 %v81_v10  ;;  %312 = vmatpush.bf16.msra.mxu3 %v81_v10  ;;  %v321_v46 = vpop.eup %320  ;;  %v260_v10 = vpack.c.bf16 %v256_v9, %v255_v8  ;;  %v319_v8 = vld [vmem:[#allocation4] ss:$0 sm:$0xff] }
  0x12   :  { %122 = vmatpush.bf16.msra.mxu1 %v68_v14  ;;  %v157_v47 = vmul.f32 32.0, %v321_v46  ;;  %vm161_vm1 = vweird.f32 %v321_v46  ;;  %v254_v14 = vld [vmem:[%s549_s6 + $0x8] sm:$0xff] }
  0x13   :  { %277 = vmatpush.bf16.msra.mxu2 %v260_v10  ;;  %v259_v15 = vpack.c.bf16 %v254_v14, %v253_v13 }
  0x14   :  { %305 = vmatmul.msk.bf16.vlgmr.msra.gmra.mxu0 %vm83_vm0, %v79_v18  ;;  %306 = vmatmul.msk.bf16.vlgmr.msra.gmra.mxu3 %vm83_vm0, %v80_v19  ;;  %v158_v48 = vsub.f32 1.0, %v157_v47  ;;  %v318_v47 = vld [vmem:[#allocation2] ss:$0 sm:$0xff] }
  0x15   :  { %307 = vmatmul.msk.bf16.vlgmr.msra.gmra.mxu1 %vm83_vm0, %v66_v20 }
  0x16   :  { %v159_v49 = vmul.f32 %v321_v46, %v158_v48 }
  0x17   :  { %278 = vmatpush.bf16.msra.mxu2 %v259_v15 }
  0x18   :  { %v160_v50 = vadd.f32 %v321_v46, %v159_v49 }
  0x1a   :  { %v162_v51 = vsel %vm161_vm1, %v321_v46, %v160_v50 }
  0x25   :  { %308 = vmatmul.msk.bf16.gmra.mxu1 %vm83_vm0, %v67_v23 }
  0x91   :  { %v99_v24 = vpop.f32.mrf.mxu0 }
  0x92   :  { %v124_v26 = vpop.f32.mrf.mxu1 }
  0x93   :  { %v125_v27 = vadd.f32 %v124_v26, %v99_v24 }
  0x95   :  { %v138_v28 = vadd.f32 %v316_v25, %v125_v27 }
  0x97   :  { %v144_v29 = vsel %vm83_vm0, %v138_v28, 0.0  ;;  %v104_v35 = vpop.f32.mrf.mxu3 }
  0x98   :  { %145 = vadd.xlane.f32.xlu0 %v144_v29 }
  0x99   :  { %v101_v30 = vpop.f32.mrf.mxu0 }
  0x9a   :  { %v126_v31 = vpop.f32.mrf.mxu1 }
  0x9b   :  { %v127_v32 = vadd.f32 %v126_v31, %v101_v30 }
  0x9d   :  { %v139_v33 = vadd.f32 %v316_v25, %v127_v32 }
  0x9f   :  { %v147_v34 = vsel %vm83_vm0, %v139_v33, 0.0  ;;  %v106_v40 = vpop.f32.mrf.mxu3 }
  0xa0   :  { %148 = vadd.xlane.f32.xlu0 %v147_v34 }
  0xa2   :  { %v129_v36 = vpop.f32.mrf.mxu1 }
  0xa3   :  { %v130_v37 = vadd.f32 %v129_v36, %v104_v35 }
  0xa5   :  { %v140_v38 = vadd.f32 %v316_v25, %v130_v37 }
  0xa7   :  { %v150_v39 = vsel %vm83_vm0, %v140_v38, 0.0 }
  0xa8   :  { %151 = vadd.xlane.f32.xlu1 %v150_v39 }
  0xaa   :  { %v131_v41 = vpop.f32.mrf.mxu1 }
  0xab   :  { %v132_v42 = vadd.f32 %v131_v41, %v106_v40  ;;  %v317_v40 = vld [vmem:[%s547_s4] ss:$0 sm:$0xff] }
  0xad   :  { %v141_v43 = vadd.f32 %v316_v25, %v132_v42 }
  0xaf   :  { %v153_v44 = vsel %vm83_vm0, %v141_v43, 0.0 }
  0xb0   :  { %154 = vadd.xlane.f32.xlu1 %v153_v44 }
 0x10b   :  { %v146_v52 = vpop.xlane.xlu0 %145 }
 0x10c   :  { %v163_v53 = vmul.f32 %v162_v51, %v146_v52 }
 0x10e   :  { %v167_v54 = vsub.f32 %v138_v28, %v163_v53 }
 0x110   :  { %v171_v55 = vmul.f32 %v167_v54, %v167_v54 }
 0x112   :  { %v175_v56 = vsel %vm83_vm0, %v171_v55, 0.0 }
 0x113   :  { %176 = vadd.xlane.f32.xlu2 %v175_v56  ;;  %v149_v57 = vpop.xlane.xlu0 %148 }
 0x114   :  { %v164_v58 = vmul.f32 %v162_v51, %v149_v57 }
 0x116   :  { %v496_v59 = vsub.f32 %v139_v33, %v164_v58 }
 0x118   :  { %v172_v60 = vmul.f32 %v496_v59, %v496_v59 }
 0x11a   :  { %v178_v61 = vsel %vm83_vm0, %v172_v60, 0.0 }
 0x11b   :  { %v152_v62 = vpop.xlane.xlu1 %151  ;;  %179 = vadd.xlane.f32.xlu2 %v178_v61 }
 0x11c   :  { %v165_v63 = vmul.f32 %v162_v51, %v152_v62 }
 0x11e   :  { %v501_v0 = vsub.f32 %v140_v38, %v165_v63 }
 0x120   :  { %v173_v1 = vmul.f32 %v501_v0, %v501_v0 }
 0x122   :  { %v181_v2 = vsel %vm83_vm0, %v173_v1, 0.0 }
 0x123   :  { %v155_v3 = vpop.xlane.xlu1 %154  ;;  %182 = vadd.xlane.f32.xlu0 %v181_v2 }
 0x124   :  { %v166_v4 = vmul.f32 %v162_v51, %v155_v3 }
 0x126   :  { %v506_v5 = vsub.f32 %v141_v43, %v166_v4 }
 0x128   :  { %v174_v6 = vmul.f32 %v506_v5, %v506_v5 }
 0x12a   :  { %v184_v7 = vsel %vm83_vm0, %v174_v6, 0.0 }
 0x12b   :  { %185 = vadd.xlane.f32.xlu1 %v184_v7 }
 0x186   :  { %v177_v11 = vpop.xlane.xlu2 %176 }
 0x187   :  { %v187_v12 = vmul.f32 %v177_v11, %v162_v51 }
 0x189   :  { %v191_v16 = vadd.f32 1e-05, %v187_v12 }
 0x18b   :  { %322 = vrsqrt.f32 %v191_v16  ;;  %vm201_vm3 = vweird.f32 %v191_v16 }
 0x18e   :  { %v180_v17 = vpop.xlane.xlu2 %179 }
 0x18f   :  { %v188_v18 = vmul.f32 %v180_v17, %v162_v51 }
 0x191   :  { %v323_v19 = vpop.eup %322  ;;  %v192_v20 = vadd.f32 1e-05, %v188_v18 }
 0x192   :  { %v196_v21 = vmul.f32 %v323_v19, %v191_v16  ;;  %vm202_vm2 = vweird.f32 %v323_v19 }
 0x193   :  { %324 = vrsqrt.f32 %v192_v20  ;;  %vm203_vm4 = vmor %vm201_vm3, %vm202_vm2  ;;  %vm211_vm6 = vweird.f32 %v192_v20 }
 0x194   :  { %v197_v22 = vmul.f32 %v323_v19, %v196_v21 }
 0x196   :  { %v198_v23 = vmul.f32 0.5, %v197_v22  ;;  %v183_v24 = vpop.xlane.xlu0 %182 }
 0x197   :  { %v189_v25 = vmul.f32 %v183_v24, %v162_v51 }
 0x198   :  { %v199_v26 = vsub.f32 1.5, %v198_v23 }
 0x199   :  { %v325_v27 = vpop.eup %324  ;;  %v193_v28 = vadd.f32 1e-05, %v189_v25 }
 0x19a   :  { %v200_v29 = vmul.f32 %v323_v19, %v199_v26  ;;  %v206_v30 = vmul.f32 %v325_v27, %v192_v20  ;;  %vm212_vm5 = vweird.f32 %v325_v27 }
 0x19b   :  { %326 = vrsqrt.f32 %v193_v28  ;;  %vm213_vm7 = vmor %vm211_vm6, %vm212_vm5  ;;  %vm221_vm9 = vweird.f32 %v193_v28 }
 0x19c   :  { %v207_v31 = vmul.f32 %v325_v27, %v206_v30  ;;  %v204_v32 = vsel %vm203_vm4, %v323_v19, %v200_v29 }
 0x19d   :  { %v235_v38 = vmul.f32 %v204_v32, %v167_v54 }
 0x19e   :  { %v208_v33 = vmul.f32 0.5, %v207_v31  ;;  %v186_v34 = vpop.xlane.xlu1 %185 }
 0x19f   :  { %v190_v35 = vmul.f32 %v186_v34, %v162_v51  ;;  %v242_v46 = vmul.f32 %v317_v40, %v235_v38 }
 0x1a0   :  { %v209_v36 = vsub.f32 1.5, %v208_v33 }
 0x1a1   :  { %v327_v37 = vpop.eup %326  ;;  %v194_v39 = vadd.f32 1e-05, %v190_v35  ;;  %v249_v52 = vadd.f32 %v318_v47, %v242_v46 }
 0x1a2   :  { %v210_v41 = vmul.f32 %v325_v27, %v209_v36  ;;  %v216_v42 = vmul.f32 %v327_v37, %v193_v28  ;;  %vm222_vm8 = vweird.f32 %v327_v37 }
 0x1a3   :  { %328 = vrsqrt.f32 %v194_v39  ;;  %vm223_vm10 = vmor %vm221_vm9, %vm222_vm8  ;;  %vm231_vm12 = vweird.f32 %v194_v39 }
 0x1a4   :  { %v214_v43 = vsel %vm213_vm7, %v325_v27, %v210_v41  ;;  %v217_v44 = vmul.f32 %v327_v37, %v216_v42 }
 0x1a5   :  { %v236_v45 = vmul.f32 %v214_v43, %v496_v59 }
 0x1a6   :  { %v218_v48 = vmul.f32 0.5, %v217_v44 }
 0x1a7   :  { %v243_v49 = vmul.f32 %v317_v40, %v236_v45 }
 0x1a8   :  { %v219_v50 = vsub.f32 1.5, %v218_v48 }
 0x1a9   :  { %v329_v51 = vpop.eup %328  ;;  %v250_v53 = vadd.f32 %v318_v47, %v243_v49 }
 0x1aa   :  { %v220_v54 = vmul.f32 %v327_v37, %v219_v50  ;;  %v226_v55 = vmul.f32 %v329_v51, %v194_v39  ;;  %vm232_vm11 = vweird.f32 %v329_v51 }
 0x1ab   :  { %v257_v56 = vpack.c.bf16 %v250_v53, %v249_v52  ;;  %vm233_vm13 = vmor %vm231_vm12, %vm232_vm11 }
 0x1ac   :  { %v227_v57 = vmul.f32 %v329_v51, %v226_v55  ;;  %v224_v58 = vsel %vm223_vm10, %v327_v37, %v220_v54 }
 0x1ad   :  { %309 = vmatmul.msk.bf16.vlgmr.msra.gmra.mxu2 %vm83_vm0, %v257_v56  ;;  %v237_v61 = vmul.f32 %v224_v58, %v501_v0 }
 0x1ae   :  { %v228_v60 = vmul.f32 0.5, %v227_v57 }
 0x1af   :  { %v244_v2 = vmul.f32 %v317_v40, %v237_v61 }
 0x1b0   :  { %v229_v59 = vsub.f32 1.5, %v228_v60 }
 0x1b1   :  { %v251_v4 = vadd.f32 %v318_v47, %v244_v2 }
 0x1b2   :  { %v230_v62 = vmul.f32 %v329_v51, %v229_v59 }
 0x1b4   :  { %v234_v63 = vsel %vm233_vm13, %v329_v51, %v230_v62 }
 0x1b5   :  { %v238_v1 = vmul.f32 %v234_v63, %v506_v5 }
 0x1b7   :  { %v245_v3 = vmul.f32 %v317_v40, %v238_v1 }
 0x1b9   :  { %v252_v6 = vadd.f32 %v318_v47, %v245_v3 }
 0x1bb   :  { %v258_v7 = vpack.c.bf16 %v252_v6, %v251_v4 }
 0x1bd   :  { %310 = vmatmul.msk.bf16.gmra.mxu2 %vm83_vm0, %v258_v7 }
 0x230   :  { %v280_v9 = vpop.f32.mrf.mxu2 }
 0x231   :  { %v281_v10 = vadd.f32 %v319_v8, %v280_v9 }
 0x233   :  { %291 = vst.msk [vmem:[%s551_s8] sm:$0xff] %vm290_vm14, %v281_v10 }
 0x238   :  { %v282_v0 = vpop.f32.mrf.mxu2 }
 0x239   :  { %v283_v11 = vadd.f32 %v319_v8, %v282_v0 }
 0x23b   :  { %292 = vst.msk [vmem:[%s551_s8 + $0x8] sm:$0xff] %vm290_vm14, %v283_v11 }
 0x240   :  { %v285_v5 = vpop.f32.mrf.mxu2 }
 0x241   :  { %v286_v12 = vadd.f32 %v319_v8, %v285_v5 }
 0x243   :  { %293 = vst.msk [vmem:[%s551_s8 + $0x10] sm:$0xff] %vm290_vm14, %v286_v12 }
 0x248   :  { %v287_v13 = vpop.f32.mrf.mxu2 }
 0x249   :  { %v288_v14 = vadd.f32 %v319_v8, %v287_v13 }
 0x24b   :  { %294 = vst.msk [vmem:[%s551_s8 + $0x18] sm:$0xff] %vm290_vm14, %v288_v14 }
 0x24c   :  { %299 = vsyncpa [#allocation3], 1 }
 0x24d   :  { %300 = vsyncpa [#allocation5], 1 }

// kernel: forward.2
= control target key start
LH: loop header
LB: loop body
LE: loop exit
PB: predicated region body
PF: predicated region fallthrough
CT: control target
= control target key end

     0   :  { %s6349_s0 = inlined_call_operand.vmem [shape: f32[2,32,12], index: 0, kind: input, shape index: {}]   ;;  %s6350_s1 = inlined_call_operand.vmem [shape: f32[32,32], index: 1, kind: input, shape index: {}]   ;;  %s6351_s2 = inlined_call_operand.vmem [shape: f32[32,32], index: 2, kind: input, shape index: {}]   ;;  %s6352_s3 = inlined_call_operand.vmem [shape: f32[32,32], index: 3, kind: input, shape index: {}]   ;;  %s6353_s4 = inlined_call_operand.vmem [shape: f32[2,12,32], index: 4, kind: input, shape index: {}]   ;;  %s6354_s5 = inlined_call_operand.vmem [shape: f32[2,1,32], index: 5, kind: input, shape index: {}]   ;;  %s6355_s6 = inlined_call_operand.vmem [shape: f32[2,2,1,32], index: 6, kind: input, shape index: {}]   ;;  %s6356_s7 = inlined_call_operand.vmem [shape: f32[2,2,1,32], index: 7, kind: input, shape index: {}]   ;;  %s6357_s8 = inlined_call_operand.vmem [shape: f32[2,2,1,32], index: 8, kind: input, shape index: {}]   ;;  %s6358_s9 = inlined_call_operand.vmem [shape: f32[2,2,1,32], index: 9, kind: input, shape index: {}]   ;;  %s6359_s10 = inlined_call_operand.vmem [shape: f32[2,2,32,64], index: 10, kind: input, shape index: {}]   ;;  %s6360_s11 = inlined_call_operand.vmem [shape: f32[2,2,1,64], index: 11, kind: input, shape index: {}]   ;;  %s6361_s12 = inlined_call_operand.vmem [shape: f32[2,2,32,32], index: 12, kind: input, shape index: {}]   ;;  %s6362_s13 = inlined_call_operand.vmem [shape: f32[2,2,1,32], index: 13, kind: input, shape index: {}]   ;;  %s6363_s14 = inlined_call_operand.vmem [shape: f32[2,2,32,32], index: 14, kind: input, shape index: {}]   ;;  %s6364_s15 = inlined_call_operand.vmem [shape: f32[2,2,1,32], index: 15, kind: input, shape index: {}]   ;;  %s6365_s16 = inlined_call_operand.vmem [shape: f32[2,2,32,64], index: 16, kind: input, shape index: {}]   ;;  %s6366_s17 = inlined_call_operand.hbm [shape: f32[2,2,1,64], index: 17, kind: input, shape index: {}]   ;;  %s6367_s18 = inlined_call_operand.vmem [shape: f32[2,2,64,32], index: 18, kind: input, shape index: {}]   ;;  %s6368_s19 = inlined_call_operand.hbm [shape: f32[2,2,1,32], index: 19, kind: input, shape index: {}]   ;;  %s6369_s20 = inlined_call_operand.vmem [shape: f32[2,32,32], index: 20, kind: output, shape index: {}]  }
   0x1   :  { %6400 = sst [smem:[#allocation11_spill]] %s6349_s0 }
   0x2   :  { %6401 = sst [smem:[#allocation12_spill]] %s6350_s1 }
   0x3   :  { %6402 = sst [smem:[#allocation13_spill]] %s6351_s2 }
   0x4   :  { %6403 = sst [smem:[#allocation14_spill]] %s6352_s3 }
   0x5   :  { %6404 = sst [smem:[#allocation15_spill]] %s6353_s4 }
   0x6   :  { %6405 = sst [smem:[#allocation16_spill]] %s6354_s5 }
   0x7   :  { %6406 = sst [smem:[#allocation17_spill]] %s6355_s6 }
   0x8   :  { %6407 = sst [smem:[#allocation18_spill]] %s6357_s8 }
   0x9   :  { %6408 = sst [smem:[#allocation19_spill]] %s6358_s9 }
   0xa   :  { %6409 = sst [smem:[#allocation20_spill]] %s6363_s14 }
   0xb   :  { %6410 = sst [smem:[#allocation21_spill]] %s6365_s16 }
   0xc   :  { %6411 = sst [smem:[#allocation22_spill]] %s6366_s17 }
   0xd   :  { %6412 = sst [smem:[#allocation23_spill]] %s6367_s18 }
   0xe   :  { %6413 = sst [smem:[#allocation24_spill]] %s6369_s20 }
   0xf   :  { %25 = vsyncpa [#allocation3], 0 }
  0x10   :  { %27 = vsyncpa [#allocation3 + $0x1], 0 }
  0x11   :  { %28 = vsyncpa [#allocation5], 0 }
  0x12   :  { %30 = vsyncpa [#allocation5 + $0x1], 0  ;;  %s4860_s1 = smov 0   ;;  %s4862_s22 = smov 0  }
  0x13   :  { %s4864_s23 = smov 0   ;;  %s4866_s24 = smov 0  }
  0x14 LB: > { %6414 = sst [smem:[#allocation8_spill]] %s4736_s23  ;;  %s4879_s2 = sadd.s32 4294967295, %s4740_s24   ;;  %s4740_s24 = sphi %s4866_s24, %s6482_s24   ;;  %s4736_s23 = sphi %s4864_s23, %s6484_s23   ;;  %s4732_s22 = sphi %s4862_s22, %s6486_s22   ;;  %s4728_s1 = sphi %s4860_s1, %s6485_s1  }
  0x15   : > { %s4882_s25 = sadd.s32 1, %s4740_s24   ;;  %s470_s26 = sadd.s32 1, %s4736_s23 }
  0x16   : > { %6415 = sst [smem:[#allocation9_spill]] %s4882_s25  ;;  %s467_s3 = ssub.s32 %s4740_s24, %s4882_s25 }
  0x17   : > { %p468_p0 = scmp.eq.s32.totalorder %s467_s3, 0  ;;  %p477_p1 = scmp.ne.s32.totalorder %s4736_s23, %s4732_s22 }
  0x18   : > { %p478_p2 = scmp.eq.s32.totalorder %s4740_s24, 0  ;;  %p483_p3 = scmp.ne.s32.totalorder %s4732_s22, %s4728_s1 }
  0x19   : > { %s4892_s27 = scalar_select %p468_p0, %s4736_s23, %s470_s26  }
  0x1a   : > { %p4894_p4 = por %p478_p2, %p477_p1  ;;  %p484_p5 = scmp.eq.s32.totalorder %s4879_s2, 0 }
  0x1b   : > { %6416 = sst [smem:[#allocation10_spill]] %s4892_s27  ;;  %p4315_p6 = scmp.lt.s32.totalorder %s4740_s24, 2 }
  0x1c   : > { %p4900_p7 = por %p484_p5, %p483_p3  ;;  %s4905_s29 = sand.u32 1, %s4736_s23  }
  0x1d   : > { %s6376_s30 = sshll.u32 %s4905_s29, 1  ;;  %s6377_s0 = sshll.u32 %s4740_s24, 1 }
  0x1e   : > { %s6419_s17 = sld [smem:[#allocation22_spill]]  ;;  %s701_s26 = scalar_lea.vmem [#allocation2], %s6376_s30 }
  0x1f   : > { %s708_s27 = sshll.u32 %s701_s26, 4  ;;  %p4918_p8 = pnand %p4315_p6, %p4894_p4  ;;  %s709_s27 = int_to_ptr.vmem [resolvable:$true] %s708_s27 }
  0x20   : > { %p4175_p9 = scmp.ge.s32.totalorder %s4740_s24, 1  ;;  %s698_s20 = scalar_lea.sflag [#allocation3], %s4905_s29 }
  0x21   : > { %p4646_p11 = pneg %p4918_p8 }
  0x24   : > { %s705_s3 = scalar_lea.hbm %s6419_s17, %s6377_s0  ;;  %s4649_s1 = scalar_lea.hbm %s6419_s17, 4 }
  0x25   : > { %s706_s25 = sshll.u32 %s705_s3, 4  ;;  %s707_s25 = int_to_ptr.hbm [resolvable:$true] %s706_s25 }
  0x26   : > { %s4642_s18 = sshra.s32 %s707_s25, 4  ;;  %s4643_s18 = int_to_ptr.hbm [resolvable:$true] %s4642_s18 }
  0x27   : > { %s4644_s16 = scalar_lea.hbm %s4643_s18, 2  ;;  %p4650_p0 = scmp.lt.s32.totalorder %s4643_s18, %s6419_s17 }
  0x28   : > { %p4645_p10 = scmp.ne.s32.totalorder %s4643_s18, %s4644_s16  ;;  %p4651_p1 = scmp.lt.s32.totalorder %s4649_s1, %s4644_s16 }
  0x2a   : > { %p4647_p12 = pnand %p4646_p11, %p4645_p10  ;;  %p4652_p2 = por %p4651_p1, %p4650_p0 }
  0x2c   : > { %p4648_p13 = pneg %p4647_p12 }
  0x2e   : > { %p4653_p3 = pnand %p4652_p2, %p4648_p13 }
  0x30   : > { %4656 = shalt.err (!%p4653_p3)
}
  0x31   : > { %s4742_s30 = smov 16   ;;  %s4743_s0 = smov 1  }
  0x32   : > { %4311 = dma.hbm_to_vmem [thread:$0]  (!%p4918_p8), %s707_s25, 32, %s709_s27, %s698_s20, %s4742_s30, %s4742_s30, %s4743_s0  }
  0x33   : > { %p745_p4 = scmp.lt.s32.totalorder %s4740_s24, 3  ;;  %s6421_s21 = sshll.u32 %s4740_s24, 1 }
  0x34   : > { %s734_s16 = scalar_lea.hbm %s6368_s19, %s6421_s21  ;;  %s6423_s26 = sshll.u32 %s4905_s29, 1 }
  0x35   : > { %p4945_p5 = pnand %p4175_p9, %p745_p4  ;;  %s735_s1 = sshll.u32 %s734_s16, 4  ;;  %s736_s1 = int_to_ptr.hbm [resolvable:$true] %s735_s1 }
  0x36   : > { %s730_s17 = scalar_lea.vmem [#allocation4], %s6423_s26  ;;  %s727_s8 = scalar_lea.sflag [#allocation5], %s4905_s29 }
  0x37   : > { %s737_s9 = sshll.u32 %s730_s17, 4  ;;  %s4672_s14 = sshra.s32 %s736_s1, 4  ;;  %s738_s9 = int_to_ptr.vmem [resolvable:$true] %s737_s9  ;;  %s4673_s14 = int_to_ptr.hbm [resolvable:$true] %s4672_s14 }
  0x38   : > { %s4674_s20 = scalar_lea.hbm %s4673_s14, 2  ;;  %s4679_s27 = scalar_lea.hbm %s6368_s19, 4 }
  0x39   : > { %p4675_p6 = scmp.ne.s32.totalorder %s4673_s14, %s4674_s20  ;;  %p4680_p9 = scmp.lt.s32.totalorder %s4673_s14, %s6368_s19 }
  0x3a   : > { %p4681_p13 = scmp.lt.s32.totalorder %s4679_s27, %s4674_s20 }
  0x3b   : > { %p4677_p10 = pnand %p4675_p6, %p4646_p11 }
  0x3c   : > { %p4682_p0 = por %p4681_p13, %p4680_p9 }
  0x3d   : > { %p4678_p12 = pneg %p4677_p10 }
  0x3f   : > { %p4683_p1 = pnand %p4682_p0, %p4678_p12 }
  0x41   : > { %4686 = shalt.err (!%p4683_p1)
}
  0x42   : > { %4314 = dma.hbm_to_vmem [thread:$0]  (!%p4918_p8), %s736_s1, 32, %s738_s9, %s727_s8, %s4742_s30, %s4742_s30, %s4743_s0  }
  0x43   : > { %749 = sbr.rel (%p4945_p5) target bundleno = 4682 (0x124a), region = 100  ;;  %s751_s17 = sand.u32 (!%p4945_p5), 1, %s4732_s22  }
  0x44   : > { %s4176_s29 = sshll.u32 (!%p4945_p5), %s751_s17, 1  ;;  %s752_s3 = scalar_lea.sflag (!%p4945_p5), [#allocation3], %s751_s17 }
  0x45   : > { %s4966_s16 = scalar_lea.vmem (!%p4945_p5), [#allocation2], %s4176_s29 }
  0x48   : > { %4719 = dma.done.wait (%p4900_p7), %s752_s3, 32  }
  0x49   : > { %4721 = vsyncadd (%p4900_p7), %s752_s3, 4294967264  ;;  %s762_s14 = scalar_lea.sflag [#allocation5], %s751_s17  ;;  %s4972_s26 = scalar_lea.vmem [#allocation4], %s4176_s29 }
  0x4a   : > { %4723 = dma.done.wait (%p4900_p7), %s762_s14, 32  }
  0x4b   : > { %4725 = vsyncadd (%p4900_p7), %s762_s14, 4294967264  ;;  %p894_p8 = scmp.lt.s32.totalorder %s4879_s2, 1  ;;  %s6424_s30 = sld [smem:[#allocation15_spill]]  ;;  %vm998_vm0 = vcmask 1045504   ;;  %vm991_vm1 = vcmask 97280   ;;  %vm1023_vm2 = vcmask 261120  }
  0x4c   : > { %s6425_s5 = sld [smem:[#allocation16_spill]]  ;;  %v4744_v23 = vmov 32.0   ;;  %s6388_s17 = smov 96  }
  0x4d   : > { %s6488_s2 = smov (!%p894_p8, %s4879_s2), 1  ;;  %s6426_s27 = sld [smem:[#allocation11_spill]]  ;;  %4440 = vrcp.f32 %v4744_v23 }
  0x4e   : > { %s4295_s8 = sshll.u32 %s6488_s2, 4  ;;  %s6378_s18 = sshll.u32 %s6488_s2, 5 }
  0x4f   : > { %s5029_s28 = sshll.u32 %s6488_s2, 1  ;;  %s6427_s6 = sld [smem:[#allocation17_spill]] }
  0x50   : > { %s5045_s9 = scalar_lea.vmem %s6356_s7, %s5029_s28  ;;  %s6432_s20 = sld [smem:[#allocation12_spill]] }
  0x51   : > { %s903_s0 = scalar_lea.vmem %s6424_s30, %s4295_s8  ;;  %s5113_s30 = scalar_lea.vmem %s6362_s13, %s5029_s28 }
  0x52   : > { %s906_s4 = scalar_lea.vmem %s6425_s5, %s6488_s2  ;;  %v982_v0 = vld [vmem:[%s903_s0] sm:$0xff]  ;;  %v983_v1 = vld [vmem:[%s903_s0 + $0x8] sm:$0xf]  ;;  %s6428_s0 = sld [smem:[#allocation14_spill]] }
  0x53   : > { %s898_s21 = scalar_lea.vmem %s6426_s27, %s6378_s18  ;;  %v986_v2 = vpack.c.bf16 %v983_v1, %v982_v0  ;;  %v4421_v10 = vld [vmem:[%s906_s4] ss:$0 sm:$0xff]  ;;  %v4441_v24 = vpop.eup %4440  ;;  %s5120_s4 = scalar_lea.vmem %s6360_s11, %s5029_s28 }
  0x54   : > { %v978_v3 = vld [vmem:[%s898_s21] sm:$0xff]  ;;  %v979_v4 = vld [vmem:[%s898_s21 + $0x8] sm:$0xff]  ;;  %v980_v7 = vld [vmem:[%s898_s21 + $0x10] sm:$0xff]  ;;  %v1037_v25 = vmul.f32 32.0, %v4441_v24  ;;  %vm1041_vm3 = vweird.f32 %v4441_v24  ;;  %s6431_s8 = sld [smem:[#allocation13_spill]]  ;;  %s6392_s29 = smov 120  }
  0x55   : > { %v1000_v5 = vsel %vm998_vm0, %v986_v2, 0  ;;  %v984_v6 = vpack.c.bf16 %v979_v4, %v978_v3  ;;  %v981_v8 = vld [vmem:[%s898_s21 + $0x18] sm:$0xff]  ;;  %s5036_s3 = scalar_lea.vmem %s6427_s6, %s5029_s28  ;;  %s5081_s21 = sshll.u32 %s6488_s2, 6  ;;  %vm1244_vm0 = vcmask 64512  }
  0x56   : > { %1009 = vmatpush.bf16.msra.mxu0 %v1000_v5  ;;  %v985_v9 = vpack.c.bf16 %v981_v8, %v980_v7  ;;  %v1038_v26 = vsub.f32 1.0, %v1037_v25  ;;  %s5087_s14 = scalar_lea.vmem %s6361_s12, %s5081_s21  ;;  %s5126_s27 = scalar_lea.vmem %s6359_s10, %s5081_s21 }
  0x57   : > { %s6390_s23 = smov 88   ;;  %s6382_s1 = smov 112  }
  0x58   : > { %v1039_v27 = vmul.f32 %v4441_v24, %v1038_v26  ;;  %v976_v50 = vld [vmem:[%s6428_s0 + $0x10] sm:$0xff]  ;;  %v977_v51 = vld [vmem:[%s6428_s0 + $0x18] sm:$0xff]  ;;  %v974_v55 = vld [vmem:[%s6428_s0] sm:$0xff]  ;;  %s6386_s18 = smov 104   ;;  %s6380_s24 = smov 80  }
  0x59   : > { %4201 = vmatmul.msk.bf16.vlgmr.msra.gmra.mxu0 %vm991_vm1, %v984_v6  ;;  %v5063_v52 = vpack.c.bf16 %v977_v51, %v976_v50  ;;  %v975_v56 = vld [vmem:[%s6428_s0 + $0x8] sm:$0xff]  ;;  %s6384_s0 = smov 72   ;;  %s6398_s25 = smov 8  }
  0x5a   : > { %v1040_v28 = vadd.f32 %v4441_v24, %v1039_v27  ;;  %v5074_v57 = vpack.c.bf16 %v975_v56, %v974_v55  ;;  %s6463_s5 = sld [smem:[#allocation20_spill]] }
  0x5b   : > { %1153 = vmatpush.bf16.msra.mxu1 %v5063_v52  ;;  %4302 = vmatpush.bf16.msra.mxu3 %v5063_v52 }
  0x5c   : > { %v5012_v29 = vsel %vm1041_vm3, %v4441_v24, %v1040_v28 }
  0x5f   : > { %1154 = vmatpush.bf16.msra.mxu1 %v5074_v57  ;;  %4303 = vmatpush.bf16.msra.mxu3 %v5074_v57 }
  0x60   : > { %s5647_s6 = scalar_lea.vmem %s6463_s5, %s5081_s21 }
  0x69   : > { %4202 = vmatmul.msk.bf16.gmra.mxu0 %vm991_vm1, %v985_v9  ;;  %vm1267_vm1 = vcmask 130048  }
  0xd6   : > { %v1011_v11 = vpop.f32.mrf.mxu0 }
  0xd7   : > { %v4996_v12 = vadd.f32 %v4421_v10, %v1011_v11  ;;  %v1213_v11 = vld [vmem:[%s5087_s14 + $0x10] sm:$0xff] }
  0xd9   : > { %v1024_v13 = vsel %vm1023_vm2, %v4996_v12, 0.0 }
  0xda   : > { %1025 = vadd.xlane.f32.xlu0 %v1024_v13  ;;  %v1214_v13 = vld [vmem:[%s5087_s14 + $0x18] sm:$0xff] }
  0xde   : > { %v1013_v14 = vpop.f32.mrf.mxu0 }
  0xdf   : > { %v5000_v15 = vadd.f32 %v4421_v10, %v1013_v14  ;;  %v1211_v14 = vld [vmem:[%s5087_s14] sm:$0xff] }
  0xe1   : > { %v1027_v16 = vsel %vm1023_vm2, %v5000_v15, 0.0 }
  0xe2   : > { %1028 = vadd.xlane.f32.xlu0 %v1027_v16 }
  0xe6   : > { %v1016_v17 = vpop.f32.mrf.mxu0 }
  0xe7   : > { %v5004_v18 = vadd.f32 %v4421_v10, %v1016_v17 }
  0xe9   : > { %v1030_v19 = vsel %vm1023_vm2, %v5004_v18, 0.0 }
  0xea   : > { %1031 = vadd.xlane.f32.xlu1 %v1030_v19 }
  0xee   : > { %v1018_v20 = vpop.f32.mrf.mxu0 }
  0xef   : > { %v5008_v21 = vadd.f32 %v4421_v10, %v1018_v20  ;;  %v1216_v20 = vpack.c.bf16 %v1214_v13, %v1213_v11 }
  0xf1   : > { %v1033_v22 = vsel %vm1023_vm2, %v5008_v21, 0.0  ;;  %1227 = vmatpush.bf16.msrb.mxu3 %v1216_v20 }
  0xf2   : > { %1034 = vadd.xlane.f32.xlu1 %v1033_v22  ;;  %v1212_v22 = vld [vmem:[%s5087_s14 + $0x8] sm:$0xff] }
  0xf3   : > { %v1215_v25 = vpack.c.bf16 %v1212_v22, %v1211_v14  ;;  %v972_v22 = vld [vmem:[%s6431_s8 + $0x10] sm:$0xff] }
  0xf5   : > { %1228 = vmatpush.bf16.msrb.mxu3 %v1215_v25  ;;  %v973_v25 = vld [vmem:[%s6431_s8 + $0x18] sm:$0xff] }
 0x14d   : > { %v1026_v30 = vpop.xlane.xlu0 %1025 }
 0x14e   : > { %v1043_v31 = vmul.f32 %v5012_v29, %v1026_v30  ;;  %v4422_v30 = vld [vmem:[%s5036_s3] ss:$0 sm:$0xff] }
 0x150   : > { %v5016_v32 = vsub.f32 %v4996_v12, %v1043_v31 }
 0x152   : > { %v1051_v33 = vmul.f32 %v5016_v32, %v5016_v32 }
 0x154   : > { %v1055_v34 = vsel %vm1023_vm2, %v1051_v33, 0.0 }
 0x155   : > { %1056 = vadd.xlane.f32.xlu2 %v1055_v34  ;;  %v1029_v35 = vpop.xlane.xlu0 %1028 }
 0x156   : > { %v1044_v36 = vmul.f32 %v5012_v29, %v1029_v35 }
 0x158   : > { %v5023_v37 = vsub.f32 %v5000_v15, %v1044_v36 }
 0x15a   : > { %v1052_v38 = vmul.f32 %v5023_v37, %v5023_v37 }
 0x15c   : > { %v1058_v39 = vsel %vm1023_vm2, %v1052_v38, 0.0 }
 0x15d   : > { %v1032_v40 = vpop.xlane.xlu1 %1031  ;;  %1059 = vadd.xlane.f32.xlu2 %v1058_v39  ;;  %v4423_v39 = vld [vmem:[%s5045_s9] ss:$0 sm:$0xff] }
 0x15e   : > { %v1045_v41 = vmul.f32 %v5012_v29, %v1032_v40 }
 0x160   : > { %v5039_v42 = vsub.f32 %v5004_v18, %v1045_v41 }
 0x162   : > { %v1053_v43 = vmul.f32 %v5039_v42, %v5039_v42 }
 0x164   : > { %v1061_v44 = vsel %vm1023_vm2, %v1053_v43, 0.0 }
 0x165   : > { %v1035_v45 = vpop.xlane.xlu1 %1034  ;;  %1062 = vadd.xlane.f32.xlu0 %v1061_v44 }
 0x166   : > { %v1046_v46 = vmul.f32 %v5012_v29, %v1035_v45 }
 0x168   : > { %v5052_v47 = vsub.f32 %v5008_v21, %v1046_v46 }
 0x16a   : > { %v1054_v48 = vmul.f32 %v5052_v47, %v5052_v47 }
 0x16c   : > { %v1064_v49 = vsel %vm1023_vm2, %v1054_v48, 0.0 }
 0x16d   : > { %1065 = vadd.xlane.f32.xlu1 %v1064_v49 }
 0x1c8   : > { %v1057_v53 = vpop.xlane.xlu2 %1056 }
 0x1c9   : > { %v1067_v54 = vmul.f32 %v1057_v53, %v5012_v29 }
 0x1cb   : > { %v1071_v58 = vadd.f32 1e-05, %v1067_v54 }
 0x1cd   : > { %4442 = vrsqrt.f32 %v1071_v58  ;;  %vm1081_vm5 = vweird.f32 %v1071_v58 }
 0x1d0   : > { %v1060_v59 = vpop.xlane.xlu2 %1059 }
 0x1d1   : > { %v1068_v60 = vmul.f32 %v1060_v59, %v5012_v29 }
 0x1d3   : > { %v4443_v61 = vpop.eup %4442  ;;  %v1072_v62 = vadd.f32 1e-05, %v1068_v60 }
 0x1d4   : > { %v1076_v63 = vmul.f32 %v4443_v61, %v1071_v58  ;;  %vm1082_vm4 = vweird.f32 %v4443_v61 }
 0x1d5   : > { %4444 = vrsqrt.f32 %v1072_v62  ;;  %vm5089_vm6 = vmor %vm1081_vm5, %vm1082_vm4  ;;  %vm1091_vm8 = vweird.f32 %v1072_v62 }
 0x1d6   : > { %v1077_v0 = vmul.f32 %v4443_v61, %v1076_v63 }
 0x1d8   : > { %v1078_v1 = vmul.f32 0.5, %v1077_v0  ;;  %v1063_v2 = vpop.xlane.xlu0 %1062 }
 0x1d9   : > { %v1069_v3 = vmul.f32 %v1063_v2, %v5012_v29  ;;  %v1175_v2 = vld [vmem:[%s5126_s27 + $0x8] sm:$0xff] }
 0x1da   : > { %v1079_v4 = vsub.f32 1.5, %v1078_v1  ;;  %v1174_v1 = vld [vmem:[%s5126_s27] sm:$0xff] }
 0x1db   : > { %v4445_v5 = vpop.eup %4444  ;;  %v1073_v6 = vadd.f32 1e-05, %v1069_v3  ;;  %v1180_v3 = vpack.c.bf16 %v1175_v2, %v1174_v1 }
 0x1dc   : > { %v1080_v7 = vmul.f32 %v4443_v61, %v1079_v4  ;;  %v1086_v8 = vmul.f32 %v4445_v5, %v1072_v62  ;;  %vm1092_vm7 = vweird.f32 %v4445_v5 }
 0x1dd   : > { %4446 = vrsqrt.f32 %v1073_v6  ;;  %vm1093_vm9 = vmor %vm1091_vm8, %vm1092_vm7  ;;  %vm1101_vm11 = vweird.f32 %v1073_v6 }
 0x1de   : > { %v1087_v10 = vmul.f32 %v4445_v5, %v1086_v8  ;;  %v1084_v16 = vsel %vm5089_vm6, %v4443_v61, %v1080_v7  ;;  %v967_v7 = vld [vmem:[%s6432_s20 + $0x8] sm:$0xff] }
 0x1df   : > { %v1115_v27 = vmul.f32 %v1084_v16, %v5016_v32  ;;  %v971_v8 = vld [vmem:[%s6431_s8 + $0x8] sm:$0xff] }
 0x1e0   : > { %v1088_v17 = vmul.f32 0.5, %v1087_v10  ;;  %v1066_v19 = vpop.xlane.xlu1 %1065 }
 0x1e1   : > { %v1070_v23 = vmul.f32 %v1066_v19, %v5012_v29  ;;  %v1122_v38 = vmul.f32 %v4422_v30, %v1115_v27 }
 0x1e2   : > { %v1089_v24 = vsub.f32 1.5, %v1088_v17 }
 0x1e3   : > { %v4447_v26 = vpop.eup %4446  ;;  %v1074_v28 = vadd.f32 1e-05, %v1070_v23  ;;  %v1129_v45 = vadd.f32 %v4423_v39, %v1122_v38  ;;  %v968_v23 = vld [vmem:[%s6432_s20 + $0x10] sm:$0xff]  ;;  %v5159_v38 = vld [vmem:[%s5113_s30] ss:$0 sm:$0xff] }
 0x1e4   : > { %v1090_v31 = vmul.f32 %v4445_v5, %v1089_v24  ;;  %v1096_v33 = vmul.f32 %v4447_v26, %v1073_v6  ;;  %vm1102_vm10 = vweird.f32 %v4447_v26  ;;  %v966_v6 = vld [vmem:[%s6432_s20] sm:$0xff]  ;;  %v969_v24 = vld [vmem:[%s6432_s20 + $0x18] sm:$0xff] }
 0x1e5   : > { %4448 = vrsqrt.f32 %v1074_v28  ;;  %vm1103_vm12 = vmor %vm1101_vm11, %vm1102_vm10  ;;  %vm1111_vm14 = vweird.f32 %v1074_v28  ;;  %v1133_v11 = vmul.f32 %v1129_v45, %v966_v6 }
 0x1e6   : > { %v1094_v34 = vsel %vm1093_vm9, %v4445_v5, %v1090_v31  ;;  %v1097_v35 = vmul.f32 %v4447_v26, %v1096_v33  ;;  %v970_v5 = vld [vmem:[%s6431_s8] sm:$0xff] }
 0x1e7   : > { %v1116_v36 = vmul.f32 %v1094_v34, %v5023_v37 }
 0x1e8   : > { %v1098_v40 = vmul.f32 0.5, %v1097_v35 }
 0x1e9   : > { %v1123_v41 = vmul.f32 %v4422_v30, %v1116_v36 }
 0x1ea   : > { %v1099_v43 = vsub.f32 1.5, %v1098_v40 }
 0x1eb   : > { %v4449_v44 = vpop.eup %4448  ;;  %v1130_v32 = vadd.f32 %v4423_v39, %v1123_v41 }
 0x1ec   : > { %v1100_v46 = vmul.f32 %v4447_v26, %v1099_v43  ;;  %v1106_v48 = vmul.f32 %v4449_v44, %v1074_v28  ;;  %vm1112_vm13 = vweird.f32 %v4449_v44 }
 0x1ed   : > { %v1137_v49 = vpack.c.bf16 %v1130_v32, %v1129_v45  ;;  %vm1113_vm15 = vmor %vm1111_vm14, %vm1112_vm13  ;;  %v1134_v13 = vmul.f32 %v1130_v32, %v967_v7  ;;  %v4427_v45 = vld [vmem:[%s5120_s4] ss:$0 sm:$0xff] }
 0x1ee   : > { %v1107_v50 = vmul.f32 %v4449_v44, %v1106_v48  ;;  %v1104_v51 = vsel %vm1103_vm12, %v4447_v26, %v1100_v46 }
 0x1ef   : > { %4203 = vmatmul.msk.bf16.vlgmr.msra.gmra.mxu1 %vm1023_vm2, %v1137_v49  ;;  %v1117_v54 = vmul.f32 %v1104_v51, %v5039_v42  ;;  %v1176_v42 = vld [vmem:[%s5126_s27 + $0x10] sm:$0xff] }
 0x1f0   : > { %v1108_v53 = vmul.f32 0.5, %v1107_v50 }
 0x1f1   : > { %v1124_v59 = vmul.f32 %v4422_v30, %v1117_v54 }
 0x1f2   : > { %v1109_v37 = vsub.f32 1.5, %v1108_v53 }
 0x1f3   : > { %v1131_v61 = vadd.f32 %v4423_v39, %v1124_v59 }
 0x1f4   : > { %v1110_v55 = vmul.f32 %v4449_v44, %v1109_v37 }
 0x1f5   : > { %v1135_v28 = vmul.f32 %v1131_v61, %v968_v23 }
 0x1f6   : > { %v1114_v56 = vsel %vm1113_vm15, %v4449_v44, %v1110_v55 }
 0x1f7   : > { %v1118_v58 = vmul.f32 %v1114_v56, %v5052_v47  ;;  %v1177_v47 = vld [vmem:[%s5126_s27 + $0x18] sm:$0xff] }
 0x1f8   : > { %v1181_v0 = vpack.c.bf16 %v1177_v47, %v1176_v42 }
 0x1f9   : > { %v1125_v60 = vmul.f32 %v4422_v30, %v1118_v58 }
 0x1fa   : > { %1198 = vmatpush.bf16.msra.mxu2 %v1181_v0 }
 0x1fb   : > { %v1132_v62 = vadd.f32 %v4423_v39, %v1125_v60 }
 0x1fd   : > { %v1138_v63 = vpack.c.bf16 %v1132_v62, %v1131_v61  ;;  %v1136_v30 = vmul.f32 %v1132_v62, %v969_v24 }
 0x1fe   : > { %1199 = vmatpush.bf16.msra.mxu2 %v1180_v3 }
 0x1ff   : > { %4204 = vmatmul.msk.bf16.vlgmr.msra.gmra.mxu3 %vm1023_vm2, %v1138_v63 }
 0x20f   : > { %4207 = vmatmul.msk.bf16.vlgmr.msrb.gmra.mxu3 %vm1023_vm2, %v1137_v49 }
 0x21f   : > { %4208 = vmatmul.msk.bf16.gmra.mxu3 %vm1023_vm2, %v1138_v63 }
 0x26c   : > { %v1156_v4 = vpop.f32.mrf.mxu1 }
 0x26d   : > { %v1166_v9 = vmul.f32 %v1156_v4, %v970_v5 }
 0x26f   : > { %v1170_v16 = vadd.f32 %v1166_v9, %v1133_v11 }
 0x274   : > { %v1158_v10 = vpop.f32.mrf.mxu1 }
 0x275   : > { %v1167_v14 = vmul.f32 %v1158_v10, %v971_v8 }
 0x277   : > { %v1171_v17 = vadd.f32 %v1167_v14, %v1134_v13 }
 0x279   : > { %v1178_v19 = vpack.c.bf16 %v1171_v17, %v1170_v16 }
 0x27b   : > { %4205 = vmatmul.msk.bf16.vlgmr.msra.gmra.mxu2 %vm1023_vm2, %v1178_v19 }
 0x282   : > { %v1161_v20 = vpop.f32.mrf.mxu3 }
 0x283   : > { %v1168_v26 = vmul.f32 %v1161_v20, %v972_v22 }
 0x285   : > { %v1172_v33 = vadd.f32 %v1168_v26, %v1135_v28 }
 0x28a   : > { %v1163_v27 = vpop.f32.mrf.mxu3 }
 0x28b   : > { %v1169_v31 = vmul.f32 %v1163_v27, %v973_v25 }
 0x28d   : > { %v1173_v34 = vadd.f32 %v1169_v31, %v1136_v30 }
 0x28f   : > { %v1179_v35 = vpack.c.bf16 %v1173_v34, %v1172_v33 }
 0x291   : > { %4206 = vmatmul.msk.bf16.gmra.mxu2 %vm1023_vm2, %v1179_v35 }
 0x292   : > { %v1230_v36 = vpop.f32.mrf.mxu3 }
 0x293   : > { %v1231_v40 = vadd.f32 %v5159_v38, %v1230_v36 }
 0x29a   : > { %v1232_v39 = vpop.f32.mrf.mxu3 }
 0x29b   : > { %v1233_v41 = vadd.f32 %v5159_v38, %v1232_v39 }
 0x29d   : > { %v5163_v43 = vpack.c.bf16 %v1233_v41, %v1231_v40 }
 0x29f   : > { %1328 = vmatpush.bf16.msrb.mxu1 %v5163_v43 }
 0x2fe   : > { %v1201_v44 = vpop.f32.mrf.mxu2 }
 0x2ff   : > { %v1202_v46 = vadd.f32 %v4427_v45, %v1201_v44 }
 0x306   : > { %v1203_v32 = vpop.f32.mrf.mxu2 }
 0x307   : > { %v1204_v48 = vadd.f32 %v4427_v45, %v1203_v32 }
 0x309   : > { %v1240_v49 = vpack.c.bf16 %v1204_v48, %v1202_v46 }
 0x30b   : > { %1242 = vrot.lane.b32.xlu1 %v1240_v49, %s6388_s17  ;;  %1335 = vrot.lane.b32.xlu0 %v1240_v49, %s6392_s29 }
 0x30c   : > { %1337 = vrot.lane.b32.xlu2 %v1240_v49, %s6390_s23 }
 0x313   : > { %1431 = vrot.lane.b32.xlu1 %v1240_v49, %s6382_s1  ;;  %1526 = vrot.lane.b32.xlu0 %v1240_v49, %s6386_s18 }
 0x314   : > { %1528 = vrot.lane.b32.xlu2 %v1240_v49, %s6384_s0  ;;  %v1206_v50 = vpop.f32.mrf.mxu2 }
 0x315   : > { %v1207_v53 = vadd.f32 %v4427_v45, %v1206_v50 }
 0x31c   : > { %1433 = vrot.lane.b32.xlu2 %v1240_v49, %s6380_s24  ;;  %v1208_v51 = vpop.f32.mrf.mxu2 }
 0x31d   : > { %v1209_v37 = vadd.f32 %v4427_v45, %v1208_v51 }
 0x31f   : > { %v1652_v54 = vpack.c.bf16 %v1209_v37, %v1207_v53 }
 0x321   : > { %1654 = vrot.lane.b32.xlu1 %v1652_v54, %s6388_s17  ;;  %1747 = vrot.lane.b32.xlu0 %v1652_v54, %s6390_s23  ;;  %s5639_s17 = scalar_lea.vmem %s6364_s15, %s5029_s28  ;;  %s6464_s23 = sld [smem:[#allocation18_spill]] }
 0x324   : > { %1745 = vrot.lane.b32.xlu2 %v1652_v54, %s6392_s29 }
 0x329   : > { %1843 = vrot.lane.b32.xlu1 %v1652_v54, %s6380_s24  ;;  %1938 = vrot.lane.b32.xlu0 %v1652_v54, %s6384_s0  ;;  %s6396_s24 = smov 16   ;;  %s6467_s0 = sld [smem:[#allocation23_spill]] }
 0x32c   : > { %1936 = vrot.lane.b32.xlu2 %v1652_v54, %s6386_s18 }
 0x331   : > { %1841 = vrot.lane.b32.xlu0 %v1652_v54, %s6382_s1 }
 0x366   : > { %v1338_v55 = vpop.permute.xlu2 %1337 }
 0x367   : > { %v1343_v56 = vsel %vm1244_vm0, %v1338_v55, 0 }
 0x368   : > { %1352 = vmatpush.bf16.xpose.msrb.mxu2 %v1343_v56 }
 0x36e   : > { %v1529_v58 = vpop.permute.xlu2 %1528 }
 0x36f   : > { %v1534_v59 = vsel %vm1244_vm0, %v1529_v58, 0 }
 0x370   : > { %1543 = vmatpush.bf16.xpose.msra.mxu2 %v1534_v59 }
 0x376   : > { %v1434_v60 = vpop.permute.xlu2 %1433 }
 0x377   : > { %v1439_v42 = vsel %vm1244_vm0, %v1434_v60, 0 }
 0x37d   : > { %v1243_v61 = vpop.permute.xlu1 %1242  ;;  %v1336_v62 = vpop.permute.xlu0 %1335 }
 0x37e   : > { %4211 = vmatmul.msk.bf16.vlgmr.msrb.gmra.mxu2 %vm1244_vm0, %v1336_v62  ;;  %v1249_v63 = vsel %vm1244_vm0, %v1243_v61, 0  ;;  %v1746_v9 = vpop.permute.xlu2 %1745 }
 0x37f   : > { %1258 = vmatpush.bf16.xpose.msrb.mxu0 %v1249_v63 }
 0x385   : > { %v1432_v47 = vpop.permute.xlu1 %1431  ;;  %v1527_v0 = vpop.permute.xlu0 %1526 }
 0x386   : > { %4209 = vmatmul.msk.bf16.vlgmr.msrb.gmra.mxu0 %vm1244_vm0, %v1240_v49  ;;  %v1937_v10 = vpop.permute.xlu2 %1936 }
 0x387   : > { %1448 = vmatpush.bf16.xpose.msra.mxu0 %v1439_v42 }
 0x38e   : > { %4215 = vmatmul.msk.bf16.vlgmr.msra.gmra.mxu2 %vm1244_vm0, %v1527_v0 }
 0x393   : > { %v1655_v1 = vpop.permute.xlu1 %1654  ;;  %v1748_v2 = vpop.permute.xlu0 %1747 }
 0x394   : > { %v1660_v3 = vsel %vm1244_vm0, %v1655_v1, 0  ;;  %v1753_v4 = vsel %vm1244_vm0, %v1748_v2, 0 }
 0x395   : > { %1669 = vmatpush.bf16.xpose.msrb.mxu0 %v1660_v3  ;;  %1762 = vmatpush.bf16.xpose.msrb.mxu2 %v1753_v4 }
 0x396   : > { %4213 = vmatmul.msk.bf16.vlgmr.msra.gmra.mxu0 %vm1244_vm0, %v1432_v47 }
 0x39b   : > { %v1844_v5 = vpop.permute.xlu1 %1843  ;;  %v1939_v6 = vpop.permute.xlu0 %1938 }
 0x39c   : > { %v1849_v7 = vsel %vm1244_vm0, %v1844_v5, 0  ;;  %v1944_v8 = vsel %vm1244_vm0, %v1939_v6, 0 }
 0x39d   : > { %1858 = vmatpush.bf16.xpose.msra.mxu0 %v1849_v7  ;;  %1953 = vmatpush.bf16.xpose.msra.mxu2 %v1944_v8 }
 0x39e   : > { %4219 = vmatmul.msk.bf16.vlgmr.msrb.gmra.mxu2 %vm1244_vm0, %v1746_v9 }
 0x3a3   : > { %v1842_v11 = vpop.permute.xlu0 %1841 }
 0x3a6   : > { %4217 = vmatmul.msk.bf16.vlgmr.msrb.gmra.mxu0 %vm1244_vm0, %v1652_v54 }
 0x3ae   : > { %4223 = vmatmul.msk.bf16.vlgmr.msra.gmra.mxu2 %vm1244_vm0, %v1937_v10 }
 0x3b6   : > { %4221 = vmatmul.msk.bf16.vlgmr.msra.gmra.mxu0 %vm1244_vm0, %v1842_v11 }
 0x401   : > { %v1354_v13 = vpop.f32.mrf.mxu2 }
 0x402   : > { %v5197_v14 = vmul.f32 0.35355338, %v1354_v13 }
 0x403   : > { %v1260_v16 = vpop.f32.mrf.mxu0 }
 0x404   : > { %v5199_v17 = vmul.f32 0.35355338, %v1260_v16  ;;  %v1361_v19 = vsel %vm1267_vm1, %v5197_v14, -inf }
 0x405   : > { %1362 = vmax.xlane.f32.xlu2 %v1361_v19 }
 0x406   : > { %v1268_v20 = vsel %vm1267_vm1, %v5199_v17, -inf }
 0x407   : > { %1269 = vmax.xlane.f32.xlu0 %v1268_v20 }
 0x409   : > { %v1356_v22 = vpop.f32.mrf.mxu2 }
 0x40a   : > { %v5205_v23 = vmul.f32 0.35355338, %v1356_v22 }
 0x40b   : > { %v1262_v24 = vpop.f32.mrf.mxu0 }
 0x40c   : > { %v5207_v25 = vmul.f32 0.35355338, %v1262_v24  ;;  %v1364_v26 = vsel %vm1267_vm1, %v5205_v23, -inf }
 0x40d   : > { %1365 = vmax.xlane.f32.xlu1 %v1364_v26 }
 0x40e   : > { %v1271_v27 = vsel %vm1267_vm1, %v5207_v25, -inf }
 0x40f   : > { %1272 = vmax.xlane.f32.xlu2 %v1271_v27 }
 0x411   : > { %v1545_v28 = vpop.f32.mrf.mxu2 }
 0x412   : > { %v5213_v30 = vmul.f32 0.35355338, %v1545_v28 }
 0x413   : > { %v1450_v31 = vpop.f32.mrf.mxu0 }
 0x414   : > { %v5215_v33 = vmul.f32 0.35355338, %v1450_v31  ;;  %v1552_v34 = vsel %vm1267_vm1, %v5213_v30, -inf }
 0x415   : > { %1553 = vmax.xlane.f32.xlu1 %v1552_v34 }
 0x416   : > { %v1457_v35 = vsel %vm1267_vm1, %v5215_v33, -inf }
 0x417   : > { %1458 = vmax.xlane.f32.xlu2 %v1457_v35 }
 0x419   : > { %v1547_v36 = vpop.f32.mrf.mxu2 }
 0x41a   : > { %v5221_v39 = vmul.f32 0.35355338, %v1547_v36 }
 0x41b   : > { %v1452_v40 = vpop.f32.mrf.mxu0 }
 0x41c   : > { %v5223_v41 = vmul.f32 0.35355338, %v1452_v40  ;;  %v1555_v44 = vsel %vm1267_vm1, %v5221_v39, -inf }
 0x41d   : > { %1556 = vmax.xlane.f32.xlu0 %v1555_v44 }
 0x41e   : > { %v1460_v45 = vsel %vm1267_vm1, %v5223_v41, -inf }
 0x41f   : > { %1461 = vmax.xlane.f32.xlu1 %v1460_v45 }
 0x421   : > { %v1764_v32 = vpop.f32.mrf.mxu2 }
 0x422   : > { %v5229_v46 = vmul.f32 0.35355338, %v1764_v32 }
 0x423   : > { %v1671_v48 = vpop.f32.mrf.mxu0 }
 0x424   : > { %v5231_v49 = vmul.f32 0.35355338, %v1671_v48  ;;  %v1771_v50 = vsel %vm1267_vm1, %v5229_v46, -inf }
 0x425   : > { %1772 = vmax.xlane.f32.xlu0 %v1771_v50 }
 0x426   : > { %v1678_v51 = vsel %vm1267_vm1, %v5231_v49, -inf }
 0x427   : > { %1679 = vmax.xlane.f32.xlu2 %v1678_v51 }
 0x429   : > { %v1766_v53 = vpop.f32.mrf.mxu2 }
 0x42a   : > { %v5237_v37 = vmul.f32 0.35355338, %v1766_v53 }
 0x42b   : > { %v1673_v54 = vpop.f32.mrf.mxu0 }
 0x42c   : > { %v5239_v55 = vmul.f32 0.35355338, %v1673_v54  ;;  %v1774_v58 = vsel %vm1267_vm1, %v5237_v37, -inf }
 0x42e   : > { %v1681_v56 = vsel %vm1267_vm1, %v5239_v55, -inf }
 0x42f   : > { %1682 = vmax.xlane.f32.xlu1 %v1681_v56  ;;  %1775 = vmax.xlane.f32.xlu2 %v1774_v58 }
 0x431   : > { %v1955_v59 = vpop.f32.mrf.mxu2 }
 0x432   : > { %v5245_v60 = vmul.f32 0.35355338, %v1955_v59 }
 0x433   : > { %v1860_v61 = vpop.f32.mrf.mxu0 }
 0x434   : > { %v5247_v62 = vmul.f32 0.35355338, %v1860_v61  ;;  %v1962_v42 = vsel %vm1267_vm1, %v5245_v60, -inf }
 0x436   : > { %v1867_v63 = vsel %vm1267_vm1, %v5247_v62, -inf }
 0x437   : > { %1868 = vmax.xlane.f32.xlu0 %v1867_v63  ;;  %1963 = vmax.xlane.f32.xlu1 %v1962_v42 }
 0x439   : > { %v1957_v47 = vpop.f32.mrf.mxu2 }
 0x43a   : > { %v5253_v0 = vmul.f32 0.35355338, %v1957_v47 }
 0x43b   : > { %v1862_v1 = vpop.f32.mrf.mxu0 }
 0x43c   : > { %v5255_v2 = vmul.f32 0.35355338, %v1862_v1  ;;  %v1965_v4 = vsel %vm1267_vm1, %v5253_v0, -inf }
 0x43e   : > { %v1870_v3 = vsel %vm1267_vm1, %v5255_v2, -inf }
 0x43f   : > { %1871 = vmax.xlane.f32.xlu2 %v1870_v3  ;;  %1966 = vmax.xlane.f32.xlu0 %v1965_v4 }
 0x478   : > { %v1363_v5 = vpop.xlane.xlu2 %1362 }
 0x479   : > { %v1367_v6 = vsub.f32 %v5197_v14, %v1363_v5 }
 0x47a   : > { %v1270_v7 = vpop.xlane.xlu0 %1269 }
 0x47b   : > { %v1369_v8 = vmul.f32 1.442695, %v1367_v6  ;;  %v1274_v9 = vsub.f32 %v5199_v17, %v1270_v7 }
 0x47d   : > { %4450 = vpow2.f32 %v1369_v8  ;;  %v1276_v10 = vmul.f32 1.442695, %v1274_v9 }
 0x47f   : > { %4452 = vpow2.f32 %v1276_v10 }
 0x480   : > { %v1366_v11 = vpop.xlane.xlu1 %1365 }
 0x481   : > { %v1368_v13 = vsub.f32 %v5205_v23, %v1366_v11 }
 0x482   : > { %v1273_v16 = vpop.xlane.xlu2 %1272 }
 0x483   : > { %v5264_v19 = vpop.eup %4450  ;;  %v1371_v20 = vmul.f32 1.442695, %v1368_v13  ;;  %v1275_v22 = vsub.f32 %v5207_v25, %v1273_v16 }
 0x484   : > { %v1373_v24 = vsel %vm1267_vm1, %v5264_v19, 0.0 }
 0x485   : > { %v5269_v14 = vpop.eup %4452  ;;  %4454 = vpow2.f32 %v1371_v20  ;;  %v1278_v26 = vmul.f32 1.442695, %v1275_v22  ;;  %1374 = vadd.xlane.f32.xlu1 %v1373_v24 }
 0x486   : > { %v1280_v17 = vsel %vm1267_vm1, %v5269_v14, 0.0 }
 0x487   : > { %4456 = vpow2.f32 %v1278_v26  ;;  %1281 = vadd.xlane.f32.xlu0 %v1280_v17 }
 0x488   : > { %v1554_v35 = vpop.xlane.xlu1 %1553 }
 0x489   : > { %v1558_v50 = vsub.f32 %v5213_v30, %v1554_v35 }
 0x48a   : > { %v1459_v31 = vpop.xlane.xlu2 %1458 }
 0x48b   : > { %v5273_v23 = vpop.eup %4454  ;;  %v1463_v45 = vsub.f32 %v5215_v33, %v1459_v31  ;;  %v1560_v56 = vmul.f32 1.442695, %v1558_v50 }
 0x48c   : > { %v1376_v25 = vsel %vm1267_vm1, %v5273_v23, 0.0 }
 0x48d   : > { %v5275_v27 = vpop.eup %4456  ;;  %v1465_v53 = vmul.f32 1.442695, %v1463_v45 }
 0x48e   : > { %v1283_v28 = vsel %vm1267_vm1, %v5275_v27, 0.0 }
 0x48f   : > { %1377 = vadd.xlane.f32.xlu0 %v1376_v25  ;;  %1284 = vadd.xlane.f32.xlu2 %v1283_v28 }
 0x490   : > { %v1557_v34 = vpop.xlane.xlu0 %1556 }
 0x491   : > { %v1559_v36 = vsub.f32 %v5221_v39, %v1557_v34 }
 0x492   : > { %v1462_v32 = vpop.xlane.xlu1 %1461 }
 0x493   : > { %v1562_v44 = vmul.f32 1.442695, %v1559_v36  ;;  %v1464_v33 = vsub.f32 %v5223_v41, %v1462_v32  ;;  %v1235_v32 = vpop.f32.mrf.mxu3 }
 0x495   : > { %4458 = vpow2.f32 %v1562_v44  ;;  %v1467_v47 = vmul.f32 1.442695, %v1464_v33 }
 0x496   : > { %4460 = vpow2.f32 %v1465_v53  ;;  %v1236_v53 = vadd.f32 %v5159_v38, %v1235_v32 }
 0x497   : > { %4462 = vpow2.f32 %v1560_v56 }
 0x498   : > { %v1773_v48 = vpop.xlane.xlu0 %1772 }
 0x499   : > { %v1777_v51 = vsub.f32 %v5229_v46, %v1773_v48 }
 0x49a   : > { %v1680_v40 = vpop.xlane.xlu2 %1679 }
 0x49b   : > { %v5292_v39 = vpop.eup %4458  ;;  %v1684_v5 = vsub.f32 %v5231_v49, %v1680_v40  ;;  %v1237_v50 = vpop.f32.mrf.mxu3 }
 0x49c   : > { %v1567_v46 = vsel %vm1267_vm1, %v5292_v39, 0.0  ;;  %v5298_v42 = vpop.eup %4460 }
 0x49d   : > { %v5300_v3 = vpop.eup %4462  ;;  %v1686_v11 = vmul.f32 1.442695, %v1684_v5 }
 0x49e   : > { %1411 = vrot.lane.b32.xlu1 %v5163_v43, %s6392_s29 }
 0x4a2   : > { %v1776_v54 = vpop.xlane.xlu2 %1775  ;;  %v1683_v58 = vpop.xlane.xlu1 %1682 }
 0x4a3   : > { %1601 = vrot.lane.b32.xlu0 %v5163_v43, %s6386_s18  ;;  %v1778_v59 = vsub.f32 %v5237_v37, %v1776_v54  ;;  %v1685_v61 = vsub.f32 %v5239_v55, %v1683_v58  ;;  %v1469_v55 = vsel %vm1267_vm1, %v5298_v42, 0.0 }
 0x4a5   : > { %v1781_v30 = vmul.f32 1.442695, %v1778_v59  ;;  %v1688_v1 = vmul.f32 1.442695, %v1685_v61 }
 0x4a7   : > { %1506 = vrot.lane.b32.xlu2 %v5163_v43, %s6382_s1  ;;  %v1779_v43 = vmul.f32 1.442695, %v1777_v51  ;;  %v1238_v51 = vadd.f32 %v5159_v38, %v1237_v50 }
 0x4a9   : > { %4464 = vpow2.f32 %v1779_v43  ;;  %v5349_v54 = vpack.c.bf16 %v1238_v51, %v1236_v53 }
 0x4aa   : > { %v1869_v63 = vpop.xlane.xlu0 %1868  ;;  %4466 = vpow2.f32 %v1781_v30  ;;  %v1964_v9 = vpop.xlane.xlu1 %1963 }
 0x4ab   : > { %v1873_v37 = vsub.f32 %v5247_v62, %v1869_v63  ;;  %4468 = vpow2.f32 %v1467_v47  ;;  %v1564_v62 = vsel %vm1267_vm1, %v5300_v3, 0.0  ;;  %v1968_v49 = vsub.f32 %v5245_v60, %v1964_v9 }
 0x4ac   : > { %4470 = vpow2.f32 %v1688_v1 }
 0x4ad   : > { %v1875_v7 = vmul.f32 1.442695, %v1873_v37  ;;  %v1970_v26 = vmul.f32 1.442695, %v1968_v49 }
 0x4af   : > { %v5303_v41 = vpop.eup %4464  ;;  %4472 = vpow2.f32 %v1875_v7 }
 0x4b0   : > { %v1783_v8 = vsel %vm1267_vm1, %v5303_v41, 0.0  ;;  %v5313_v10 = vpop.eup %4466  ;;  %4474 = vpow2.f32 %v1686_v11 }
 0x4b1   : > { %v5315_v16 = vpop.eup %4468  ;;  %v1786_v22 = vsel %vm1267_vm1, %v5313_v10, 0.0 }
 0x4b2   : > { %v1872_v4 = vpop.xlane.xlu2 %1871  ;;  %v5318_v20 = vpop.eup %4470  ;;  %v1472_v25 = vsel %vm1267_vm1, %v5315_v16, 0.0 }
 0x4b3   : > { %v1874_v6 = vsub.f32 %v5255_v2, %v1872_v4  ;;  %v1967_v2 = vpop.xlane.xlu0 %1966  ;;  %v1693_v17 = vsel %vm1267_vm1, %v5318_v20, 0.0 }
 0x4b4   : > { %v1969_v24 = vsub.f32 %v5253_v0, %v1967_v2 }
 0x4b5   : > { %v1877_v13 = vmul.f32 1.442695, %v1874_v6  ;;  %v5327_v60 = vpop.eup %4472 }
 0x4b6   : > { %v1972_v28 = vmul.f32 1.442695, %v1969_v24  ;;  %v5329_v31 = vpop.eup %4474  ;;  %v1879_v0 = vsel %vm1267_vm1, %v5327_v60, 0.0 }
 0x4b7   : > { %4476 = vpow2.f32 %v1877_v13  ;;  %v1690_v35 = vsel %vm1267_vm1, %v5329_v31, 0.0 }
 0x4b8   : > { %4478 = vpow2.f32 %v1970_v26 }
 0x4b9   : > { %4480 = vpow2.f32 %v1972_v28 }
 0x4bd   : > { %v5331_v34 = vpop.eup %4476 }
 0x4be   : > { %v1882_v36 = vsel %vm1267_vm1, %v5331_v34, 0.0  ;;  %v5339_v40 = vpop.eup %4478 }
 0x4bf   : > { %v5341_v44 = vpop.eup %4480  ;;  %v1974_v45 = vsel %vm1267_vm1, %v5339_v40, 0.0 }
 0x4c0   : > { %v1977_v48 = vsel %vm1267_vm1, %v5341_v44, 0.0 }
 0x4c8   : > { %1568 = vadd.xlane.f32.xlu1 %v1567_v46 }
 0x4cd   : > { %1470 = vadd.xlane.f32.xlu0 %v1469_v55 }
 0x4d0   : > { %1784 = vadd.xlane.f32.xlu1 %v1783_v8  ;;  %1565 = vadd.xlane.f32.xlu2 %v1564_v62 }
 0x4d5   : > { %1787 = vadd.xlane.f32.xlu0 %v1786_v22 }
 0x4d8   : > { %1694 = vadd.xlane.f32.xlu1 %v1693_v17  ;;  %1473 = vadd.xlane.f32.xlu2 %v1472_v25 }
 0x4dd   : > { %1880 = vadd.xlane.f32.xlu0 %v1879_v0 }
 0x4e0   : > { %1691 = vadd.xlane.f32.xlu2 %v1690_v35  ;;  %1883 = vadd.xlane.f32.xlu1 %v1882_v36 }
 0x4e5   : > { %1975 = vadd.xlane.f32.xlu0 %v1974_v45 }
 0x4e8   : > { %1978 = vadd.xlane.f32.xlu1 %v1977_v48 }
 0x4f8   : > { %v1375_v56 = vpop.xlane.xlu1 %1374  ;;  %1821 = vrot.lane.b32.xlu2 %v5349_v54, %s6392_s29  ;;  %s6471_s29 = smov 104  }
 0x4f9   : > { %4482 = vrcp.f32 %v1375_v56  ;;  %2011 = vrot.lane.b32.xlu0 %v5349_v54, %s6386_s18  ;;  %v1388_v1 = vand.u32 2147483647, %v1375_v56  ;;  %v1390_v4 = vand.u32 2147483648, %v1375_v56  ;;  %vm1384_vm3 = vweird.f32 %v1375_v56  ;;  %s5683_s18 = scalar_lea.vmem %s6464_s23, %s5029_s28  ;;  %s6472_s23 = smov 72  }
 0x4fa   : > { %v1282_v43 = vpop.xlane.xlu0 %1281 }
 0x4fb   : > { %4484 = vrcp.f32 %v1282_v43  ;;  %vm5357_vm5 = vcmp.eq.f32.partialorder %v1388_v1, 8.507059e+37  ;;  %v1391_v13 = vor.u32 1.1754944e-38, %v1390_v4  ;;  %v1295_v49 = vand.u32 2147483647, %v1282_v43 }
 0x4fc   : > { %v1297_v2 = vand.u32 2147483648, %v1282_v43  ;;  %vm1291_vm8 = vweird.f32 %v1282_v43 }
 0x4fd   : > { %vm1296_vm12 = vcmp.eq.f32.partialorder %v1295_v49, 8.507059e+37 }
 0x4fe   : > { %v1298_v50 = vor.u32 1.1754944e-38, %v1297_v2 }
 0x4ff   : > { %v4483_v58 = vpop.eup %4482 }
 0x500   : > { %v1380_v59 = vmul.f32 %v4483_v58, %v1375_v56  ;;  %vm1385_vm4 = vweird.f32 %v4483_v58 }
 0x501   : > { %v4485_v33 = vpop.eup %4484  ;;  %1916 = vrot.lane.b32.xlu1 %v5349_v54, %s6382_s1  ;;  %vm5361_vm7 = vmor %vm1384_vm3, %vm1385_vm4  ;;  %s6394_s1 = smov 24  }
 0x502   : > { %v1381_v61 = vsub.f32 1.0, %v1380_v59  ;;  %v1287_v38 = vmul.f32 %v4485_v33, %v1282_v43  ;;  %v1378_v30 = vpop.xlane.xlu0 %1377  ;;  %v1285_v46 = vpop.xlane.xlu2 %1284  ;;  %vm1292_vm6 = vweird.f32 %v4485_v33 }
 0x503   : > { %4486 = vrcp.f32 %v1378_v30  ;;  %v1403_v26 = vand.u32 2147483647, %v1378_v30  ;;  %v1405_v17 = vand.u32 2147483648, %v1378_v30  ;;  %vm5367_vm9 = vmor %vm1291_vm8, %vm1292_vm6  ;;  %v1312_v36 = vand.u32 2147483648, %v1285_v46 }
 0x504   : > { %v1288_v63 = vsub.f32 1.0, %v1287_v38  ;;  %4488 = vrcp.f32 %v1285_v46  ;;  %v1382_v47 = vmul.f32 %v4483_v58, %v1381_v61  ;;  %v1310_v48 = vand.u32 2147483647, %v1285_v46 }
 0x505   : > { %vm1399_vm13 = vweird.f32 %v1378_v30  ;;  %v1406_v43 = vor.u32 1.1754944e-38, %v1405_v17  ;;  %vm1306_vm15 = vweird.f32 %v1285_v46  ;;  %vm1404_vm3 = vcmp.eq.f32.partialorder %v1403_v26, 8.507059e+37 }
 0x506   : > { %v1289_v37 = vmul.f32 %v4485_v33, %v1288_v63  ;;  %v1383_v6 = vadd.f32 %v4483_v58, %v1382_v47  ;;  %vm1311_vm6 = vcmp.eq.f32.partialorder %v1310_v48, 8.507059e+37 }
 0x508   : > { %v1290_v9 = vadd.f32 %v4485_v33, %v1289_v37  ;;  %v1387_v28 = vsel %vm5361_vm7, %v4483_v58, %v1383_v6 }
 0x509   : > { %v4487_v55 = vpop.eup %4486  ;;  %v1392_v56 = vsel %vm5357_vm5, %v1391_v13, %v1387_v28 }
 0x50a   : > { %v4489_v5 = vpop.eup %4488  ;;  %v1395_v7 = vmul.f32 %v4487_v55, %v1378_v30  ;;  %v1507_v8 = vpop.permute.xlu2 %1506  ;;  %vm1400_vm10 = vweird.f32 %v4487_v55  ;;  %v1294_v45 = vsel %vm5367_vm9, %v4485_v33, %v1290_v9  ;;  %v1313_v33 = vor.u32 1.1754944e-38, %v1312_v36 }
 0x50b   : > { %v1302_v11 = vmul.f32 %v4489_v5, %v1285_v46  ;;  %1519 = vmatpush.bf16.msra.mxu1 %v1507_v8  ;;  %vm1307_vm11 = vweird.f32 %v4489_v5  ;;  %vm1401_vm14 = vmor %vm1399_vm13, %vm1400_vm10  ;;  %v1299_v61 = vsel %vm1296_vm12, %v1298_v50, %v1294_v45  ;;  %v1393_v30 = vmul.f32 %v5264_v19, %v1392_v56 }
 0x50c   : > { %v1396_v22 = vsub.f32 1.0, %v1395_v7  ;;  %vm1308_vm4 = vmor %vm1306_vm15, %vm1307_vm11  ;;  %v1300_v4 = vmul.f32 %v5269_v14, %v1299_v61 }
 0x50d   : > { %v1303_v25 = vsub.f32 1.0, %v1302_v11 }
 0x50e   : > { %v1397_v35 = vmul.f32 %v4487_v55, %v1396_v22 }
 0x50f   : > { %v1304_v32 = vmul.f32 %v4489_v5, %v1303_v25 }
 0x510   : > { %v1398_v51 = vadd.f32 %v4487_v55, %v1397_v35  ;;  %v1412_v53 = vpop.permute.xlu1 %1411 }
 0x511   : > { %v1305_v58 = vadd.f32 %v4489_v5, %v1304_v32  ;;  %1424 = vmatpush.bf16.msra.mxu3 %v1412_v53 }
 0x512   : > { %v1402_v59 = vsel %vm1401_vm14, %v4487_v55, %v1398_v51 }
 0x513   : > { %v1407_v38 = vsel %vm1404_vm3, %v1406_v43, %v1402_v59  ;;  %v1309_v63 = vsel %vm1308_vm4, %v4489_v5, %v1305_v58 }
 0x514   : > { %v1408_v47 = vmul.f32 %v5273_v23, %v1407_v38  ;;  %v1314_v1 = vsel %vm1311_vm6, %v1313_v33, %v1309_v63 }
 0x515   : > { %v1602_v37 = vpop.permute.xlu0 %1601  ;;  %v1315_v46 = vmul.f32 %v5275_v27, %v1314_v1 }
 0x516   : > { %1614 = vmatpush.bf16.msrb.mxu3 %v1602_v37  ;;  %v1409_v55 = vpack.c.bf16 %v1408_v47, %v1393_v30 }
 0x517   : > { %v1316_v6 = vpack.c.bf16 %v1315_v46, %v1300_v4 }
 0x518   : > { %4212 = vmatmul.msk.bf16.vlgmr.msra.gmra.mxu3 %vm1267_vm1, %v1409_v55 }
 0x519   : > { %4210 = vmatmul.msk.bf16.vlgmr.msrb.gmra.mxu1 %vm1267_vm1, %v1316_v6 }
 0x51a   : > { %1738 = vmatpush.bf16.msrb.mxu1 %v5349_v54 }
 0x53b   : > { %v1569_v5 = vpop.xlane.xlu1 %1568 }
 0x53c   : > { %4490 = vrcp.f32 %v1569_v5  ;;  %v1594_v28 = vand.u32 2147483647, %v1569_v5  ;;  %v1596_v0 = vand.u32 2147483648, %v1569_v5  ;;  %vm1590_vm7 = vweird.f32 %v1569_v5 }
 0x53e   : > { %vm5418_vm10 = vcmp.eq.f32.partialorder %v1594_v28, 8.507059e+37  ;;  %v1597_v59 = vor.u32 1.1754944e-38, %v1596_v0 }
 0x540   : > { %v5383_v7 = vpop.xlane.xlu0 %1470 }
 0x541   : > { %4492 = vrcp.f32 %v5383_v7  ;;  %v1486_v33 = vand.u32 2147483648, %v5383_v7  ;;  %vm1480_vm3 = vweird.f32 %v5383_v7 }
 0x542   : > { %v5388_v14 = vpop.eup %4490 }
 0x543   : > { %v5385_v19 = vpop.xlane.xlu1 %1784  ;;  %v1566_v23 = vpop.xlane.xlu2 %1565  ;;  %v1586_v8 = vmul.f32 %v5388_v14, %v1569_v5  ;;  %vm1591_vm8 = vweird.f32 %v5388_v14 }
 0x544   : > { %4494 = vrcp.f32 %v1566_v23  ;;  %v1579_v35 = vand.u32 2147483647, %v1566_v23  ;;  %v1581_v53 = vand.u32 2147483648, %v1566_v23  ;;  %vm1575_vm9 = vweird.f32 %v1566_v23  ;;  %vm5440_vm13 = vmor %vm1590_vm7, %vm1591_vm8 }
 0x545   : > { %4496 = vrcp.f32 %v5385_v19  ;;  %v1587_v2 = vsub.f32 1.0, %v1586_v8 }
 0x546   : > { %vm5427_vm12 = vcmp.eq.f32.partialorder %v1579_v35, 8.507059e+37  ;;  %v1582_v55 = vor.u32 1.1754944e-38, %v1581_v53  ;;  %v1487_v35 = vor.u32 1.1754944e-38, %v1486_v33  ;;  %v1798_v53 = vand.u32 2147483647, %v5385_v19 }
 0x547   : > { %v5390_v27 = vpop.eup %4492  ;;  %v1588_v17 = vmul.f32 %v5388_v14, %v1587_v2 }
 0x548   : > { %v5393_v62 = vpop.xlane.xlu0 %1787  ;;  %v1476_v13 = vmul.f32 %v5390_v27, %v5383_v7  ;;  %vm1481_vm14 = vweird.f32 %v5390_v27 }
 0x549   : > { %4498 = vrcp.f32 %v5393_v62  ;;  %v1589_v56 = vadd.f32 %v5388_v14, %v1588_v17  ;;  %vm5458_vm4 = vmor %vm1480_vm3, %vm1481_vm14  ;;  %vm1809_vm14 = vweird.f32 %v5393_v62 }
 0x54a   : > { %v4495_v9 = vpop.eup %4494  ;;  %v1477_v26 = vsub.f32 1.0, %v1476_v13 }
 0x54b   : > { %v5395_v54 = vpop.xlane.xlu2 %1473  ;;  %v1571_v11 = vmul.f32 %v4495_v9, %v1566_v23  ;;  %v5400_v49 = vpop.xlane.xlu1 %1694  ;;  %vm1576_vm5 = vweird.f32 %v4495_v9  ;;  %v1593_v8 = vsel %vm5440_vm13, %v5388_v14, %v1589_v56  ;;  %v1800_v56 = vand.u32 2147483648, %v5385_v19 }
 0x54c   : > { %4500 = vrcp.f32 %v5395_v54  ;;  %v5405_v25 = vpop.eup %4496  ;;  %v1478_v51 = vmul.f32 %v5390_v27, %v1477_v26  ;;  %vm5423_vm11 = vmor %vm1575_vm9, %vm1576_vm5  ;;  %v1501_v6 = vand.u32 2147483648, %v5395_v54  ;;  %v1499_v5 = vand.u32 2147483647, %v5395_v54 }
 0x54d   : > { %v1572_v22 = vsub.f32 1.0, %v1571_v11  ;;  %4502 = vrcp.f32 %v5400_v49  ;;  %v1790_v30 = vmul.f32 %v5405_v25, %v5385_v19  ;;  %v1484_v11 = vand.u32 2147483647, %v5383_v7 }
 0x54e   : > { %v1479_v46 = vadd.f32 %v5390_v27, %v1478_v51  ;;  %vm1495_vm6 = vweird.f32 %v5395_v54  ;;  %v1598_v17 = vsel %vm5418_vm10, %v1597_v59, %v1593_v8  ;;  %v1502_v0 = vor.u32 1.1754944e-38, %v1501_v6 }
 0x54f   : > { %v1573_v24 = vmul.f32 %v4495_v9, %v1572_v22  ;;  %v5409_v45 = vpop.eup %4498  ;;  %vm1500_vm7 = vcmp.eq.f32.partialorder %v1499_v5, 8.507059e+37  ;;  %vm1485_vm8 = vcmp.eq.f32.partialorder %v1484_v11, 8.507059e+37  ;;  %vm1795_vm9 = vweird.f32 %v5405_v25 }
 0x550   : > { %v5412_v48 = vpop.xlane.xlu0 %1880  ;;  %v1805_v1 = vmul.f32 %v5409_v45, %v5393_v62  ;;  %v1483_v7 = vsel %vm5458_vm4, %v5390_v27, %v1479_v46  ;;  %v1599_v27 = vmul.f32 %v5292_v39, %v1598_v17  ;;  %vm1810_vm10 = vweird.f32 %v5409_v45 }
 0x551   : > { %v1574_v32 = vadd.f32 %v4495_v9, %v1573_v24  ;;  %v1791_v24 = vsub.f32 1.0, %v1790_v30  ;;  %v1488_v58 = vsel %vm1485_vm8, %v1487_v35, %v1483_v7  ;;  %vm5504_vm13 = vcmp.eq.f32.partialorder %v1798_v53, 8.507059e+37 }
 0x552   : > { %v4501_v50 = vpop.eup %4500  ;;  %v1806_v14 = vsub.f32 1.0, %v1805_v1  ;;  %v1801_v11 = vor.u32 1.1754944e-38, %v1800_v56 }
 0x553   : > { %v5407_v36 = vpop.xlane.xlu2 %1691  ;;  %v1491_v43 = vmul.f32 %v4501_v50, %v5395_v54  ;;  %v5431_v63 = vpop.xlane.xlu1 %1883  ;;  %v1578_v47 = vsel %vm5423_vm11, %v4495_v9, %v1574_v32  ;;  %vm1496_vm15 = vweird.f32 %v4501_v50  ;;  %v1792_v59 = vmul.f32 %v5405_v25, %v1791_v24 }
 0x554   : > { %v5447_v23 = vpop.eup %4502  ;;  %v1583_v13 = vsel %vm5427_vm12, %v1582_v55, %v1578_v47  ;;  %4504 = vrcp.f32 %v5407_v36  ;;  %vm1497_vm5 = vmor %vm1495_vm6, %vm1496_vm15  ;;  %v1807_v61 = vmul.f32 %v5409_v45, %v1806_v14  ;;  %v1815_v47 = vand.u32 2147483648, %v5393_v62 }
 0x555   : > { %v1492_v37 = vsub.f32 1.0, %v1491_v43  ;;  %v1712_v28 = vmul.f32 %v5447_v23, %v5400_v49  ;;  %v1584_v32 = vmul.f32 %v5300_v3, %v1583_v13  ;;  %v1813_v3 = vand.u32 2147483647, %v5393_v62  ;;  %vm5514_vm15 = vmor %vm1809_vm14, %vm1810_vm10 }
 0x556   : > { %v1808_v4 = vadd.f32 %v5409_v45, %v1807_v61  ;;  %vm1794_vm11 = vweird.f32 %v5385_v19  ;;  %vm1717_vm6 = vweird.f32 %v5447_v23  ;;  %v1911_v13 = vand.u32 2147483648, %v5431_v63 }
 0x557   : > { %v1493_v9 = vmul.f32 %v4501_v50, %v1492_v37  ;;  %v1600_v1 = vpack.c.bf16 %v1599_v27, %v1584_v32  ;;  %v1489_v37 = vmul.f32 %v5298_v42, %v1488_v58  ;;  %vm5500_vm12 = vmor %vm1794_vm11, %vm1795_vm9  ;;  %vm5518_vm3 = vcmp.eq.f32.partialorder %v1813_v3, 8.507059e+37 }
 0x558   : > { %v5472_v54 = vpop.xlane.xlu0 %1975  ;;  %v1812_v24 = vsel %vm5514_vm15, %v5409_v45, %v1808_v4  ;;  %v1722_v45 = vand.u32 2147483648, %v5400_v49  ;;  %vm1905_vm15 = vweird.f32 %v5431_v63 }
 0x559   : > { %v1494_v26 = vadd.f32 %v4501_v50, %v1493_v9  ;;  %4506 = vrcp.f32 %v5472_v54  ;;  %4216 = vmatmul.msk.bf16.vlgmr.msrb.gmra.mxu3 %vm1267_vm1, %v1600_v1  ;;  %v1991_v19 = vand.u32 2147483648, %v5472_v54 }
 0x55a   : > { %v5479_v33 = vpop.eup %4504  ;;  %4508 = vrcp.f32 %v5431_v63  ;;  %v1723_v3 = vor.u32 1.1754944e-38, %v1722_v45  ;;  %v1912_v45 = vor.u32 1.1754944e-38, %v1911_v13 }
 0x55b   : > { %v1822_v2 = vpop.permute.xlu2 %1821  ;;  %v1498_v51 = vsel %vm1497_vm5, %v4501_v50, %v1494_v26  ;;  %v1713_v50 = vsub.f32 1.0, %v1712_v28  ;;  %v5484_v30 = vpop.xlane.xlu1 %1978  ;;  %v1697_v39 = vmul.f32 %v5479_v33, %v5407_v36  ;;  %4510 = vrcp.f32 %v5412_v48 }
 0x55c   : > { %1834 = vmatpush.bf16.msra.mxu3 %v1822_v2  ;;  %v1503_v43 = vsel %vm1500_vm7, %v1502_v0, %v1498_v51  ;;  %4512 = vrcp.f32 %v5484_v30  ;;  %v1816_v2 = vor.u32 1.1754944e-38, %v1815_v47  ;;  %vm1702_vm4 = vweird.f32 %v5479_v33 }
 0x55d   : > { %v1504_v38 = vmul.f32 %v5315_v16, %v1503_v43  ;;  %v1793_v16 = vadd.f32 %v5405_v25, %v1792_v59  ;;  %v1698_v46 = vsub.f32 1.0, %v1697_v39  ;;  %v1714_v55 = vmul.f32 %v5447_v23, %v1713_v50 }
 0x55e   : > { %v1707_v26 = vand.u32 2147483648, %v5407_v36  ;;  %vm1701_vm5 = vweird.f32 %v5407_v36  ;;  %v1705_v28 = vand.u32 2147483647, %v5407_v36  ;;  %vm1716_vm7 = vweird.f32 %v5400_v49 }
 0x55f   : > { %v1505_v42 = vpack.c.bf16 %v1504_v38, %v1489_v37  ;;  %v1699_v9 = vmul.f32 %v5479_v33, %v1698_v46  ;;  %v5510_v5 = vpop.eup %4506  ;;  %v1797_v22 = vsel %vm5500_vm12, %v5405_v25, %v1793_v16  ;;  %v1715_v7 = vadd.f32 %v5447_v23, %v1714_v55  ;;  %vm5547_vm8 = vmor %vm1701_vm5, %vm1702_vm4 }
 0x560   : > { %v5524_v62 = vpop.eup %4508  ;;  %v1720_v25 = vand.u32 2147483647, %v5400_v49  ;;  %v1981_v32 = vmul.f32 %v5510_v5, %v5472_v54  ;;  %v1817_v36 = vsel %vm5518_vm3, %v1816_v2, %v1812_v24  ;;  %v1802_v43 = vsel %vm5504_vm13, %v1801_v11, %v1797_v22  ;;  %vm1718_vm9 = vmor %vm1716_vm7, %vm1717_vm6 }
 0x561   : > { %4214 = vmatmul.msk.bf16.vlgmr.msra.gmra.mxu1 %vm1267_vm1, %v1505_v42  ;;  %v1700_v14 = vadd.f32 %v5479_v33, %v1699_v9  ;;  %v5534_v17 = vpop.eup %4510  ;;  %v1901_v51 = vmul.f32 %v5524_v62, %v5431_v63  ;;  %v1708_v27 = vor.u32 1.1754944e-38, %v1707_v26  ;;  %v1719_v58 = vsel %vm1718_vm9, %v5447_v23, %v1715_v7 }
 0x562   : > { %v5540_v0 = vpop.eup %4512  ;;  %v1886_v59 = vmul.f32 %v5534_v17, %v5412_v48  ;;  %vm1706_vm10 = vcmp.eq.f32.partialorder %v1705_v28, 8.507059e+37  ;;  %v1982_v38 = vsub.f32 1.0, %v1981_v32  ;;  %vm1721_vm11 = vcmp.eq.f32.partialorder %v1720_v25, 8.507059e+37 }
 0x563   : > { %v1704_v53 = vsel %vm5547_vm8, %v5479_v33, %v1700_v14  ;;  %v1996_v49 = vmul.f32 %v5540_v0, %v5484_v30  ;;  %v1818_v33 = vmul.f32 %v5313_v10, %v1817_v36  ;;  %v1902_v47 = vsub.f32 1.0, %v1901_v51 }
 0x564   : > { %v1709_v50 = vsel %vm1706_vm10, %v1708_v27, %v1704_v53  ;;  %v1803_v39 = vmul.f32 %v5303_v41, %v1802_v43  ;;  %v1724_v1 = vsel %vm1721_vm11, %v1723_v3, %v1719_v58  ;;  %v1887_v16 = vsub.f32 1.0, %v1886_v59 }
 0x565   : > { %v1997_v61 = vsub.f32 1.0, %v1996_v49  ;;  %v1710_v23 = vmul.f32 %v5329_v31, %v1709_v50  ;;  %v1983_v4 = vmul.f32 %v5510_v5, %v1982_v38  ;;  %v1725_v55 = vmul.f32 %v5318_v20, %v1724_v1 }
 0x566   : > { %v1819_v46 = vpack.c.bf16 %v1818_v33, %v1803_v39  ;;  %v1903_v10 = vmul.f32 %v5524_v62, %v1902_v47  ;;  %vm2001_vm12 = vweird.f32 %v5540_v0  ;;  %v1888_v41 = vmul.f32 %v5534_v17, %v1887_v16 }
 0x567   : > { %v1998_v37 = vmul.f32 %v5540_v0, %v1997_v61  ;;  %v2006_v8 = vand.u32 2147483648, %v5484_v30  ;;  %v1726_v31 = vpack.c.bf16 %v1725_v55, %v1710_v23  ;;  %v1984_v9 = vadd.f32 %v5510_v5, %v1983_v4  ;;  %v2063_v55 = vld [vmem:[%s5647_s6 + $0x10] sm:$0xff] }
 0x568   : > { %vm1986_vm13 = vweird.f32 %v5510_v5  ;;  %vm2000_vm14 = vweird.f32 %v5484_v30  ;;  %v2004_v20 = vand.u32 2147483647, %v5484_v30  ;;  %v1904_v11 = vadd.f32 %v5524_v62, %v1903_v10  ;;  %v2064_v10 = vld [vmem:[%s5647_s6 + $0x18] sm:$0xff] }
 0x569   : > { %v1999_v6 = vadd.f32 %v5540_v0, %v1998_v37  ;;  %4220 = vmatmul.msk.bf16.vlgmr.msra.gmra.mxu3 %vm1267_vm1, %v1819_v46  ;;  %vm1906_vm3 = vweird.f32 %v5524_v62  ;;  %vm5592_vm4 = vmor %vm2000_vm14, %vm2001_vm12  ;;  %vm1985_vm6 = vweird.f32 %v5472_v54  ;;  %v1989_v30 = vand.u32 2147483647, %v5472_v54 }
 0x56a   : > { %v1889_v22 = vadd.f32 %v5534_v17, %v1888_v41  ;;  %vm1891_vm5 = vweird.f32 %v5534_v17  ;;  %v1909_v24 = vand.u32 2147483647, %v5431_v63  ;;  %vm5608_vm7 = vmor %vm1985_vm6, %vm1986_vm13  ;;  %v2007_v26 = vor.u32 1.1754944e-38, %v2006_v8  ;;  %v2062_v41 = vld [vmem:[%s5647_s6 + $0x8] sm:$0xff] }
 0x56b   : > { %v2012_v56 = vpop.permute.xlu0 %2011  ;;  %v2003_v2 = vsel %vm5592_vm4, %v5540_v0, %v1999_v6  ;;  %vm1890_vm8 = vweird.f32 %v5412_v48  ;;  %v1896_v54 = vand.u32 2147483648, %v5412_v48  ;;  %vm1907_vm9 = vmor %vm1905_vm15, %vm1906_vm3  ;;  %v1988_v7 = vsel %vm5608_vm7, %v5510_v5, %v1984_v9  ;;  %v2061_v6 = vld [vmem:[%s5647_s6] sm:$0xff] }
 0x56c   : > { %2024 = vmatpush.bf16.msrb.mxu3 %v2012_v56  ;;  %vm2005_vm10 = vcmp.eq.f32.partialorder %v2004_v20, 8.507059e+37  ;;  %v1894_v28 = vand.u32 2147483647, %v5412_v48  ;;  %v1908_v0 = vsel %vm1907_vm9, %v5524_v62, %v1904_v11  ;;  %v1992_v25 = vor.u32 1.1754944e-38, %v1991_v19  ;;  %vm1892_vm11 = vmor %vm1890_vm8, %vm1891_vm5 }
 0x56d   : > { %vm1990_vm12 = vcmp.eq.f32.partialorder %v1989_v30, 8.507059e+37  ;;  %v1893_v35 = vsel %vm1892_vm11, %v5534_v17, %v1889_v22  ;;  %vm1910_vm13 = vcmp.eq.f32.partialorder %v1909_v24, 8.507059e+37  ;;  %v1897_v63 = vor.u32 1.1754944e-38, %v1896_v54 }
 0x56e   : > { %v1993_v32 = vsel %vm1990_vm12, %v1992_v25, %v1988_v7  ;;  %v1913_v36 = vsel %vm1910_vm13, %v1912_v45, %v1908_v0  ;;  %vm1895_vm14 = vcmp.eq.f32.partialorder %v1894_v28, 8.507059e+37  ;;  %v2067_v8 = vpack.c.bf16 %v2062_v41, %v2061_v6 }
 0x56f   : > { %v1898_v5 = vsel %vm1895_vm14, %v1897_v63, %v1893_v35  ;;  %v1994_v53 = vmul.f32 %v5339_v40, %v1993_v32  ;;  %v1914_v48 = vmul.f32 %v5331_v34, %v1913_v36  ;;  %vm1649_vm15 = vcmask 195584  }
 0x570   : > { %2583 = vmatpush.bf16.msra.mxu3 %v5063_v52  ;;  %v1899_v49 = vmul.f32 %v5327_v60, %v1898_v5 }
 0x571   : > { %4218 = vmatmul.msk.bf16.vlgmr.msrb.gmra.mxu1 %vm1267_vm1, %v1726_v31 }
 0x572   : > { %v1915_v56 = vpack.c.bf16 %v1914_v48, %v1899_v49 }
 0x573   : > { %v1917_v42 = vpop.permute.xlu1 %1916 }
 0x574   : > { %1929 = vmatpush.bf16.msra.mxu1 %v1917_v42  ;;  %2584 = vmatpush.bf16.msra.mxu3 %v5074_v57  ;;  %v2008_v57 = vsel %vm2005_vm10, %v2007_v26, %v2003_v2  ;;  %v2068_v42 = vpack.c.bf16 %v2064_v10, %v2063_v55 }
 0x575   : > { %v2009_v51 = vmul.f32 %v5341_v44, %v2008_v57 }
 0x576   : > { %2081 = vmatpush.bf16.msrb.mxu0 %v2068_v42 }
 0x577   : > { %v2010_v62 = vpack.c.bf16 %v2009_v51, %v1994_v53 }
 0x579   : > { %4224 = vmatmul.msk.bf16.vlgmr.msrb.gmra.mxu3 %vm1267_vm1, %v2010_v62 }
 0x57a   : > { %2082 = vmatpush.bf16.msrb.mxu0 %v2067_v8 }
 0x581   : > { %4222 = vmatmul.msk.bf16.vlgmr.msra.gmra.mxu1 %vm1267_vm1, %v1915_v56 }
 0x596   : > { %v1330_v44 = vpop.f32.mrf.mxu1 }
 0x59b   : > { %v1426_v17 = vpop.f32.mrf.mxu3 }
 0x59e   : > { %v1332_v58 = vpop.f32.mrf.mxu1 }
 0x5a3   : > { %v1428_v43 = vpop.f32.mrf.mxu3 }
 0x5a4   : > { %v4361_v27 = vpack.i.bf16 %v1428_v43, %v1426_v17  ;;  %v4428_v43 = vld [vmem:[%s5639_s17] ss:$0 sm:$0xff] }
 0x5a6   : > { %4362 = vrot.lane.b32.xlu2 %v4361_v27, %s6398_s25 }
 0x5dc   : > { %v1616_v40 = vpop.f32.mrf.mxu3 }
 0x5de   : > { %v1521_v59 = vpop.f32.mrf.mxu1 }
 0x5e4   : > { %v1618_v33 = vpop.f32.mrf.mxu3 }
 0x5e5   : > { %v4371_v60 = vpack.i.bf16 %v1618_v33, %v1616_v40 }
 0x5e6   : > { %v1523_v61 = vpop.f32.mrf.mxu1 }
 0x5e7   : > { %v4366_v34 = vpack.i.bf16 %v1523_v61, %v1521_v59  ;;  %4372 = vrot.lane.b32.xlu2 %v4371_v60, %s6394_s1 }
 0x5e9   : > { %4367 = vrot.lane.b32.xlu0 %v4366_v34, %s6396_s24 }
 0x5ec   : > { %v1836_v50 = vpop.f32.mrf.mxu3 }
 0x5ee   : > { %v1740_v3 = vpop.f32.mrf.mxu1 }
 0x5f4   : > { %v1838_v47 = vpop.f32.mrf.mxu3 }
 0x5f5   : > { %v4376_v39 = vpack.i.bf16 %v1838_v47, %v1836_v50 }
 0x5f6   : > { %v1742_v38 = vpop.f32.mrf.mxu1 }
 0x5f7   : > { %4377 = vrot.lane.b32.xlu1 %v4376_v39, %s6398_s25 }
 0x5fc   : > { %v2026_v37 = vpop.f32.mrf.mxu3 }
 0x5fe   : > { %v1931_v1 = vpop.f32.mrf.mxu1 }
 0x600   : > { %v4363_v31 = vpop.permute.xlu2 %4362 }
 0x601   : > { %v4365_v9 = vunpack.i.h.bf16 %v4363_v31  ;;  %v4364_v20 = vunpack.i.l.bf16 %v4363_v31 }
 0x603   : > { %v1646_v30 = vsel %vm1244_vm0, %v1332_v58, %v4365_v9  ;;  %v1645_v2 = vsel %vm1244_vm0, %v1330_v44, %v4364_v20 }
 0x604   : > { %v2028_v4 = vpop.f32.mrf.mxu3 }
 0x605   : > { %v4386_v46 = vpack.i.bf16 %v2028_v4, %v2026_v37 }
 0x606   : > { %v1933_v16 = vpop.f32.mrf.mxu1 }
 0x607   : > { %v4381_v23 = vpack.i.bf16 %v1933_v16, %v1931_v1  ;;  %4387 = vrot.lane.b32.xlu2 %v4386_v46, %s6394_s1  ;;  %s6468_s1 = smov 120  }
 0x609   : > { %4382 = vrot.lane.b32.xlu0 %v4381_v23, %s6396_s24  ;;  %s6465_s24 = sld [smem:[#allocation19_spill]] }
 0x60f   : > { %s5689_s25 = scalar_lea.vmem %s6465_s24, %s5029_s28  ;;  %s6466_s24 = sld [smem:[#allocation21_spill]] }
 0x615   : > { %s5717_s5 = scalar_lea.vmem %s6466_s24, %s5081_s21  ;;  %s4300_s21 = sshll.u32 %s6488_s2, 7 }
 0x616   : > { %s5764_s28 = scalar_lea.vmem %s6467_s0, %s4300_s21  ;;  %s6469_s24 = smov 88  }
 0x617   : > { %s6470_s21 = smov 96   ;;  %s6473_s0 = smov 112  }
 0x641   : > { %v4373_v11 = vpop.permute.xlu2 %4372 }
 0x642   : > { %v4375_v22 = vunpack.i.h.bf16 %v4373_v11  ;;  %v4374_v24 = vunpack.i.l.bf16 %v4373_v11  ;;  %v2212_v11 = vld [vmem:[%s5717_s5 + $0x10] sm:$0xff] }
 0x65b   : > { %v4368_v19 = vpop.permute.xlu0 %4367 }
 0x65c   : > { %v4370_v52 = vunpack.i.h.bf16 %v4368_v19  ;;  %v4369_v13 = vunpack.i.l.bf16 %v4368_v19  ;;  %v2213_v19 = vld [vmem:[%s5717_s5 + $0x18] sm:$0xff] }
 0x65e   : > { %v1647_v14 = vsel %vm1267_vm1, %v1645_v2, %v4369_v13  ;;  %v1648_v26 = vsel %vm1267_vm1, %v1646_v30, %v4370_v52  ;;  %v2217_v13 = vpack.c.bf16 %v2213_v19, %v2212_v11  ;;  %v2210_v30 = vld [vmem:[%s5717_s5] sm:$0xff]  ;;  %v2211_v2 = vld [vmem:[%s5717_s5 + $0x8] sm:$0xff] }
 0x65f   : > { %v1650_v54 = vsel %vm1649_vm15, %v1647_v14, %v4374_v24  ;;  %v1651_v7 = vsel %vm1649_vm15, %v1648_v26, %v4375_v22  ;;  %v2216_v22 = vpack.c.bf16 %v2211_v2, %v2210_v30 }
 0x660   : > { %v2065_v28 = vpack.c.bf16 %v1651_v7, %v1650_v54  ;;  %2234 = vmatpush.bf16.msrb.mxu1 %v2217_v13 }
 0x661   : > { %v4388_v45 = vpop.permute.xlu2 %4387 }
 0x662   : > { %4225 = vmatmul.msk.bf16.vlgmr.msrb.gmra.mxu0 %vm1023_vm2, %v2065_v28  ;;  %v4390_v36 = vunpack.i.h.bf16 %v4388_v45  ;;  %v4389_v51 = vunpack.i.l.bf16 %v4388_v45 }
 0x664   : > { %2235 = vmatpush.bf16.msrb.mxu1 %v2216_v22 }
 0x669   : > { %v4378_v0 = vpop.permute.xlu1 %4377 }
 0x66a   : > { %v4380_v25 = vunpack.i.h.bf16 %v4378_v0  ;;  %v4379_v57 = vunpack.i.l.bf16 %v4378_v0 }
 0x66c   : > { %v2056_v5 = vsel %vm1244_vm0, %v1742_v38, %v4380_v25  ;;  %v2055_v53 = vsel %vm1244_vm0, %v1740_v3, %v4379_v57 }
 0x67b   : > { %v4383_v35 = vpop.permute.xlu0 %4382 }
 0x67c   : > { %v4385_v32 = vunpack.i.h.bf16 %v4383_v35  ;;  %v4384_v63 = vunpack.i.l.bf16 %v4383_v35 }
 0x67e   : > { %v2057_v48 = vsel %vm1267_vm1, %v2055_v53, %v4384_v63  ;;  %v2058_v62 = vsel %vm1267_vm1, %v2056_v5, %v4385_v32 }
 0x67f   : > { %v2059_v49 = vsel %vm1649_vm15, %v2057_v48, %v4389_v51  ;;  %v2060_v56 = vsel %vm1649_vm15, %v2058_v62, %v4390_v36 }
 0x680   : > { %v2066_v17 = vpack.c.bf16 %v2060_v56, %v2059_v49  ;;  %v4429_v56 = vld [vmem:[%s5683_s18] ss:$0 sm:$0xff] }
 0x682   : > { %4226 = vmatmul.msk.bf16.gmra.mxu0 %vm1023_vm2, %v2066_v17 }
 0x6df   : > { %v2084_v27 = vpop.f32.mrf.mxu0 }
 0x6e0   : > { %v2094_v44 = vadd.f32 %v2084_v27, %v4996_v12 }
 0x6e2   : > { %v5669_v58 = vadd.f32 %v4428_v43, %v2094_v44  ;;  %v4430_v44 = vld [vmem:[%s5689_s25] ss:$0 sm:$0xff] }
 0x6e4   : > { %v2108_v59 = vsel %vm1023_vm2, %v5669_v58, 0.0 }
 0x6e5   : > { %2109 = vadd.xlane.f32.xlu1 %v2108_v59 }
 0x6e7   : > { %v2086_v40 = vpop.f32.mrf.mxu0 }
 0x6e8   : > { %v2095_v61 = vadd.f32 %v2086_v40, %v5000_v15 }
 0x6ea   : > { %v5674_v34 = vadd.f32 %v4428_v43, %v2095_v61 }
 0x6ec   : > { %v2111_v33 = vsel %vm1023_vm2, %v5674_v34, 0.0 }
 0x6ed   : > { %2112 = vadd.xlane.f32.xlu0 %v2111_v33 }
 0x6ff   : > { %v2089_v60 = vpop.f32.mrf.mxu0 }
 0x700   : > { %v2096_v3 = vadd.f32 %v2089_v60, %v5004_v18 }
 0x702   : > { %v5691_v12 = vadd.f32 %v4428_v43, %v2096_v3 }
 0x704   : > { %v2114_v15 = vsel %vm1023_vm2, %v5691_v12, 0.0 }
 0x705   : > { %2115 = vadd.xlane.f32.xlu0 %v2114_v15 }
 0x707   : > { %v2091_v47 = vpop.f32.mrf.mxu0 }
 0x708   : > { %v2097_v1 = vadd.f32 %v2091_v47, %v5008_v21 }
 0x70a   : > { %v5700_v4 = vadd.f32 %v4428_v43, %v2097_v1 }
 0x70c   : > { %v2117_v42 = vsel %vm1023_vm2, %v5700_v4, 0.0 }
 0x758   : > { %v2110_v50 = vpop.xlane.xlu1 %2109 }
 0x759   : > { %v2120_v38 = vmul.f32 %v2110_v50, %v5012_v29 }
 0x75b   : > { %v2124_v18 = vsub.f32 %v5669_v58, %v2120_v38 }
 0x75d   : > { %v2128_v39 = vmul.f32 %v2124_v18, %v2124_v18 }
 0x75f   : > { %v2132_v37 = vsel %vm1023_vm2, %v2128_v39, 0.0 }
 0x760   : > { %2133 = vadd.xlane.f32.xlu2 %v2132_v37  ;;  %v2113_v16 = vpop.xlane.xlu0 %2112 }
 0x761   : > { %v2121_v23 = vmul.f32 %v2113_v16, %v5012_v29 }
 0x763   : > { %v2125_v46 = vsub.f32 %v5674_v34, %v2121_v23 }
 0x765   : > { %v2129_v55 = vmul.f32 %v2125_v46, %v2125_v46 }
 0x767   : > { %v2135_v10 = vsel %vm1023_vm2, %v2129_v55, 0.0 }
 0x768   : > { %2136 = vadd.xlane.f32.xlu1 %v2135_v10  ;;  %2118 = vadd.xlane.f32.xlu2 %v2117_v42 }
 0x778   : > { %v2116_v21 = vpop.xlane.xlu0 %2115 }
 0x779   : > { %v2122_v6 = vmul.f32 %v2116_v21, %v5012_v29 }
 0x77b   : > { %v5708_v41 = vsub.f32 %v5691_v12, %v2122_v6 }
 0x77d   : > { %v2130_v8 = vmul.f32 %v5708_v41, %v5708_v41 }
 0x77f   : > { %v2138_v31 = vsel %vm1023_vm2, %v2130_v8, 0.0 }
 0x780   : > { %2139 = vadd.xlane.f32.xlu1 %v2138_v31 }
 0x7d3   : > { %v2134_v9 = vpop.xlane.xlu2 %2133 }
 0x7d4   : > { %v2144_v20 = vmul.f32 %v2134_v9, %v5012_v29 }
 0x7d6   : > { %v2148_v52 = vadd.f32 1e-05, %v2144_v20 }
 0x7d8   : > { %4514 = vrsqrt.f32 %v2148_v52  ;;  %vm2158_vm4 = vweird.f32 %v2148_v52 }
 0x7db   : > { %v2137_v24 = vpop.xlane.xlu1 %2136  ;;  %v2119_v14 = vpop.xlane.xlu2 %2118 }
 0x7dc   : > { %v2145_v26 = vmul.f32 %v2137_v24, %v5012_v29  ;;  %v2123_v54 = vmul.f32 %v2119_v14, %v5012_v29  ;;  %v5740_v24 = vld [vmem:[%s4966_s16] ss:$0 sm:$0xff] }
 0x7de   : > { %v4515_v7 = vpop.eup %4514  ;;  %v2149_v28 = vadd.f32 1e-05, %v2145_v26  ;;  %v5727_v0 = vsub.f32 %v5700_v4, %v2123_v54 }
 0x7df   : > { %v2153_v25 = vmul.f32 %v4515_v7, %v2148_v52  ;;  %vm2159_vm3 = vweird.f32 %v4515_v7 }
 0x7e0   : > { %4516 = vrsqrt.f32 %v2149_v28  ;;  %v2131_v57 = vmul.f32 %v5727_v0, %v5727_v0  ;;  %vm2160_vm6 = vmor %vm2158_vm4, %vm2159_vm3  ;;  %vm2168_vm7 = vweird.f32 %v2149_v28 }
 0x7e1   : > { %v2154_v45 = vmul.f32 %v4515_v7, %v2153_v25 }
 0x7e2   : > { %v2141_v35 = vsel %vm1023_vm2, %v2131_v57, 0.0 }
 0x7e3   : > { %v2155_v32 = vmul.f32 0.5, %v2154_v45  ;;  %2142 = vadd.xlane.f32.xlu0 %v2141_v35 }
 0x7e5   : > { %v2156_v63 = vsub.f32 1.5, %v2155_v32 }
 0x7e6   : > { %v4517_v36 = vpop.eup %4516 }
 0x7e7   : > { %v2157_v51 = vmul.f32 %v4515_v7, %v2156_v63  ;;  %v2163_v5 = vmul.f32 %v4517_v36, %v2149_v28  ;;  %vm2169_vm5 = vweird.f32 %v4517_v36 }
 0x7e8   : > { %vm2170_vm8 = vmor %vm2168_vm7, %vm2169_vm5 }
 0x7e9   : > { %v2164_v53 = vmul.f32 %v4517_v36, %v2163_v5  ;;  %v2161_v48 = vsel %vm2160_vm6, %v4515_v7, %v2157_v51 }
 0x7ea   : > { %v2192_v17 = vmul.f32 %v2161_v48, %v2124_v18 }
 0x7eb   : > { %v2165_v62 = vmul.f32 0.5, %v2164_v53 }
 0x7ec   : > { %v2199_v59 = vmul.f32 %v4429_v56, %v2192_v17 }
 0x7ed   : > { %v2166_v49 = vsub.f32 1.5, %v2165_v62  ;;  %v2413_v62 = vld [vmem:[%s5764_s28 + $0x30] sm:$0xff] }
 0x7ee   : > { %v2206_v33 = vadd.f32 %v4430_v44, %v2199_v59 }
 0x7ef   : > { %v2167_v43 = vmul.f32 %v4517_v36, %v2166_v49  ;;  %v2414_v49 = vld [vmem:[%s5764_s28 + $0x38] sm:$0xff] }
 0x7f1   : > { %v2171_v27 = vsel %vm2170_vm8, %v4517_v36, %v2167_v43 }
 0x7f2   : > { %v2193_v40 = vmul.f32 %v2171_v27, %v2125_v46 }
 0x7f3   : > { %v2140_v15 = vpop.xlane.xlu1 %2139 }
 0x7f4   : > { %v2200_v61 = vmul.f32 %v4429_v56, %v2193_v40  ;;  %v2146_v50 = vmul.f32 %v2140_v15, %v5012_v29  ;;  %v2411_v40 = vld [vmem:[%s5764_s28 + $0x20] sm:$0xff] }
 0x7f6   : > { %v2207_v60 = vadd.f32 %v4430_v44, %v2200_v61  ;;  %v2150_v38 = vadd.f32 1e-05, %v2146_v50  ;;  %v2412_v61 = vld [vmem:[%s5764_s28 + $0x28] sm:$0xff] }
 0x7f8   : > { %v2214_v3 = vpack.c.bf16 %v2207_v60, %v2206_v33  ;;  %4518 = vrsqrt.f32 %v2150_v38  ;;  %vm2178_vm10 = vweird.f32 %v2150_v38 }
 0x7fa   : > { %4227 = vmatmul.msk.bf16.vlgmr.msrb.gmra.mxu1 %vm1023_vm2, %v2214_v3  ;;  %v2419_v3 = vpack.c.bf16 %v2412_v61, %v2411_v40 }
 0x7fe   : > { %v4519_v47 = vpop.eup %4518 }
 0x7ff   : > { %v2173_v18 = vmul.f32 %v4519_v47, %v2150_v38  ;;  %vm2179_vm9 = vweird.f32 %v4519_v47 }
 0x800   : > { %vm2180_vm11 = vmor %vm2178_vm10, %vm2179_vm9 }
 0x801   : > { %v2174_v39 = vmul.f32 %v4519_v47, %v2173_v18 }
 0x803   : > { %v2175_v23 = vmul.f32 0.5, %v2174_v39  ;;  %v2409_v39 = vld [vmem:[%s5764_s28 + $0x10] sm:$0xff] }
 0x805   : > { %v2176_v46 = vsub.f32 1.5, %v2175_v23 }
 0x807   : > { %v2177_v10 = vmul.f32 %v4519_v47, %v2176_v46 }
 0x809   : > { %v2181_v6 = vsel %vm2180_vm11, %v4519_v47, %v2177_v10 }
 0x80a   : > { %v2194_v9 = vmul.f32 %v2181_v6, %v5708_v41  ;;  %v2408_v6 = vld [vmem:[%s5764_s28 + $0x8] sm:$0xff] }
 0x80c   : > { %v2201_v52 = vmul.f32 %v4429_v56, %v2194_v9 }
 0x80e   : > { %v2208_v30 = vadd.f32 %v4430_v44, %v2201_v52 }
 0x856   : > { %v2143_v1 = vpop.xlane.xlu0 %2142 }
 0x857   : > { %v2147_v37 = vmul.f32 %v2143_v1, %v5012_v29  ;;  %v2410_v1 = vld [vmem:[%s5764_s28 + $0x18] sm:$0xff] }
 0x858   : > { %v2418_v23 = vpack.c.bf16 %v2410_v1, %v2409_v39 }
 0x859   : > { %v2151_v16 = vadd.f32 1e-05, %v2147_v37 }
 0x85b   : > { %4520 = vrsqrt.f32 %v2151_v16  ;;  %vm2188_vm13 = vweird.f32 %v2151_v16 }
 0x861   : > { %v4521_v55 = vpop.eup %4520 }
 0x862   : > { %v2183_v42 = vmul.f32 %v4521_v55, %v2151_v16  ;;  %vm2189_vm12 = vweird.f32 %v4521_v55 }
 0x863   : > { %vm2190_vm14 = vmor %vm2188_vm13, %vm2189_vm12  ;;  %vm2421_vm13 = vcmask 523264  }
 0x864   : > { %v2184_v21 = vmul.f32 %v4521_v55, %v2183_v42 }
 0x866   : > { %v2185_v8 = vmul.f32 0.5, %v2184_v21  ;;  %v2407_v21 = vld [vmem:[%s5764_s28] sm:$0xff] }
 0x867   : > { %v2417_v9 = vpack.c.bf16 %v2408_v6, %v2407_v21 }
 0x868   : > { %v2186_v31 = vsub.f32 1.5, %v2185_v8 }
 0x86a   : > { %v2187_v20 = vmul.f32 %v4521_v55, %v2186_v31 }
 0x86c   : > { %v2191_v11 = vsel %vm2190_vm14, %v4521_v55, %v2187_v20 }
 0x86d   : > { %v2195_v19 = vmul.f32 %v2191_v11, %v5727_v0 }
 0x86f   : > { %v2202_v13 = vmul.f32 %v4429_v56, %v2195_v19  ;;  %v2420_v56 = vpack.c.bf16 %v2414_v49, %v2413_v62 }
 0x871   : > { %v2209_v2 = vadd.f32 %v4430_v44, %v2202_v13  ;;  %2432 = vmatpush.bf16.msrb.mxu2 %v2420_v56 }
 0x873   : > { %v2215_v22 = vpack.c.bf16 %v2209_v2, %v2208_v30 }
 0x875   : > { %4228 = vmatmul.msk.bf16.gmra.mxu1 %vm1023_vm2, %v2215_v22  ;;  %2433 = vmatpush.bf16.msrb.mxu2 %v2419_v3 }
 0x877   : > { %v2237_v14 = vpop.f32.mrf.mxu1 }
 0x878   : > { %v5744_v26 = vadd.f32 %v5740_v24, %v2237_v14 }
 0x879   : > { %2434 = vmatpush.bf16.msrb.mxu2 %v2418_v23 }
 0x87a   : > { %v5747_v41 = vmul.f32 0.70710677, %v5744_v26 }
 0x87c   : > { %v2255_v54 = vand.u32 2147483647, %v5747_v41  ;;  %vm2387_vm11 = vcmp.ge.f32.partialorder %v5747_v41, 0.0 }
 0x87d   : > { %2435 = vmatpush.bf16.msrb.mxu2 %v2417_v9 }
 0x87e   : > { %v2259_v7 = vmul.f32 0.3275911, %v2255_v54  ;;  %v2363_v59 = vsub.f32 0.0, %v2255_v54 }
 0x87f   : > { %v2239_v28 = vpop.f32.mrf.mxu1 }
 0x880   : > { %v2263_v0 = vadd.f32 1.0, %v2259_v7  ;;  %v5751_v25 = vadd.f32 %v5740_v24, %v2239_v28  ;;  %v2367_v47 = vmul.f32 %v2363_v59, %v2255_v54  ;;  %v2247_v59 = vmul.f32 0.5, %v5744_v26 }
 0x882   : > { %4522 = vrcp.f32 %v2263_v0  ;;  %v5754_v57 = vmul.f32 0.70710677, %v5751_v25  ;;  %v2278_v5 = vand.u32 2147483648, %v2263_v0  ;;  %v2276_v48 = vand.u32 2147483647, %v2263_v0 }
 0x883   : > { %vm2272_vm4 = vweird.f32 %v2263_v0  ;;  %v2371_v8 = vmul.f32 1.442695, %v2367_v47  ;;  %v2248_v40 = vmul.f32 0.5, %v5751_v25 }
 0x884   : > { %v5757_v45 = vand.u32 2147483647, %v5754_v57  ;;  %v2279_v43 = vor.u32 1.1754944e-38, %v2278_v5  ;;  %vm2277_vm5 = vcmp.eq.f32.partialorder %v2276_v48, 8.507059e+37  ;;  %vm2388_vm12 = vcmp.ge.f32.partialorder %v5754_v57, 0.0 }
 0x886   : > { %v2260_v35 = vmul.f32 0.3275911, %v5757_v45  ;;  %v2364_v19 = vsub.f32 0.0, %v5757_v45 }
 0x888   : > { %v4523_v32 = vpop.eup %4522  ;;  %v2264_v36 = vadd.f32 1.0, %v2260_v35  ;;  %v2368_v22 = vmul.f32 %v2364_v19, %v5757_v45 }
 0x889   : > { %v2268_v63 = vmul.f32 %v4523_v32, %v2263_v0  ;;  %vm2273_vm3 = vweird.f32 %v4523_v32 }
 0x88a   : > { %4524 = vrcp.f32 %v2264_v36  ;;  %vm2274_vm6 = vmor %vm2272_vm4, %vm2273_vm3  ;;  %v2293_v18 = vand.u32 2147483648, %v2264_v36  ;;  %v2291_v16 = vand.u32 2147483647, %v2264_v36  ;;  %vm2287_vm8 = vweird.f32 %v2264_v36 }
 0x88b   : > { %v2269_v51 = vsub.f32 1.0, %v2268_v63  ;;  %4526 = vpow2.f32 %v2371_v8  ;;  %v2373_v0 = vmul.f32 1.442695, %v2368_v22 }
 0x88c   : > { %v2294_v42 = vor.u32 1.1754944e-38, %v2293_v18  ;;  %vm2292_vm10 = vcmp.eq.f32.partialorder %v2291_v16, 8.507059e+37 }
 0x88d   : > { %v2270_v53 = vmul.f32 %v4523_v32, %v2269_v51  ;;  %4528 = vpow2.f32 %v2373_v0 }
 0x88f   : > { %v2271_v17 = vadd.f32 %v4523_v32, %v2270_v53 }
 0x890   : > { %v4525_v27 = vpop.eup %4524 }
 0x891   : > { %v2275_v44 = vsel %vm2274_vm6, %v4523_v32, %v2271_v17  ;;  %v2283_v60 = vmul.f32 %v4525_v27, %v2264_v36  ;;  %vm2288_vm7 = vweird.f32 %v4525_v27  ;;  %v4527_v35 = vpop.eup %4526 }
 0x892   : > { %v2280_v33 = vsel %vm2277_vm5, %v2279_v43, %v2275_v44  ;;  %vm2289_vm9 = vmor %vm2287_vm8, %vm2288_vm7 }
 0x893   : > { %v2327_v15 = vmul.f32 1.0614054, %v2280_v33  ;;  %v2284_v50 = vsub.f32 1.0, %v2283_v60  ;;  %v4529_v49 = vpop.eup %4528 }
 0x895   : > { %v2331_v38 = vadd.f32 -1.4531521, %v2327_v15  ;;  %v2285_v37 = vmul.f32 %v4525_v27, %v2284_v50 }
 0x897   : > { %v2335_v46 = vmul.f32 %v2331_v38, %v2280_v33  ;;  %v2286_v55 = vadd.f32 %v4525_v27, %v2285_v37 }
 0x899   : > { %v2339_v10 = vadd.f32 1.4214138, %v2335_v46  ;;  %v2290_v31 = vsel %vm2289_vm9, %v4525_v27, %v2286_v55 }
 0x89a   : > { %v2295_v11 = vsel %vm2292_vm10, %v2294_v42, %v2290_v31 }
 0x89b   : > { %v2343_v20 = vmul.f32 %v2339_v10, %v2280_v33  ;;  %v2328_v52 = vmul.f32 1.0614054, %v2295_v11 }
 0x89d   : > { %v2347_v13 = vadd.f32 -0.28449672, %v2343_v20  ;;  %v2332_v30 = vadd.f32 -1.4531521, %v2328_v52 }
 0x89f   : > { %v2351_v2 = vmul.f32 %v2347_v13, %v2280_v33  ;;  %v2336_v14 = vmul.f32 %v2332_v30, %v2295_v11 }
 0x8a1   : > { %v2355_v54 = vadd.f32 0.2548296, %v2351_v2  ;;  %v2340_v7 = vadd.f32 1.4214138, %v2336_v14 }
 0x8a3   : > { %v2359_v28 = vmul.f32 %v2355_v54, %v2280_v33  ;;  %v2344_v32 = vmul.f32 %v2340_v7, %v2295_v11 }
 0x8a5   : > { %v2379_v63 = vmul.f32 %v4527_v35, %v2359_v28  ;;  %v2348_v36 = vadd.f32 -0.28449672, %v2344_v32 }
 0x8a7   : > { %v2383_v51 = vsub.f32 1.0, %v2379_v63  ;;  %v2352_v5 = vmul.f32 %v2348_v36, %v2295_v11 }
 0x8a9   : > { %v2356_v53 = vadd.f32 0.2548296, %v2352_v5  ;;  %v2391_v48 = vsub.f32 0.0, %v2383_v51 }
 0x8ab   : > { %v2360_v62 = vmul.f32 %v2356_v53, %v2295_v11  ;;  %v2395_v45 = vsel %vm2387_vm11, %v2383_v51, %v2391_v48 }
 0x8ac   : > { %v2399_v27 = vadd.f32 1.0, %v2395_v45 }
 0x8ad   : > { %v2380_v56 = vmul.f32 %v4529_v49, %v2360_v62 }
 0x8ae   : > { %v2403_v33 = vmul.f32 %v2399_v27, %v2247_v59 }
 0x8af   : > { %v2384_v17 = vsub.f32 1.0, %v2380_v56 }
 0x8b1   : > { %v2392_v43 = vsub.f32 0.0, %v2384_v17 }
 0x8b3   : > { %v2396_v44 = vsel %vm2388_vm12, %v2384_v17, %v2392_v43 }
 0x8b4   : > { %v2400_v61 = vadd.f32 1.0, %v2396_v44 }
 0x8b6   : > { %v2404_v60 = vmul.f32 %v2400_v61, %v2248_v40 }
 0x8b8   : > { %v2415_v3 = vpack.c.bf16 %v2404_v60, %v2403_v33 }
 0x8ba   : > { %4229 = vmatmul.msk.bf16.vlgmr.msrb.gmra.mxu2 %vm2421_vm13, %v2415_v3 }
 0x8f2   : > { %v2242_v15 = vpop.f32.mrf.mxu1 }
 0x8f3   : > { %v5782_v41 = vadd.f32 %v5740_v24, %v2242_v15 }
 0x8f5   : > { %v5785_v50 = vmul.f32 0.70710677, %v5782_v41 }
 0x8f7   : > { %v2257_v57 = vand.u32 2147483647, %v5785_v50  ;;  %vm2389_vm10 = vcmp.ge.f32.partialorder %v5785_v50, 0.0 }
 0x8f9   : > { %v2261_v38 = vmul.f32 0.3275911, %v2257_v57  ;;  %v2365_v9 = vsub.f32 0.0, %v2257_v57 }
 0x8fa   : > { %v2244_v26 = vpop.f32.mrf.mxu1 }
 0x8fb   : > { %v2265_v47 = vadd.f32 1.0, %v2261_v38  ;;  %v5789_v25 = vadd.f32 %v5740_v24, %v2244_v26  ;;  %v2369_v30 = vmul.f32 %v2365_v9, %v2257_v57 }
 0x8fd   : > { %4530 = vrcp.f32 %v2265_v47  ;;  %v5792_v18 = vmul.f32 0.70710677, %v5789_v25  ;;  %v2308_v55 = vand.u32 2147483648, %v2265_v47  ;;  %v2306_v42 = vand.u32 2147483647, %v2265_v47 }
 0x8fe   : > { %vm2302_vm3 = vweird.f32 %v2265_v47  ;;  %v2375_v0 = vmul.f32 1.442695, %v2369_v30 }
 0x8ff   : > { %v2258_v39 = vand.u32 2147483647, %v5792_v18  ;;  %v2309_v24 = vor.u32 1.1754944e-38, %v2308_v55  ;;  %vm2307_vm6 = vcmp.eq.f32.partialorder %v2306_v42, 8.507059e+37  ;;  %vm2390_vm11 = vcmp.ge.f32.partialorder %v5792_v18, 0.0 }
 0x901   : > { %v2262_v1 = vmul.f32 0.3275911, %v2258_v39  ;;  %v2366_v36 = vsub.f32 0.0, %v2258_v39 }
 0x903   : > { %v4531_v37 = vpop.eup %4530  ;;  %v2266_v23 = vadd.f32 1.0, %v2262_v1  ;;  %v2370_v62 = vmul.f32 %v2366_v36, %v2258_v39 }
 0x904   : > { %v2298_v16 = vmul.f32 %v4531_v37, %v2265_v47  ;;  %vm2303_vm14 = vweird.f32 %v4531_v37 }
 0x905   : > { %4532 = vrcp.f32 %v2266_v23  ;;  %vm2304_vm4 = vmor %vm2302_vm3, %vm2303_vm14  ;;  %v2323_v13 = vand.u32 2147483648, %v2266_v23  ;;  %v2321_v22 = vand.u32 2147483647, %v2266_v23  ;;  %vm2317_vm7 = vweird.f32 %v2266_v23 }
 0x906   : > { %v2299_v46 = vsub.f32 1.0, %v2298_v16  ;;  %4534 = vpow2.f32 %v2375_v0  ;;  %v2377_v43 = vmul.f32 1.442695, %v2370_v62  ;;  %v2249_v16 = vmul.f32 0.5, %v5782_v41 }
 0x907   : > { %v2324_v28 = vor.u32 1.1754944e-38, %v2323_v13  ;;  %vm2322_vm9 = vcmp.eq.f32.partialorder %v2321_v22, 8.507059e+37 }
 0x908   : > { %v2300_v10 = vmul.f32 %v4531_v37, %v2299_v46  ;;  %4536 = vpow2.f32 %v2377_v43 }
 0x90a   : > { %v2301_v21 = vadd.f32 %v4531_v37, %v2300_v10 }
 0x90b   : > { %v4533_v6 = vpop.eup %4532 }
 0x90c   : > { %v2305_v8 = vsel %vm2304_vm4, %v4531_v37, %v2301_v21  ;;  %v2313_v20 = vmul.f32 %v4533_v6, %v2266_v23  ;;  %vm2318_vm5 = vweird.f32 %v4533_v6  ;;  %v4535_v27 = vpop.eup %4534  ;;  %v2250_v23 = vmul.f32 0.5, %v5789_v25  ;;  %v4432_v21 = vld [vmem:[%s4972_s26] ss:$0 sm:$0xff] }
 0x90d   : > { %v2310_v31 = vsel %vm2307_vm6, %v2309_v24, %v2305_v8  ;;  %vm2319_vm8 = vmor %vm2317_vm7, %vm2318_vm5 }
 0x90e   : > { %v2329_v11 = vmul.f32 1.0614054, %v2310_v31  ;;  %v2314_v19 = vsub.f32 1.0, %v2313_v20  ;;  %v4537_v57 = vpop.eup %4536 }
 0x910   : > { %v2333_v52 = vadd.f32 -1.4531521, %v2329_v11  ;;  %v2315_v2 = vmul.f32 %v4533_v6, %v2314_v19 }
 0x912   : > { %v2337_v14 = vmul.f32 %v2333_v52, %v2310_v31  ;;  %v2316_v54 = vadd.f32 %v4533_v6, %v2315_v2 }
 0x914   : > { %v2341_v7 = vadd.f32 1.4214138, %v2337_v14  ;;  %v2320_v35 = vsel %vm2319_vm8, %v4533_v6, %v2316_v54 }
 0x915   : > { %v2325_v63 = vsel %vm2322_vm9, %v2324_v28, %v2320_v35 }
 0x916   : > { %v2345_v32 = vmul.f32 %v2341_v7, %v2310_v31  ;;  %v2330_v51 = vmul.f32 1.0614054, %v2325_v63 }
 0x918   : > { %v2349_v5 = vadd.f32 -0.28449672, %v2345_v32  ;;  %v2334_v53 = vadd.f32 -1.4531521, %v2330_v51 }
 0x91a   : > { %v2353_v48 = vmul.f32 %v2349_v5, %v2310_v31  ;;  %v2338_v49 = vmul.f32 %v2334_v53, %v2325_v63  ;;  %v4244_v5 = vld [vmem:[%s5087_s14 + $0x30] sm:$0xff] }
 0x91c   : > { %v2357_v56 = vadd.f32 0.2548296, %v2353_v48  ;;  %v2342_v45 = vadd.f32 1.4214138, %v2338_v49  ;;  %v4242_v49 = vld [vmem:[%s5087_s14 + $0x20] sm:$0xff] }
 0x91e   : > { %v2361_v17 = vmul.f32 %v2357_v56, %v2310_v31  ;;  %v2346_v44 = vmul.f32 %v2342_v45, %v2325_v63  ;;  %v4243_v56 = vld [vmem:[%s5087_s14 + $0x28] sm:$0xff] }
 0x91f   : > { %v2648_v45 = vpack.c.bf16 %v4243_v56, %v4242_v49  ;;  %v4235_v56 = vld [vmem:[%s5126_s27 + $0x20] sm:$0xff] }
 0x920   : > { %v2381_v59 = vmul.f32 %v4535_v27, %v2361_v17  ;;  %v2350_v40 = vadd.f32 -0.28449672, %v2346_v44 }
 0x922   : > { %v2385_v61 = vsub.f32 1.0, %v2381_v59  ;;  %v2354_v33 = vmul.f32 %v2350_v40, %v2325_v63 }
 0x924   : > { %v2358_v60 = vadd.f32 0.2548296, %v2354_v33  ;;  %v2393_v3 = vsub.f32 0.0, %v2385_v61 }
 0x926   : > { %v2362_v15 = vmul.f32 %v2358_v60, %v2325_v63  ;;  %v2397_v26 = vsel %vm2389_vm10, %v2385_v61, %v2393_v3 }
 0x927   : > { %v2401_v1 = vadd.f32 1.0, %v2397_v26 }
 0x928   : > { %v2382_v38 = vmul.f32 %v4537_v57, %v2362_v15 }
 0x929   : > { %v2405_v55 = vmul.f32 %v2401_v1, %v2249_v16 }
 0x92a   : > { %v2386_v47 = vsub.f32 1.0, %v2382_v38 }
 0x92c   : > { %v2394_v39 = vsub.f32 0.0, %v2386_v47 }
 0x92e   : > { %v2398_v37 = vsel %vm2390_vm11, %v2386_v47, %v2394_v39 }
 0x92f   : > { %v2402_v46 = vadd.f32 1.0, %v2398_v37 }
 0x931   : > { %v2406_v10 = vmul.f32 %v2402_v46, %v2250_v23 }
 0x933   : > { %v2416_v42 = vpack.c.bf16 %v2406_v10, %v2405_v55  ;;  %v4424_v10 = vld [vmem:[%s5036_s3 + $0x1] ss:$0 sm:$0xff]  ;;  %s6474_s3 = smov 80  }
 0x935   : > { %4230 = vmatmul.msk.bf16.gmra.mxu2 %vm2421_vm13, %v2416_v42 }
 0x93d   : > { %v2437_v24 = vpop.f32.mrf.mxu2 }
 0x93e   : > { %v2447_v50 = vadd.f32 %v2437_v24, %v5669_v58 }
 0x940   : > { %v5802_v6 = vadd.f32 %v4432_v21, %v2447_v50  ;;  %v4425_v50 = vld [vmem:[%s5045_s9 + $0x1] ss:$0 sm:$0xff]  ;;  %s6478_s9 = smov 16  }
 0x942   : > { %v2463_v18 = vsel %vm1023_vm2, %v5802_v6, 0.0 }
 0x943   : > { %2464 = vadd.xlane.f32.xlu2 %v2463_v18 }
 0x945   : > { %v2439_v8 = vpop.f32.mrf.mxu2 }
 0x946   : > { %v2448_v41 = vadd.f32 %v2439_v8, %v5674_v34 }
 0x948   : > { %v5807_v25 = vadd.f32 %v4432_v21, %v2448_v41 }
 0x94a   : > { %v2466_v31 = vsel %vm1023_vm2, %v5807_v25, 0.0 }
 0x94b   : > { %2467 = vadd.xlane.f32.xlu1 %v2466_v31 }
 0x9b6   : > { %v2465_v9 = vpop.xlane.xlu2 %2464 }
 0x9b7   : > { %v2475_v20 = vmul.f32 %v2465_v9, %v5012_v29 }
 0x9b8   : > { %v2442_v11 = vpop.f32.mrf.mxu2 }
 0x9b9   : > { %v5813_v58 = vsub.f32 %v5802_v6, %v2475_v20  ;;  %v2449_v19 = vadd.f32 %v2442_v11, %v5691_v12 }
 0x9bb   : > { %v5816_v52 = vadd.f32 %v4432_v21, %v2449_v19  ;;  %v2483_v34 = vmul.f32 %v5813_v58, %v5813_v58 }
 0x9bd   : > { %v2469_v13 = vsel %vm1023_vm2, %v5816_v52, 0.0  ;;  %v2487_v30 = vsel %vm1023_vm2, %v2483_v34, 0.0 }
 0x9be   : > { %v2468_v2 = vpop.xlane.xlu1 %2467  ;;  %2470 = vadd.xlane.f32.xlu1 %v2469_v13  ;;  %2488 = vadd.xlane.f32.xlu0 %v2487_v30 }
 0x9bf   : > { %v2476_v22 = vmul.f32 %v2468_v2, %v5012_v29 }
 0x9c0   : > { %v2444_v14 = vpop.f32.mrf.mxu2 }
 0x9c1   : > { %v2480_v12 = vsub.f32 %v5807_v25, %v2476_v22  ;;  %v2450_v54 = vadd.f32 %v2444_v14, %v5700_v4  ;;  %v4245_v4 = vld [vmem:[%s5087_s14 + $0x38] sm:$0xff]  ;;  %s6479_s14 = smov 24  }
 0x9c2   : > { %v2649_v53 = vpack.c.bf16 %v4245_v4, %v4244_v5  ;;  %v4238_v5 = vld [vmem:[%s5126_s27 + $0x38] sm:$0xff] }
 0x9c3   : > { %v5826_v7 = vadd.f32 %v4432_v21, %v2450_v54  ;;  %v2484_v28 = vmul.f32 %v2480_v12, %v2480_v12 }
 0x9c4   : > { %2661 = vmatpush.bf16.msra.mxu1 %v2649_v53 }
 0x9c5   : > { %v2490_v0 = vsel %vm1023_vm2, %v2484_v28, 0.0  ;;  %v2472_v35 = vsel %vm1023_vm2, %v5826_v7, 0.0 }
 0x9c6   : > { %2491 = vadd.xlane.f32.xlu2 %v2490_v0  ;;  %2473 = vadd.xlane.f32.xlu0 %v2472_v35 }
 0x9c8   : > { %2662 = vmatpush.bf16.msra.mxu1 %v2648_v45  ;;  %v4236_v45 = vld [vmem:[%s5126_s27 + $0x28] sm:$0xff] }
 0xa31   : > { %v2471_v32 = vpop.xlane.xlu1 %2470  ;;  %v2489_v63 = vpop.xlane.xlu0 %2488 }
 0xa32   : > { %v2477_v36 = vmul.f32 %v2471_v32, %v5012_v29  ;;  %v2499_v51 = vmul.f32 %v2489_v63, %v5012_v29 }
 0xa34   : > { %v5836_v48 = vsub.f32 %v5816_v52, %v2477_v36  ;;  %v2503_v62 = vadd.f32 1e-05, %v2499_v51  ;;  %v4237_v51 = vld [vmem:[%s5126_s27 + $0x30] sm:$0xff] }
 0xa35   : > { %v2612_v4 = vpack.c.bf16 %v4238_v5, %v4237_v51 }
 0xa36   : > { %4538 = vrsqrt.f32 %v2503_v62  ;;  %v2485_v17 = vmul.f32 %v5836_v48, %v5836_v48  ;;  %vm2513_vm14 = vweird.f32 %v2503_v62 }
 0xa37   : > { %2630 = vmatpush.bf16.msra.mxu0 %v2612_v4 }
 0xa38   : > { %v2493_v43 = vsel %vm1023_vm2, %v2485_v17, 0.0  ;;  %v2611_v17 = vpack.c.bf16 %v4236_v45, %v4235_v56 }
 0xa39   : > { %2494 = vadd.xlane.f32.xlu2 %v2493_v43  ;;  %v2474_v27 = vpop.xlane.xlu0 %2473  ;;  %v2492_v44 = vpop.xlane.xlu2 %2491 }
 0xa3a   : > { %v2478_v59 = vmul.f32 %v2474_v27, %v5012_v29  ;;  %v2500_v40 = vmul.f32 %v2492_v44, %v5012_v29 }
 0xa3b   : > { %2631 = vmatpush.bf16.msra.mxu0 %v2611_v17 }
 0xa3c   : > { %v4539_v61 = vpop.eup %4538  ;;  %v5846_v33 = vsub.f32 %v5826_v7, %v2478_v59  ;;  %v2504_v60 = vadd.f32 1e-05, %v2500_v40 }
 0xa3d   : > { %v2508_v3 = vmul.f32 %v4539_v61, %v2503_v62  ;;  %vm2514_vm12 = vweird.f32 %v4539_v61 }
 0xa3e   : > { %4540 = vrsqrt.f32 %v2504_v60  ;;  %v2486_v15 = vmul.f32 %v5846_v33, %v5846_v33  ;;  %vm2515_vm3 = vmor %vm2513_vm14, %vm2514_vm12  ;;  %vm2523_vm6 = vweird.f32 %v2504_v60 }
 0xa3f   : > { %v2509_v57 = vmul.f32 %v4539_v61, %v2508_v3  ;;  %v5870_v3 = vld [vmem:[%s5113_s30 + $0x1] ss:$0 sm:$0xff] }
 0xa40   : > { %v2496_v38 = vsel %vm1023_vm2, %v2486_v15, 0.0 }
 0xa41   : > { %v2510_v26 = vmul.f32 0.5, %v2509_v57  ;;  %2497 = vadd.xlane.f32.xlu1 %v2496_v38 }
 0xa43   : > { %v2511_v47 = vsub.f32 1.5, %v2510_v26 }
 0xa44   : > { %v4541_v39 = vpop.eup %4540 }
 0xa45   : > { %v2512_v1 = vmul.f32 %v4539_v61, %v2511_v47  ;;  %v2518_v37 = vmul.f32 %v4541_v39, %v2504_v60  ;;  %vm2524_vm4 = vweird.f32 %v4541_v39  ;;  %v4634_v47 = vld [vmem:[%s6431_s8] sm:$0xff] }
 0xa46   : > { %vm2525_vm5 = vmor %vm2523_vm6, %vm2524_vm4 }
 0xa47   : > { %v2519_v16 = vmul.f32 %v4541_v39, %v2518_v37  ;;  %v2516_v23 = vsel %vm2515_vm3, %v4539_v61, %v2512_v1  ;;  %v4635_v37 = vld [vmem:[%s6432_s20] sm:$0xff] }
 0xa48   : > { %v2547_v42 = vmul.f32 %v2516_v23, %v5813_v58  ;;  %v4636_v23 = vld [vmem:[%s6432_s20 + $0x8] sm:$0xff] }
 0xa49   : > { %v2520_v46 = vmul.f32 0.5, %v2519_v16 }
 0xa4a   : > { %v2554_v18 = vmul.f32 %v4424_v10, %v2547_v42 }
 0xa4b   : > { %v2521_v55 = vsub.f32 1.5, %v2520_v46 }
 0xa4c   : > { %v2561_v31 = vadd.f32 %v4425_v50, %v2554_v18  ;;  %v4638_v18 = vld [vmem:[%s6431_s8 + $0x10] sm:$0xff] }
 0xa4d   : > { %v2522_v21 = vmul.f32 %v4541_v39, %v2521_v55  ;;  %v4637_v55 = vld [vmem:[%s6431_s8 + $0x8] sm:$0xff] }
 0xa4e   : > { %v2565_v16 = vmul.f32 %v4635_v37, %v2561_v31 }
 0xa4f   : > { %v2526_v24 = vsel %vm2525_vm5, %v4541_v39, %v2522_v21 }
 0xa50   : > { %v2548_v8 = vmul.f32 %v2526_v24, %v2480_v12 }
 0xa52   : > { %v2555_v41 = vmul.f32 %v4424_v10, %v2548_v8 }
 0xa54   : > { %v5854_v9 = vadd.f32 %v4425_v50, %v2555_v41 }
 0xa56   : > { %v2569_v20 = vpack.c.bf16 %v5854_v9, %v2561_v31  ;;  %v2566_v46 = vmul.f32 %v4636_v23, %v5854_v9  ;;  %v4639_v31 = vld [vmem:[%s6432_s20 + $0x10] sm:$0xff] }
 0xa58   : > { %4233 = vmatmul.msk.bf16.vlgmr.msra.gmra.mxu3 %vm1023_vm2, %v2569_v20  ;;  %4247 = vmatmul.msk.bf16.vlgmr.msra.gmra.mxu1 %vm1023_vm2, %v2569_v20  ;;  %v4640_v20 = vld [vmem:[%s6432_s20 + $0x18] sm:$0xff] }
 0xaac   : > { %v2495_v11 = vpop.xlane.xlu2 %2494 }
 0xaad   : > { %v2501_v58 = vmul.f32 %v2495_v11, %v5012_v29 }
 0xaaf   : > { %v2505_v19 = vadd.f32 1e-05, %v2501_v58  ;;  %v4641_v58 = vld [vmem:[%s6431_s8 + $0x18] sm:$0xff] }
 0xab1   : > { %4542 = vrsqrt.f32 %v2505_v19  ;;  %vm2533_vm8 = vweird.f32 %v2505_v19 }
 0xab4   : > { %v2498_v34 = vpop.xlane.xlu1 %2497 }
 0xab5   : > { %v2502_v13 = vmul.f32 %v2498_v34, %v5012_v29 }
 0xab7   : > { %v4543_v30 = vpop.eup %4542  ;;  %v2506_v2 = vadd.f32 1e-05, %v2502_v13 }
 0xab8   : > { %v2528_v22 = vmul.f32 %v4543_v30, %v2505_v19  ;;  %vm2534_vm7 = vweird.f32 %v4543_v30 }
 0xab9   : > { %4544 = vrsqrt.f32 %v2506_v2  ;;  %vm2535_vm9 = vmor %vm2533_vm8, %vm2534_vm7  ;;  %vm2543_vm11 = vweird.f32 %v2506_v2 }
 0xaba   : > { %v2529_v14 = vmul.f32 %v4543_v30, %v2528_v22  ;;  %v4434_v22 = vld [vmem:[%s5120_s4 + $0x1] ss:$0 sm:$0xff]  ;;  %s6477_s4 = smov 8  }
 0xabc   : > { %v2530_v12 = vmul.f32 0.5, %v2529_v14 }
 0xabe   : > { %v2531_v54 = vsub.f32 1.5, %v2530_v12 }
 0xabf   : > { %v4545_v28 = vpop.eup %4544 }
 0xac0   : > { %v2532_v0 = vmul.f32 %v4543_v30, %v2531_v54  ;;  %v2538_v35 = vmul.f32 %v4545_v28, %v2506_v2  ;;  %vm2544_vm10 = vweird.f32 %v4545_v28 }
 0xac1   : > { %vm2545_vm12 = vmor %vm2543_vm11, %vm2544_vm10 }
 0xac2   : > { %v2539_v32 = vmul.f32 %v4545_v28, %v2538_v35  ;;  %v2536_v63 = vsel %vm2535_vm9, %v4543_v30, %v2532_v0 }
 0xac3   : > { %v2549_v62 = vmul.f32 %v2536_v63, %v5836_v48 }
 0xac4   : > { %v2540_v36 = vmul.f32 0.5, %v2539_v32 }
 0xac5   : > { %v2556_v44 = vmul.f32 %v4424_v10, %v2549_v62 }
 0xac6   : > { %v2541_v53 = vsub.f32 1.5, %v2540_v36 }
 0xac7   : > { %v2563_v40 = vadd.f32 %v4425_v50, %v2556_v44 }
 0xac8   : > { %v2542_v49 = vmul.f32 %v4545_v28, %v2541_v53 }
 0xac9   : > { %v2567_v9 = vmul.f32 %v4639_v31, %v2563_v40 }
 0xaca   : > { %v2546_v43 = vsel %vm2545_vm12, %v4545_v28, %v2542_v49 }
 0xacb   : > { %v2550_v27 = vmul.f32 %v2546_v43, %v5846_v33 }
 0xacd   : > { %v2557_v59 = vmul.f32 %v4424_v10, %v2550_v27 }
 0xacf   : > { %v2564_v61 = vadd.f32 %v4425_v50, %v2557_v59 }
 0xad1   : > { %v2570_v60 = vpack.c.bf16 %v2564_v61, %v2563_v40  ;;  %v2568_v11 = vmul.f32 %v4640_v20, %v2564_v61 }
 0xad3   : > { %4234 = vmatmul.msk.bf16.gmra.mxu3 %vm1023_vm2, %v2570_v60  ;;  %4248 = vmatmul.msk.bf16.gmra.mxu1 %vm1023_vm2, %v2570_v60 }
 0xad5   : > { %v2664_v48 = vpop.f32.mrf.mxu1 }
 0xad6   : > { %v2665_v38 = vadd.f32 %v5870_v3, %v2664_v48 }
 0xadb   : > { %v2586_v15 = vpop.f32.mrf.mxu3 }
 0xadc   : > { %v2596_v39 = vmul.f32 %v4634_v47, %v2586_v15 }
 0xadd   : > { %v2666_v57 = vpop.f32.mrf.mxu1 }
 0xade   : > { %v2667_v26 = vadd.f32 %v5870_v3, %v2666_v57  ;;  %v2600_v42 = vadd.f32 %v2596_v39, %v2565_v16 }
 0xae0   : > { %v5874_v33 = vpack.c.bf16 %v2667_v26, %v2665_v38 }
 0xae2   : > { %2760 = vmatpush.bf16.msrb.mxu3 %v5874_v33 }
 0xae3   : > { %v2588_v1 = vpop.f32.mrf.mxu3 }
 0xae4   : > { %v2597_v10 = vmul.f32 %v4637_v55, %v2588_v1 }
 0xae6   : > { %v2601_v21 = vadd.f32 %v2597_v10, %v2566_v46 }
 0xae8   : > { %v2609_v24 = vpack.c.bf16 %v2601_v21, %v2600_v42 }
 0xaea   : > { %4240 = vmatmul.msk.bf16.vlgmr.msra.gmra.mxu0 %vm1023_vm2, %v2609_v24 }
 0xb56   : > { %v2591_v50 = vpop.f32.mrf.mxu3 }
 0xb57   : > { %v2598_v8 = vmul.f32 %v4638_v18, %v2591_v50 }
 0xb59   : > { %v2602_v34 = vadd.f32 %v2598_v8, %v2567_v9 }
 0xb5e   : > { %v2593_v41 = vpop.f32.mrf.mxu3 }
 0xb5f   : > { %v2599_v19 = vmul.f32 %v4641_v58, %v2593_v41 }
 0xb61   : > { %v2603_v13 = vadd.f32 %v2599_v19, %v2568_v11 }
 0xb63   : > { %v2610_v30 = vpack.c.bf16 %v2603_v13, %v2602_v34 }
 0xb65   : > { %4241 = vmatmul.msk.bf16.gmra.mxu0 %vm1023_vm2, %v2610_v30 }
 0xb67   : > { %v2633_v2 = vpop.f32.mrf.mxu0 }
 0xb68   : > { %v2634_v12 = vadd.f32 %v4434_v22, %v2633_v2 }
 0xb6f   : > { %v2635_v14 = vpop.f32.mrf.mxu0 }
 0xb70   : > { %v2636_v54 = vadd.f32 %v4434_v22, %v2635_v14 }
 0xb72   : > { %v2674_v28 = vpack.c.bf16 %v2636_v54, %v2634_v12 }
 0xb74   : > { %2767 = vrot.lane.b32.xlu1 %v2674_v28, %s6468_s1  ;;  %2769 = vrot.lane.b32.xlu2 %v2674_v28, %s6469_s24 }
 0xb75   : > { %2676 = vrot.lane.b32.xlu0 %v2674_v28, %s6470_s21 }
 0xb7c   : > { %2958 = vrot.lane.b32.xlu2 %v2674_v28, %s6471_s29 }
 0xb7d   : > { %2960 = vrot.lane.b32.xlu0 %v2674_v28, %s6472_s23 }
 0xb84   : > { %2863 = vrot.lane.b32.xlu2 %v2674_v28, %s6473_s0 }
 0xb85   : > { %2865 = vrot.lane.b32.xlu0 %v2674_v28, %s6474_s3 }
 0xbce   : > { %v2770_v35 = vpop.permute.xlu2 %2769 }
 0xbcf   : > { %v2775_v36 = vsel %vm1244_vm0, %v2770_v35, 0 }
 0xbd6   : > { %v2959_v56 = vpop.permute.xlu2 %2958 }
 0xbde   : > { %v2864_v27 = vpop.permute.xlu2 %2863 }
 0xbe2   : > { %v2638_v0 = vpop.f32.mrf.mxu0 }
 0xbe3   : > { %v2639_v5 = vadd.f32 %v4434_v22, %v2638_v0 }
 0xbe6   : > { %v2768_v43 = vpop.permute.xlu1 %2767 }
 0xbe7   : > { %v2677_v32 = vpop.permute.xlu0 %2676 }
 0xbe8   : > { %v2682_v63 = vsel %vm1244_vm0, %v2677_v32, 0 }
 0xbe9   : > { %2691 = vmatpush.bf16.xpose.msra.mxu2 %v2682_v63 }
 0xbea   : > { %v2640_v51 = vpop.f32.mrf.mxu0 }
 0xbeb   : > { %v2641_v4 = vadd.f32 %v4434_v22, %v2640_v51 }
 0xbed   : > { %v3083_v53 = vpack.c.bf16 %v2641_v4, %v2639_v5 }
 0xbef   : > { %v2961_v62 = vpop.permute.xlu0 %2960  ;;  %3369 = vrot.lane.b32.xlu2 %v3083_v53, %s6472_s23  ;;  %3176 = vrot.lane.b32.xlu0 %v3083_v53, %s6468_s1 }
 0xbf0   : > { %v2966_v49 = vsel %vm1244_vm0, %v2961_v62, 0  ;;  %4249 = vmatmul.msk.bf16.vlgmr.msra.gmra.mxu2 %vm1244_vm0, %v2674_v28  ;;  %3178 = vrot.lane.b32.xlu1 %v3083_v53, %s6469_s24 }
 0xbf1   : > { %2784 = vmatpush.bf16.xpose.msrb.mxu2 %v2775_v36 }
 0xbf7   : > { %v2866_v45 = vpop.permute.xlu0 %2865  ;;  %3272 = vrot.lane.b32.xlu2 %v3083_v53, %s6473_s0  ;;  %3367 = vrot.lane.b32.xlu0 %v3083_v53, %s6471_s29 }
 0xbf8   : > { %v2871_v17 = vsel %vm1244_vm0, %v2866_v45, 0  ;;  %3085 = vrot.lane.b32.xlu1 %v3083_v53, %s6470_s21 }
 0xbf9   : > { %2975 = vmatpush.bf16.xpose.msra.mxu2 %v2966_v49  ;;  %2880 = vmatpush.bf16.xpose.msrb.mxu0 %v2871_v17 }
 0xc00   : > { %3274 = vrot.lane.b32.xlu1 %v3083_v53, %s6474_s3  ;;  %4251 = vmatmul.msk.bf16.vlgmr.msrb.gmra.mxu2 %vm1244_vm0, %v2768_v43 }
 0xc01   : > { %4253 = vmatmul.msk.bf16.vlgmr.msrb.gmra.mxu0 %vm1244_vm0, %v2864_v27 }
 0xc08   : > { %2843 = vrot.lane.b32.xlu1 %v5874_v33, %s6468_s1 }
 0xc10   : > { %4255 = vmatmul.msk.bf16.vlgmr.msra.gmra.mxu2 %vm1244_vm0, %v2959_v56 }
 0xc49   : > { %v3370_v44 = vpop.permute.xlu2 %3369 }
 0xc4a   : > { %v3375_v61 = vsel %vm1244_vm0, %v3370_v44, 0 }
 0xc51   : > { %v3273_v46 = vpop.permute.xlu2 %3272 }
 0xc61   : > { %v3177_v60 = vpop.permute.xlu0 %3176 }
 0xc62   : > { %v3179_v59 = vpop.permute.xlu1 %3178 }
 0xc63   : > { %v3184_v40 = vsel %vm1244_vm0, %v3179_v59, 0 }
 0xc64   : > { %3193 = vmatpush.bf16.xpose.msrb.mxu2 %v3184_v40 }
 0xc69   : > { %v3368_v47 = vpop.permute.xlu0 %3367 }
 0xc6a   : > { %v3086_v48 = vpop.permute.xlu1 %3085 }
 0xc6b   : > { %v3091_v15 = vsel %vm1244_vm0, %v3086_v48, 0  ;;  %4259 = vmatmul.msk.bf16.vlgmr.msrb.gmra.mxu2 %vm1244_vm0, %v3177_v60 }
 0xc6c   : > { %3384 = vmatpush.bf16.xpose.msra.mxu2 %v3375_v61  ;;  %3100 = vmatpush.bf16.xpose.msra.mxu0 %v3091_v15 }
 0xc72   : > { %v3275_v57 = vpop.permute.xlu1 %3274 }
 0xc73   : > { %v3280_v38 = vsel %vm1244_vm0, %v3275_v57, 0  ;;  %v2693_v26 = vpop.f32.mrf.mxu2  ;;  %4257 = vmatmul.msk.bf16.vlgmr.msra.gmra.mxu0 %vm1244_vm0, %v3083_v53 }
 0xc74   : > { %3289 = vmatpush.bf16.xpose.msrb.mxu0 %v3280_v38  ;;  %v2698_v42 = vmul.f32 0.35355338, %v2693_v26 }
 0xc76   : > { %v2700_v18 = vsel %vm1267_vm1, %v2698_v42, -inf }
 0xc7a   : > { %v2844_v39 = vpop.permute.xlu1 %2843 }
 0xc7b   : > { %v2695_v1 = vpop.f32.mrf.mxu2  ;;  %2856 = vmatpush.bf16.msra.mxu3 %v2844_v39  ;;  %4263 = vmatmul.msk.bf16.vlgmr.msra.gmra.mxu2 %vm1244_vm0, %v3368_v47 }
 0xc7c   : > { %v2699_v31 = vmul.f32 0.35355338, %v2695_v1 }
 0xc7e   : > { %v2882_v37 = vpop.f32.mrf.mxu0  ;;  %v2703_v11 = vsel %vm1267_vm1, %v2699_v31, -inf }
 0xc7f   : > { %v2887_v16 = vmul.f32 0.35355338, %v2882_v37 }
 0xc81   : > { %v2889_v23 = vsel %vm1267_vm1, %v2887_v16, -inf }
 0xc82   : > { %2890 = vmax.xlane.f32.xlu0 %v2889_v23 }
 0xc83   : > { %v2786_v55 = vpop.f32.mrf.mxu2  ;;  %4261 = vmatmul.msk.bf16.vlgmr.msrb.gmra.mxu0 %vm1244_vm0, %v3273_v46 }
 0xc84   : > { %v5938_v10 = vmul.f32 0.35355338, %v2786_v55 }
 0xc86   : > { %v2884_v21 = vpop.f32.mrf.mxu0  ;;  %v2793_v24 = vsel %vm1267_vm1, %v5938_v10, -inf }
 0xc87   : > { %v5942_v50 = vmul.f32 0.35355338, %v2884_v21  ;;  %2794 = vmax.xlane.f32.xlu2 %v2793_v24 }
 0xc89   : > { %v2892_v8 = vsel %vm1267_vm1, %v5942_v50, -inf }
 0xc8a   : > { %2701 = vmax.xlane.f32.xlu0 %v2700_v18  ;;  %2893 = vmax.xlane.f32.xlu1 %v2892_v8 }
 0xc8b   : > { %v2788_v41 = vpop.f32.mrf.mxu2 }
 0xc8c   : > { %v5947_v9 = vmul.f32 0.35355338, %v2788_v41 }
 0xc8e   : > { %v2796_v20 = vsel %vm1267_vm1, %v5947_v9, -inf }
 0xc92   : > { %2797 = vmax.xlane.f32.xlu0 %v2796_v20  ;;  %2704 = vmax.xlane.f32.xlu1 %v2703_v11 }
 0xc93   : > { %v2977_v58 = vpop.f32.mrf.mxu2 }
 0xc94   : > { %v5952_v19 = vmul.f32 0.35355338, %v2977_v58 }
 0xc96   : > { %v2984_v34 = vsel %vm1267_vm1, %v5952_v19, -inf }
 0xc9a   : > { %2985 = vmax.xlane.f32.xlu1 %v2984_v34 }
 0xc9b   : > { %v2979_v13 = vpop.f32.mrf.mxu2 }
 0xc9c   : > { %v5956_v30 = vmul.f32 0.35355338, %v2979_v13 }
 0xc9e   : > { %v2987_v2 = vsel %vm1267_vm1, %v5956_v30, -inf }
 0xc9f   : > { %2988 = vmax.xlane.f32.xlu2 %v2987_v2 }
 0xcee   : > { %v3195_v22 = vpop.f32.mrf.mxu2 }
 0xcef   : > { %v5960_v14 = vmul.f32 0.35355338, %v3195_v22 }
 0xcf0   : > { %v3102_v12 = vpop.f32.mrf.mxu0 }
 0xcf1   : > { %v5962_v54 = vmul.f32 0.35355338, %v3102_v12  ;;  %v3202_v28 = vsel %vm1267_vm1, %v5960_v14, -inf }
 0xcf2   : > { %3203 = vmax.xlane.f32.xlu2 %v3202_v28  ;;  %v2669_v28 = vpop.f32.mrf.mxu1 }
 0xcf3   : > { %v3109_v0 = vsel %vm1267_vm1, %v5962_v54, -inf }
 0xcf4   : > { %3110 = vmax.xlane.f32.xlu0 %v3109_v0 }
 0xcf5   : > { %v2891_v35 = vpop.xlane.xlu0 %2890 }
 0xcf6   : > { %v3197_v32 = vpop.f32.mrf.mxu2  ;;  %v2895_v63 = vsub.f32 %v2887_v16, %v2891_v35 }
 0xcf7   : > { %v5982_v57 = vmul.f32 0.35355338, %v3197_v32 }
 0xcf8   : > { %v3104_v36 = vpop.f32.mrf.mxu0  ;;  %v2897_v4 = vmul.f32 1.442695, %v2895_v63  ;;  %v2670_v63 = vadd.f32 %v5870_v3, %v2669_v28 }
 0xcf9   : > { %v5968_v51 = vmul.f32 0.35355338, %v3104_v36  ;;  %v3205_v23 = vsel %vm1267_vm1, %v5982_v57, -inf }
 0xcfa   : > { %4546 = vpow2.f32 %v2897_v4  ;;  %v2795_v59 = vpop.xlane.xlu2 %2794  ;;  %v2671_v35 = vpop.f32.mrf.mxu1 }
 0xcfb   : > { %v3112_v5 = vsel %vm1267_vm1, %v5968_v51, -inf  ;;  %v2799_v38 = vsub.f32 %v5938_v10, %v2795_v59  ;;  %v2672_v32 = vadd.f32 %v5870_v3, %v2671_v35 }
 0xcfc   : > { %3113 = vmax.xlane.f32.xlu1 %v3112_v5 }
 0xcfd   : > { %v2702_v53 = vpop.xlane.xlu0 %2701  ;;  %v2894_v62 = vpop.xlane.xlu1 %2893  ;;  %v2801_v55 = vmul.f32 1.442695, %v2799_v38  ;;  %v6026_v36 = vpack.c.bf16 %v2672_v32, %v2670_v63 }
 0xcfe   : > { %v3386_v49 = vpop.f32.mrf.mxu2  ;;  %v2706_v27 = vsub.f32 %v2698_v42, %v2702_v53  ;;  %v2896_v16 = vsub.f32 %v5942_v50, %v2894_v62 }
 0xcff   : > { %v5972_v56 = vmul.f32 0.35355338, %v3386_v49 }
 0xd00   : > { %v3291_v45 = vpop.f32.mrf.mxu0  ;;  %v5980_v61 = vpop.eup %4546  ;;  %v2708_v60 = vmul.f32 1.442695, %v2706_v27  ;;  %v2899_v21 = vmul.f32 1.442695, %v2896_v16 }
 0xd01   : > { %v5974_v17 = vmul.f32 0.35355338, %v3291_v45  ;;  %v3393_v43 = vsel %vm1267_vm1, %v5972_v56, -inf  ;;  %v2901_v37 = vsel %vm1267_vm1, %v5980_v61, 0.0 }
 0xd02   : > { %3394 = vmax.xlane.f32.xlu2 %v3393_v43  ;;  %4548 = vpow2.f32 %v2708_v60 }
 0xd03   : > { %v3298_v44 = vsel %vm1267_vm1, %v5974_v17, -inf }
 0xd04   : > { %3299 = vmax.xlane.f32.xlu0 %v3298_v44 }
 0xd05   : > { %v2705_v40 = vpop.xlane.xlu1 %2704  ;;  %v2798_v48 = vpop.xlane.xlu0 %2797 }
 0xd06   : > { %v2707_v15 = vsub.f32 %v2699_v31, %v2705_v40  ;;  %v2800_v39 = vsub.f32 %v5947_v9, %v2798_v48  ;;  %v3388_v10 = vpop.f32.mrf.mxu2 }
 0xd07   : > { %v5995_v18 = vmul.f32 0.35355338, %v3388_v10 }
 0xd08   : > { %v2710_v26 = vmul.f32 1.442695, %v2707_v15  ;;  %v3293_v47 = vpop.f32.mrf.mxu0  ;;  %v2803_v42 = vmul.f32 1.442695, %v2800_v39  ;;  %v5997_v8 = vpop.eup %4548 }
 0xd09   : > { %v5986_v1 = vmul.f32 0.35355338, %v3293_v47  ;;  %v3396_v9 = vsel %vm1267_vm1, %v5995_v18, -inf  ;;  %v2712_v20 = vsel %vm1267_vm1, %v5997_v8, 0.0 }
 0xd0a   : > { %2902 = vadd.xlane.f32.xlu2 %v2901_v37  ;;  %4550 = vpow2.f32 %v2710_v26 }
 0xd0b   : > { %v3301_v46 = vsel %vm1267_vm1, %v5986_v1, -inf  ;;  %4552 = vpow2.f32 %v2801_v55 }
 0xd0c   : > { %3206 = vmax.xlane.f32.xlu0 %v3205_v23  ;;  %3302 = vmax.xlane.f32.xlu1 %v3301_v46  ;;  %4554 = vpow2.f32 %v2803_v42 }
 0xd0d   : > { %v2986_v24 = vpop.xlane.xlu1 %2985  ;;  %4556 = vpow2.f32 %v2899_v21 }
 0xd0e   : > { %v2990_v41 = vsub.f32 %v5952_v19, %v2986_v24 }
 0xd10   : > { %v5999_v50 = vpop.eup %4550  ;;  %v2992_v11 = vmul.f32 1.442695, %v2990_v41 }
 0xd11   : > { %v2715_v31 = vsel %vm1267_vm1, %v5999_v50, 0.0  ;;  %v6008_v58 = vpop.eup %4552 }
 0xd12   : > { %2716 = vadd.xlane.f32.xlu2 %v2715_v31  ;;  %v6010_v34 = vpop.eup %4554  ;;  %4558 = vpow2.f32 %v2992_v11  ;;  %v2805_v22 = vsel %vm1267_vm1, %v6008_v58, 0.0  ;;  %v6032_v5 = vpop.xlane.xlu2 %2988 }
 0xd13   : > { %v6012_v13 = vpop.eup %4556  ;;  %v2808_v19 = vsel %vm1267_vm1, %v6010_v34, 0.0 }
 0xd14   : > { %3397 = vmax.xlane.f32.xlu0 %v3396_v9  ;;  %2713 = vadd.xlane.f32.xlu1 %v2712_v20  ;;  %v2904_v2 = vsel %vm1267_vm1, %v6012_v13, 0.0 }
 0xd18   : > { %v6020_v12 = vpop.eup %4558 }
 0xd19   : > { %v2996_v0 = vsel %vm1267_vm1, %v6020_v12, 0.0 }
 0xd1a   : > { %2809 = vadd.xlane.f32.xlu2 %v2808_v19 }
 0xd1c   : > { %2905 = vadd.xlane.f32.xlu0 %v2904_v2  ;;  %2806 = vadd.xlane.f32.xlu1 %v2805_v22 }
 0xd22   : > { %2997 = vadd.xlane.f32.xlu2 %v2996_v0 }
 0xd35   : > { %3252 = vrot.lane.b32.xlu1 %v6026_v36, %s6468_s1 }
 0xd3a   : > { %3033 = vrot.lane.b32.xlu2 %v5874_v33, %s6471_s29 }
 0xd65   : > { %v3204_v4 = vpop.xlane.xlu2 %3203 }
 0xd66   : > { %v3208_v53 = vsub.f32 %v5960_v14, %v3204_v4 }
 0xd67   : > { %v3111_v62 = vpop.xlane.xlu0 %3110 }
 0xd68   : > { %v3210_v49 = vmul.f32 1.442695, %v3208_v53  ;;  %v3115_v45 = vsub.f32 %v5962_v54, %v3111_v62 }
 0xd6a   : > { %4560 = vpow2.f32 %v3210_v49  ;;  %v3117_v43 = vmul.f32 1.442695, %v3115_v45 }
 0xd6c   : > { %4562 = vpow2.f32 %v3117_v43 }
 0xd6f   : > { %v3114_v3 = vpop.xlane.xlu1 %3113 }
 0xd70   : > { %v6036_v27 = vpop.eup %4560  ;;  %v3116_v44 = vsub.f32 %v5968_v51, %v3114_v3 }
 0xd71   : > { %v3214_v59 = vsel %vm1267_vm1, %v6036_v27, 0.0 }
 0xd72   : > { %v6041_v40 = vpop.eup %4562  ;;  %v3119_v60 = vmul.f32 1.442695, %v3116_v44  ;;  %3215 = vadd.xlane.f32.xlu2 %v3214_v59 }
 0xd73   : > { %v3121_v14 = vsel %vm1267_vm1, %v6041_v40, 0.0 }
 0xd74   : > { %4564 = vpow2.f32 %v3119_v60  ;;  %3122 = vadd.xlane.f32.xlu0 %v3121_v14 }
 0xd75   : > { %v3395_v54 = vpop.xlane.xlu2 %3394 }
 0xd76   : > { %v3399_v51 = vsub.f32 %v5972_v56, %v3395_v54 }
 0xd77   : > { %v3300_v48 = vpop.xlane.xlu0 %3299 }
 0xd78   : > { %v3304_v15 = vsub.f32 %v5974_v17, %v3300_v48  ;;  %v3401_v37 = vmul.f32 1.442695, %v3399_v51 }
 0xd7a   : > { %v6046_v38 = vpop.eup %4564  ;;  %v3306_v26 = vmul.f32 1.442695, %v3304_v15 }
 0xd7b   : > { %v3124_v47 = vsel %vm1267_vm1, %v6046_v38, 0.0 }
 0xd7c   : > { %4566 = vpow2.f32 %v3306_v26  ;;  %3125 = vadd.xlane.f32.xlu1 %v3124_v47 }
 0xd7d   : > { %v6051_v39 = vpop.xlane.xlu2 %2902  ;;  %4568 = vpow2.f32 %v3401_v37 }
 0xd7f   : > { %v3303_v16 = vpop.xlane.xlu1 %3302 }
 0xd80   : > { %v3305_v46 = vsub.f32 %v5986_v1, %v3303_v16 }
 0xd82   : > { %v6053_v23 = vpop.eup %4566  ;;  %v3308_v56 = vmul.f32 1.442695, %v3305_v46 }
 0xd83   : > { %v3310_v17 = vsel %vm1267_vm1, %v6053_v23, 0.0  ;;  %v6058_v42 = vpop.eup %4568 }
 0xd84   : > { %3311 = vadd.xlane.f32.xlu2 %v3310_v17  ;;  %v3405_v21 = vsel %vm1267_vm1, %v6058_v42, 0.0 }
 0xd85   : > { %v2717_v55 = vpop.xlane.xlu2 %2716 }
 0xd86   : > { %4570 = vrcp.f32 %v2717_v55  ;;  %v2742_v2 = vand.u32 2147483647, %v2717_v55  ;;  %v2744_v22 = vand.u32 2147483648, %v2717_v55  ;;  %vm2738_vm4 = vweird.f32 %v2717_v55 }
 0xd87   : > { %v2714_v10 = vpop.xlane.xlu1 %2713 }
 0xd88   : > { %4572 = vrcp.f32 %v2714_v10  ;;  %2938 = vrot.lane.b32.xlu0 %v5874_v33, %s6473_s0  ;;  %v2727_v0 = vand.u32 2147483647, %v2714_v10  ;;  %v2729_v35 = vand.u32 2147483648, %v2714_v10  ;;  %v2745_v62 = vor.u32 1.1754944e-38, %v2744_v22 }
 0xd89   : > { %4574 = vpow2.f32 %v3308_v56  ;;  %vm2723_vm5 = vweird.f32 %v2714_v10  ;;  %vm2743_vm7 = vcmp.eq.f32.partialorder %v2742_v2, 8.507059e+37 }
 0xd8a   : > { %v2730_v43 = vor.u32 1.1754944e-38, %v2729_v35  ;;  %vm2728_vm9 = vcmp.eq.f32.partialorder %v2727_v0, 8.507059e+37 }
 0xd8c   : > { %3406 = vadd.xlane.f32.xlu2 %v3405_v21  ;;  %v4571_v1 = vpop.eup %4570  ;;  %v2991_v21 = vsub.f32 %v5956_v30, %v6032_v5 }
 0xd8d   : > { %v2734_v41 = vmul.f32 %v4571_v1, %v2717_v55  ;;  %v6064_v31 = vpop.xlane.xlu2 %2809  ;;  %vm2739_vm14 = vweird.f32 %v4571_v1 }
 0xd8e   : > { %v4573_v24 = vpop.eup %4572  ;;  %4576 = vrcp.f32 %v6064_v31  ;;  %vm2740_vm6 = vmor %vm2738_vm4, %vm2739_vm14  ;;  %vm2831_vm14 = vweird.f32 %v6064_v31  ;;  %v2994_v2 = vmul.f32 1.442695, %v2991_v21 }
 0xd8f   : > { %v2719_v9 = vmul.f32 %v4573_v24, %v2714_v10  ;;  %v6067_v20 = vpop.eup %4574  ;;  %v2735_v11 = vsub.f32 1.0, %v2734_v41  ;;  %v2807_v19 = vpop.xlane.xlu1 %2806  ;;  %vm2724_vm3 = vweird.f32 %v4573_v24 }
 0xd90   : > { %4578 = vrcp.f32 %v2807_v19  ;;  %v3313_v63 = vsel %vm1267_vm1, %v6067_v20, 0.0  ;;  %vm2725_vm8 = vmor %vm2723_vm5, %vm2724_vm3  ;;  %v2822_v17 = vand.u32 2147483648, %v2807_v19  ;;  %v2820_v10 = vand.u32 2147483647, %v2807_v19 }
 0xd91   : > { %v2720_v33 = vsub.f32 1.0, %v2719_v9  ;;  %v2736_v28 = vmul.f32 %v4571_v1, %v2735_v11  ;;  %vm2816_vm12 = vweird.f32 %v2807_v19  ;;  %v3207_v9 = vpop.xlane.xlu0 %3206  ;;  %4580 = vpow2.f32 %v2994_v2 }
 0xd92   : > { %v2823_v41 = vor.u32 1.1754944e-38, %v2822_v17 }
 0xd93   : > { %v2721_v32 = vmul.f32 %v4573_v24, %v2720_v33  ;;  %v2737_v4 = vadd.f32 %v4571_v1, %v2736_v28 }
 0xd94   : > { %3314 = vadd.xlane.f32.xlu2 %v3313_v63  ;;  %v4577_v53 = vpop.eup %4576 }
 0xd95   : > { %v2722_v49 = vadd.f32 %v4573_v24, %v2721_v32  ;;  %3347 = vrot.lane.b32.xlu1 %v6026_v36, %s6473_s0  ;;  %v2741_v45 = vsel %vm2740_vm6, %v4571_v1, %v2737_v4  ;;  %v2827_v3 = vmul.f32 %v4577_v53, %v6064_v31  ;;  %v6074_v44 = vpop.xlane.xlu2 %2997  ;;  %vm2832_vm11 = vweird.f32 %v4577_v53 }
 0xd96   : > { %v2746_v59 = vsel %vm2743_vm7, %v2745_v62, %v2741_v45  ;;  %v4579_v48 = vpop.eup %4578  ;;  %v2835_v1 = vand.u32 2147483647, %v6064_v31  ;;  %vm2833_vm4 = vmor %vm2831_vm14, %vm2832_vm11  ;;  %vm2821_vm6 = vcmp.eq.f32.partialorder %v2820_v10, 8.507059e+37  ;;  %vm2912_vm11 = vweird.f32 %v6051_v39 }
 0xd97   : > { %v2726_v60 = vsel %vm2725_vm8, %v4573_v24, %v2722_v49  ;;  %v2828_v54 = vsub.f32 1.0, %v2827_v3  ;;  %v2747_v15 = vmul.f32 %v5999_v50, %v2746_v59  ;;  %v2812_v26 = vmul.f32 %v4579_v48, %v2807_v19  ;;  %v6088_v63 = vpop.eup %4580 }
 0xd98   : > { %v2731_v14 = vsel %vm2728_vm9, %v2730_v43, %v2726_v60  ;;  %vm2817_vm10 = vweird.f32 %v4579_v48  ;;  %v2837_v50 = vand.u32 2147483648, %v6064_v31  ;;  %vm2836_vm5 = vcmp.eq.f32.partialorder %v2835_v1, 8.507059e+37 }
 0xd99   : > { %v2732_v51 = vmul.f32 %v5997_v8, %v2731_v14  ;;  %v2829_v47 = vmul.f32 %v4577_v53, %v2828_v54  ;;  %v2813_v16 = vsub.f32 1.0, %v2812_v26  ;;  %vm2818_vm3 = vmor %vm2816_vm12, %vm2817_vm10  ;;  %v3209_v19 = vsub.f32 %v5982_v57, %v3207_v9  ;;  %v3398_v35 = vpop.xlane.xlu0 %3397 }
 0xd9a   : > { %v2838_v22 = vor.u32 1.1754944e-38, %v2837_v50  ;;  %v3400_v4 = vsub.f32 %v5995_v18, %v3398_v35 }
 0xd9b   : > { %v2748_v37 = vpack.c.bf16 %v2747_v15, %v2732_v51  ;;  %v2814_v46 = vmul.f32 %v4579_v48, %v2813_v16  ;;  %v2830_v55 = vadd.f32 %v4577_v53, %v2829_v47  ;;  %v3212_v0 = vmul.f32 1.442695, %v3209_v19 }
 0xd9d   : > { %4250 = vmatmul.msk.bf16.vlgmr.msrb.gmra.mxu3 %vm1267_vm1, %v2748_v37  ;;  %v3034_v56 = vpop.permute.xlu2 %3033  ;;  %v2815_v8 = vadd.f32 %v4579_v48, %v2814_v46  ;;  %v2834_v11 = vsel %vm2833_vm4, %v4577_v53, %v2830_v55  ;;  %4582 = vpow2.f32 %v3212_v0  ;;  %v3403_v53 = vmul.f32 1.442695, %v3400_v4 }
 0xd9e   : > { %3046 = vmatpush.bf16.msrb.mxu3 %v3034_v56  ;;  %v2839_v30 = vsel %vm2836_vm5, %v2838_v22, %v2834_v11  ;;  %v2918_v56 = vand.u32 2147483648, %v6051_v39  ;;  %v2916_v55 = vand.u32 2147483647, %v6051_v39 }
 0xd9f   : > { %v2819_v24 = vsel %vm2818_vm3, %v4579_v48, %v2815_v8  ;;  %v2840_v28 = vmul.f32 %v6010_v34, %v2839_v30  ;;  %4584 = vpow2.f32 %v3403_v53 }
 0xda0   : > { %v2824_v33 = vsel %vm2821_vm6, %v2823_v41, %v2819_v24  ;;  %v2919_v1 = vor.u32 1.1754944e-38, %v2918_v56  ;;  %vm2917_vm3 = vcmp.eq.f32.partialorder %v2916_v55, 8.507059e+37 }
 0xda1   : > { %v2825_v5 = vmul.f32 %v6008_v58, %v2824_v33  ;;  %v2999_v58 = vsel %vm1267_vm1, %v6088_v63, 0.0  ;;  %v2906_v45 = vpop.xlane.xlu0 %2905 }
 0xda2   : > { %4586 = vrcp.f32 %v2906_v45  ;;  %v2933_v26 = vand.u32 2147483648, %v2906_v45  ;;  %vm2927_vm9 = vweird.f32 %v2906_v45  ;;  %v2931_v46 = vand.u32 2147483647, %v2906_v45 }
 0xda3   : > { %v2841_v31 = vpack.c.bf16 %v2840_v28, %v2825_v5  ;;  %v6093_v57 = vpop.eup %4582  ;;  %4588 = vrcp.f32 %v6051_v39 }
 0xda4   : > { %v3217_v34 = vsel %vm1267_vm1, %v6093_v57, 0.0  ;;  %v2934_v21 = vor.u32 1.1754944e-38, %v2933_v26  ;;  %vm2932_vm14 = vcmp.eq.f32.partialorder %v2931_v46, 8.507059e+37 }
 0xda5   : > { %v6097_v62 = vpop.eup %4584 }
 0xda6   : > { %v3408_v49 = vsel %vm1267_vm1, %v6097_v62, 0.0 }
 0xda7   : > { %v3253_v32 = vpop.permute.xlu1 %3252 }
 0xda8   : > { %v4587_v18 = vpop.eup %4586 }
 0xda9   : > { %v4589_v43 = vpop.eup %4588  ;;  %v2923_v3 = vmul.f32 %v4587_v18, %v2906_v45  ;;  %vm2928_vm7 = vweird.f32 %v4587_v18 }
 0xdaa   : > { %v2908_v59 = vmul.f32 %v4589_v43, %v6051_v39  ;;  %vm2913_vm8 = vweird.f32 %v4589_v43  ;;  %vm2929_vm10 = vmor %vm2927_vm9, %vm2928_vm7 }
 0xdab   : > { %v2924_v60 = vsub.f32 1.0, %v2923_v3  ;;  %vm2914_vm12 = vmor %vm2912_vm11, %vm2913_vm8 }
 0xdac   : > { %v2909_v14 = vsub.f32 1.0, %v2908_v59 }
 0xdad   : > { %4252 = vmatmul.msk.bf16.vlgmr.msra.gmra.mxu3 %vm1267_vm1, %v2841_v31  ;;  %v2925_v48 = vmul.f32 %v4587_v18, %v2924_v60 }
 0xdae   : > { %3265 = vmatpush.bf16.msra.mxu3 %v3253_v32  ;;  %v2910_v15 = vmul.f32 %v4589_v43, %v2909_v14 }
 0xdaf   : > { %v2926_v51 = vadd.f32 %v4587_v18, %v2925_v48 }
 0xdb0   : > { %v2911_v16 = vadd.f32 %v4589_v43, %v2910_v15 }
 0xdb1   : > { %v2930_v10 = vsel %vm2929_vm10, %v4587_v18, %v2926_v51 }
 0xdb2   : > { %3000 = vadd.xlane.f32.xlu0 %v2999_v58  ;;  %v2915_v50 = vsel %vm2914_vm12, %v4589_v43, %v2911_v16  ;;  %v2935_v24 = vsel %vm2932_vm14, %v2934_v21, %v2930_v10 }
 0xdb3   : > { %v2920_v9 = vsel %vm2917_vm3, %v2919_v1, %v2915_v50  ;;  %v2936_v22 = vmul.f32 %v6012_v13, %v2935_v24 }
 0xdb4   : > { %v2921_v39 = vmul.f32 %v5980_v61, %v2920_v9 }
 0xdb6   : > { %v2937_v31 = vpack.c.bf16 %v2936_v22, %v2921_v39 }
 0xdba   : > { %3218 = vadd.xlane.f32.xlu0 %v3217_v34 }
 0xdc2   : > { %3409 = vadd.xlane.f32.xlu0 %v3408_v49 }
 0xdd6   : > { %3442 = vrot.lane.b32.xlu0 %v6026_v36, %s6471_s29 }
 0xde5   : > { %v6108_v47 = vpop.xlane.xlu2 %3215 }
 0xde7   : > { %v6105_v54 = vpop.xlane.xlu0 %3122 }
 0xde8   : > { %4590 = vrcp.f32 %v6105_v54  ;;  %v3138_v58 = vand.u32 2147483648, %v6105_v54  ;;  %vm3132_vm8 = vweird.f32 %v6105_v54 }
 0xdea   : > { %v3139_v18 = vor.u32 1.1754944e-38, %v3138_v58 }
 0xdee   : > { %v4591_v17 = vpop.eup %4590 }
 0xdef   : > { %v3126_v37 = vpop.xlane.xlu1 %3125  ;;  %v3128_v8 = vmul.f32 %v4591_v17, %v6105_v54  ;;  %vm3133_vm6 = vweird.f32 %v4591_v17 }
 0xdf0   : > { %4592 = vrcp.f32 %v3126_v37  ;;  %v3153_v35 = vand.u32 2147483648, %v3126_v37  ;;  %vm3147_vm5 = vweird.f32 %v3126_v37  ;;  %v3151_v61 = vand.u32 2147483647, %v3126_v37  ;;  %vm3134_vm9 = vmor %vm3132_vm8, %vm3133_vm6 }
 0xdf1   : > { %v3129_v33 = vsub.f32 1.0, %v3128_v8 }
 0xdf2   : > { %v3154_v34 = vor.u32 1.1754944e-38, %v3153_v35  ;;  %vm3152_vm10 = vcmp.eq.f32.partialorder %v3151_v61, 8.507059e+37  ;;  %v3011_v61 = vand.u32 2147483647, %v6074_v44 }
 0xdf3   : > { %v3130_v28 = vmul.f32 %v4591_v17, %v3129_v33 }
 0xdf5   : > { %v3131_v4 = vadd.f32 %v4591_v17, %v3130_v28 }
 0xdf6   : > { %v4593_v41 = vpop.eup %4592 }
 0xdf7   : > { %v3143_v11 = vmul.f32 %v4593_v41, %v3126_v37  ;;  %v3312_v2 = vpop.xlane.xlu2 %3311  ;;  %vm3148_vm4 = vweird.f32 %v4593_v41  ;;  %v3135_v45 = vsel %vm3134_vm9, %v4591_v17, %v3131_v4 }
 0xdf8   : > { %4594 = vrcp.f32 %v3312_v2  ;;  %vm3149_vm7 = vmor %vm3147_vm5, %vm3148_vm4  ;;  %v3327_v46 = vand.u32 2147483648, %v3312_v2  ;;  %vm3321_vm14 = vweird.f32 %v3312_v2  ;;  %v3325_v17 = vand.u32 2147483647, %v3312_v2 }
 0xdf9   : > { %v3144_v30 = vsub.f32 1.0, %v3143_v11 }
 0xdfa   : > { %v2939_v5 = vpop.permute.xlu0 %2938  ;;  %v3328_v50 = vor.u32 1.1754944e-38, %v3327_v46  ;;  %vm3326_vm6 = vcmp.eq.f32.partialorder %v3325_v17, 8.507059e+37 }
 0xdfb   : > { %v3145_v19 = vmul.f32 %v4593_v41, %v3144_v30  ;;  %2951 = vmatpush.bf16.msrb.mxu1 %v2939_v5 }
 0xdfd   : > { %v3146_v0 = vadd.f32 %v4593_v41, %v3145_v19 }
 0xdfe   : > { %4254 = vmatmul.msk.bf16.vlgmr.msrb.gmra.mxu1 %vm1267_vm1, %v2937_v31  ;;  %v4595_v13 = vpop.eup %4594 }
 0xdff   : > { %3169 = vmatpush.bf16.msra.mxu1 %v6026_v36  ;;  %v6118_v32 = vpop.xlane.xlu2 %3406  ;;  %v3136_v36 = vand.u32 2147483647, %v6105_v54  ;;  %v3150_v53 = vsel %vm3149_vm7, %v4593_v41, %v3146_v0  ;;  %v3317_v49 = vmul.f32 %v4595_v13, %v3312_v2  ;;  %vm3322_vm12 = vweird.f32 %v4595_v13 }
 0xe00   : > { %v3155_v43 = vsel %vm3152_vm10, %v3154_v34, %v3150_v53  ;;  %vm3323_vm3 = vmor %vm3321_vm14, %vm3322_vm12  ;;  %vm3007_vm10 = vweird.f32 %v6074_v44  ;;  %vm3012_vm14 = vcmp.eq.f32.partialorder %v3011_v61, 8.507059e+37 }
 0xe01   : > { %vm3137_vm11 = vcmp.eq.f32.partialorder %v3136_v36, 8.507059e+37  ;;  %v3318_v59 = vsub.f32 1.0, %v3317_v49  ;;  %v3156_v48 = vmul.f32 %v6046_v38, %v3155_v43 }
 0xe02   : > { %v3140_v3 = vsel %vm3137_vm11, %v3139_v18, %v3135_v45 }
 0xe03   : > { %v3141_v15 = vmul.f32 %v6041_v40, %v3140_v3  ;;  %v3319_v54 = vmul.f32 %v4595_v13, %v3318_v59 }
 0xe05   : > { %v3157_v51 = vpack.c.bf16 %v3156_v48, %v3141_v15  ;;  %v3320_v37 = vadd.f32 %v4595_v13, %v3319_v54 }
 0xe07   : > { %v3348_v60 = vpop.permute.xlu1 %3347  ;;  %v3315_v14 = vpop.xlane.xlu2 %3314  ;;  %v3324_v10 = vsel %vm3323_vm3, %v4595_v13, %v3320_v37  ;;  %v3013_v13 = vand.u32 2147483648, %v6074_v44 }
 0xe08   : > { %4596 = vrcp.f32 %v3315_v14  ;;  %3360 = vmatpush.bf16.msrb.mxu1 %v3348_v60  ;;  %v3342_v55 = vand.u32 2147483648, %v3315_v14  ;;  %v3340_v21 = vand.u32 2147483647, %v3315_v14  ;;  %vm3336_vm5 = vweird.f32 %v3315_v14 }
 0xe09   : > { %v3329_v8 = vsel %vm3326_vm6, %v3328_v50, %v3324_v10  ;;  %4598 = vrcp.f32 %v6074_v44  ;;  %v3014_v43 = vor.u32 1.1754944e-38, %v3013_v13 }
 0xe0a   : > { %v3343_v1 = vor.u32 1.1754944e-38, %v3342_v55  ;;  %vm3341_vm8 = vcmp.eq.f32.partialorder %v3340_v21, 8.507059e+37  ;;  %v3330_v9 = vmul.f32 %v6053_v23, %v3329_v8  ;;  %v3231_v8 = vand.u32 2147483648, %v6108_v47 }
 0xe0e   : > { %v4597_v26 = vpop.eup %4596  ;;  %4258 = vmatmul.msk.bf16.vlgmr.msra.gmra.mxu1 %vm1267_vm1, %v3157_v51 }
 0xe0f   : > { %v3332_v16 = vmul.f32 %v4597_v26, %v3315_v14  ;;  %vm3337_vm4 = vweird.f32 %v4597_v26  ;;  %v4599_v22 = vpop.eup %4598 }
 0xe10   : > { %vm3338_vm7 = vmor %vm3336_vm5, %vm3337_vm4  ;;  %v3003_v33 = vmul.f32 %v4599_v22, %v6074_v44  ;;  %vm3008_vm9 = vweird.f32 %v4599_v22 }
 0xe11   : > { %v3333_v56 = vsub.f32 1.0, %v3332_v16  ;;  %vm6140_vm11 = vmor %vm3007_vm10, %vm3008_vm9  ;;  %vm3225_vm10 = vweird.f32 %v6108_v47 }
 0xe12   : > { %v3004_v39 = vsub.f32 1.0, %v3003_v33 }
 0xe13   : > { %v3334_v38 = vmul.f32 %v4597_v26, %v3333_v56 }
 0xe14   : > { %v3005_v19 = vmul.f32 %v4599_v22, %v3004_v39 }
 0xe15   : > { %v3335_v40 = vadd.f32 %v4597_v26, %v3334_v38 }
 0xe16   : > { %v3006_v23 = vadd.f32 %v4599_v22, %v3005_v19 }
 0xe17   : > { %v3339_v24 = vsel %vm3338_vm7, %v4597_v26, %v3335_v40 }
 0xe18   : > { %v3344_v41 = vsel %vm3341_vm8, %v3343_v1, %v3339_v24  ;;  %v3010_v36 = vsel %vm6140_vm11, %v4599_v22, %v3006_v23  ;;  %v3229_v1 = vand.u32 2147483647, %v6108_v47  ;;  %v3232_v22 = vor.u32 1.1754944e-38, %v3231_v8 }
 0xe19   : > { %v3345_v11 = vmul.f32 %v6067_v20, %v3344_v41  ;;  %v3015_v60 = vsel %vm3012_vm14, %v3014_v43, %v3010_v36 }
 0xe1a   : > { %v3016_v26 = vmul.f32 %v6020_v12, %v3015_v60  ;;  %vm3230_vm14 = vcmp.eq.f32.partialorder %v3229_v1, 8.507059e+37 }
 0xe1b   : > { %v3346_v2 = vpack.c.bf16 %v3345_v11, %v3330_v9 }
 0xe1e   : > { %4262 = vmatmul.msk.bf16.vlgmr.msrb.gmra.mxu1 %vm1267_vm1, %v3346_v2 }
 0xe20   : > { %v6131_v30 = vpop.f32.mrf.mxu3 }
 0xe25   : > { %v3001_v5 = vpop.xlane.xlu0 %3000 }
 0xe26   : > { %4600 = vrcp.f32 %v3001_v5  ;;  %v3028_v53 = vand.u32 2147483648, %v3001_v5  ;;  %v3026_v18 = vand.u32 2147483647, %v3001_v5  ;;  %vm3022_vm3 = vweird.f32 %v3001_v5 }
 0xe27   : > { %4602 = vrcp.f32 %v6108_v47 }
 0xe28   : > { %v6134_v28 = vpop.f32.mrf.mxu3  ;;  %v3029_v44 = vor.u32 1.1754944e-38, %v3028_v53  ;;  %vm3027_vm6 = vcmp.eq.f32.partialorder %v3026_v18, 8.507059e+37 }
 0xe2c   : > { %v4601_v31 = vpop.eup %4600 }
 0xe2d   : > { %v3018_v20 = vmul.f32 %v4601_v31, %v3001_v5  ;;  %v3219_v0 = vpop.xlane.xlu0 %3218  ;;  %v6136_v35 = vpop.eup %4602  ;;  %vm3023_vm12 = vweird.f32 %v4601_v31 }
 0xe2e   : > { %4604 = vrcp.f32 %v3219_v0  ;;  %v3221_v49 = vmul.f32 %v6136_v35, %v6108_v47  ;;  %vm3024_vm4 = vmor %vm3022_vm3, %vm3023_vm12  ;;  %v3246_v50 = vand.u32 2147483648, %v3219_v0  ;;  %vm3226_vm7 = vweird.f32 %v6136_v35 }
 0xe2f   : > { %v3019_v58 = vsub.f32 1.0, %v3018_v20  ;;  %vm3240_vm8 = vweird.f32 %v3219_v0  ;;  %vm3227_vm11 = vmor %vm3225_vm10, %vm3226_vm7  ;;  %vm3416_vm7 = vweird.f32 %v6118_v32 }
 0xe30   : > { %v2858_v34 = vpop.f32.mrf.mxu3  ;;  %v3222_v14 = vsub.f32 1.0, %v3221_v49  ;;  %v3247_v9 = vor.u32 1.1754944e-38, %v3246_v50  ;;  %v4265_v50 = vld [vmem:[%s5647_s6 + $0x20] sm:$0xff] }
 0xe31   : > { %v3020_v45 = vmul.f32 %v4601_v31, %v3019_v58 }
 0xe32   : > { %v3223_v17 = vmul.f32 %v6136_v35, %v3222_v14 }
 0xe33   : > { %v3021_v3 = vadd.f32 %v4601_v31, %v3020_v45 }
 0xe34   : > { %v4605_v59 = vpop.eup %4604  ;;  %v3224_v12 = vadd.f32 %v6136_v35, %v3223_v17  ;;  %v4267_v17 = vld [vmem:[%s5647_s6 + $0x30] sm:$0xff] }
 0xe35   : > { %v3025_v48 = vsel %vm3024_vm4, %v4601_v31, %v3021_v3  ;;  %v3236_v15 = vmul.f32 %v4605_v59, %v3219_v0  ;;  %v6149_v54 = vpop.xlane.xlu0 %3409  ;;  %vm3241_vm5 = vweird.f32 %v4605_v59 }
 0xe36   : > { %v3030_v51 = vsel %vm3027_vm6, %v3029_v44, %v3025_v48  ;;  %4606 = vrcp.f32 %v6149_v54  ;;  %vm3242_vm9 = vmor %vm3240_vm8, %vm3241_vm5  ;;  %v3228_v11 = vsel %vm3227_vm11, %v6136_v35, %v3224_v12  ;;  %v3437_v35 = vand.u32 2147483648, %v6149_v54  ;;  %v4266_v12 = vld [vmem:[%s5647_s6 + $0x28] sm:$0xff] }
 0xe37   : > { %v3031_v37 = vmul.f32 %v6088_v63, %v3030_v51  ;;  %v3237_v16 = vsub.f32 1.0, %v3236_v15  ;;  %4608 = vrcp.f32 %v6118_v32  ;;  %v3244_v63 = vand.u32 2147483647, %v3219_v0 }
 0xe38   : > { %v2860_v46 = vpop.f32.mrf.mxu3  ;;  %v3233_v5 = vsel %vm3230_vm14, %v3232_v22, %v3228_v11  ;;  %vm3431_vm6 = vweird.f32 %v6149_v54  ;;  %v3435_v58 = vand.u32 2147483647, %v6149_v54  ;;  %v3438_v53 = vor.u32 1.1754944e-38, %v3437_v35 }
 0xe39   : > { %v3238_v56 = vmul.f32 %v4605_v59, %v3237_v16  ;;  %v4391_v55 = vpack.i.bf16 %v2860_v46, %v2858_v34  ;;  %v3032_v10 = vpack.c.bf16 %v3031_v37, %v3016_v26  ;;  %vm3245_vm12 = vcmp.eq.f32.partialorder %v3244_v63, 8.507059e+37 }
 0xe3a   : > { %v3234_v47 = vmul.f32 %v6036_v27, %v3233_v5  ;;  %v3420_v27 = vand.u32 2147483647, %v6118_v32  ;;  %v3499_v63 = vpack.c.bf16 %v4266_v12, %v4265_v50 }
 0xe3b   : > { %v3239_v38 = vadd.f32 %v4605_v59, %v3238_v56  ;;  %4392 = vrot.lane.b32.xlu2 %v4391_v55, %s6477_s4  ;;  %4256 = vmatmul.msk.bf16.vlgmr.msrb.gmra.mxu3 %vm1267_vm1, %v3032_v10  ;;  %v4268_v56 = vld [vmem:[%s5647_s6 + $0x38] sm:$0xff]  ;;  %s6480_s6 = sshll.u32 %s6488_s2, 5 }
 0xe3c   : > { %v4607_v21 = vpop.eup %4606  ;;  %vm3421_vm10 = vcmp.eq.f32.partialorder %v3420_v27, 8.507059e+37  ;;  %v3500_v55 = vpack.c.bf16 %v4268_v56, %v4267_v17 }
 0xe3d   : > { %v4609_v40 = vpop.eup %4608  ;;  %v3243_v24 = vsel %vm3242_vm9, %v4605_v59, %v3239_v38  ;;  %v3427_v41 = vmul.f32 %v4607_v21, %v6149_v54  ;;  %vm3432_vm3 = vweird.f32 %v4607_v21  ;;  %vm3436_vm9 = vcmp.eq.f32.partialorder %v3435_v58, 8.507059e+37 }
 0xe3e   : > { %v3412_v2 = vmul.f32 %v4609_v40, %v6118_v32  ;;  %v3248_v33 = vsel %vm3245_vm12, %v3247_v9, %v3243_v24  ;;  %vm3417_vm4 = vweird.f32 %v4609_v40  ;;  %vm3433_vm5 = vmor %vm3431_vm6, %vm3432_vm3  ;;  %3513 = vmatpush.bf16.msra.mxu0 %v3500_v55 }
 0xe3f   : > { %v3428_v39 = vsub.f32 1.0, %v3427_v41  ;;  %v3249_v31 = vmul.f32 %v6093_v57, %v3248_v33  ;;  %v3422_v57 = vand.u32 2147483648, %v6118_v32  ;;  %vm3418_vm8 = vmor %vm3416_vm7, %vm3417_vm4 }
 0xe40   : > { %v3413_v19 = vsub.f32 1.0, %v3412_v2 }
 0xe41   : > { %v3429_v23 = vmul.f32 %v4607_v21, %v3428_v39  ;;  %v3250_v13 = vpack.c.bf16 %v3249_v31, %v3234_v47  ;;  %v3423_v49 = vor.u32 1.1754944e-38, %v3422_v57 }
 0xe42   : > { %v3414_v0 = vmul.f32 %v4609_v40, %v3413_v19  ;;  %3514 = vmatpush.bf16.msra.mxu0 %v3499_v63 }
 0xe43   : > { %v3430_v4 = vadd.f32 %v4607_v21, %v3429_v23 }
 0xe44   : > { %v3415_v61 = vadd.f32 %v4609_v40, %v3414_v0 }
 0xe45   : > { %v3434_v36 = vsel %vm3433_vm5, %v4607_v21, %v3430_v4 }
 0xe46   : > { %v3419_v34 = vsel %vm3418_vm8, %v4609_v40, %v3415_v61  ;;  %v3439_v45 = vsel %vm3436_vm9, %v3438_v53, %v3434_v36 }
 0xe47   : > { %v3424_v18 = vsel %vm3421_vm10, %v3423_v49, %v3419_v34  ;;  %v3440_v43 = vmul.f32 %v6097_v62, %v3439_v45 }
 0xe48   : > { %v3443_v20 = vpop.permute.xlu0 %3442  ;;  %v3425_v3 = vmul.f32 %v6058_v42, %v3424_v18  ;;  %v4435_v18 = vld [vmem:[%s5639_s17 + $0x1] ss:$0 sm:$0xff] }
 0xe49   : > { %3455 = vmatpush.bf16.msrb.mxu3 %v3443_v20 }
 0xe4a   : > { %v3441_v59 = vpack.c.bf16 %v3440_v43, %v3425_v3 }
 0xe4b   : > { %4260 = vmatmul.msk.bf16.vlgmr.msra.gmra.mxu3 %vm1267_vm1, %v3250_v13 }
 0xe5b   : > { %4264 = vmatmul.msk.bf16.vlgmr.msrb.gmra.mxu3 %vm1267_vm1, %v3441_v59 }
 0xe7b   : > { %v2953_v60 = vpop.f32.mrf.mxu1 }
 0xe83   : > { %v2955_v44 = vpop.f32.mrf.mxu1 }
 0xe84   : > { %v4396_v14 = vpack.i.bf16 %v2955_v44, %v2953_v60 }
 0xe86   : > { %4397 = vrot.lane.b32.xlu1 %v4396_v14, %s6478_s9 }
 0xe8b   : > { %v3171_v32 = vpop.f32.mrf.mxu1 }
 0xe93   : > { %v3173_v48 = vpop.f32.mrf.mxu1 }
 0xe95   : > { %v4393_v8 = vpop.permute.xlu2 %4392 }
 0xe96   : > { %v4395_v1 = vunpack.i.h.bf16 %v4393_v8  ;;  %v4394_v24 = vunpack.i.l.bf16 %v4393_v8 }
 0xe98   : > { %v3078_v2 = vsel %vm1244_vm0, %v6134_v28, %v4395_v1  ;;  %v3077_v22 = vsel %vm1244_vm0, %v6131_v30, %v4394_v24 }
 0xe9b   : > { %v3362_v54 = vpop.f32.mrf.mxu1 }
 0xea3   : > { %v3364_v42 = vpop.f32.mrf.mxu1 }
 0xea4   : > { %v4406_v37 = vpack.i.bf16 %v3364_v42, %v3362_v54 }
 0xebe   : > { %v3048_v15 = vpop.f32.mrf.mxu3 }
 0xec6   : > { %v3050_v51 = vpop.f32.mrf.mxu3 }
 0xec7   : > { %v4401_v26 = vpack.i.bf16 %v3050_v51, %v3048_v15 }
 0xec9   : > { %4402 = vrot.lane.b32.xlu1 %v4401_v26, %s6479_s14 }
 0xece   : > { %v3267_v62 = vpop.f32.mrf.mxu3 }
 0xed1   : > { %4407 = vrot.lane.b32.xlu1 %v4406_v37, %s6478_s9 }
 0xed6   : > { %v3269_v16 = vpop.f32.mrf.mxu3 }
 0xed7   : > { %v4411_v46 = vpack.i.bf16 %v3269_v16, %v3267_v62 }
 0xed9   : > { %4412 = vrot.lane.b32.xlu0 %v4411_v46, %s6477_s4 }
 0xede   : > { %v3457_v10 = vpop.f32.mrf.mxu3 }
 0xee6   : > { %v3459_v38 = vpop.f32.mrf.mxu3 }
 0xee7   : > { %v4416_v21 = vpack.i.bf16 %v3459_v38, %v3457_v10 }
 0xee9   : > { %4417 = vrot.lane.b32.xlu0 %v4416_v21, %s6479_s14 }
 0xef8   : > { %v4398_v40 = vpop.permute.xlu1 %4397 }
 0xef9   : > { %v4400_v41 = vunpack.i.h.bf16 %v4398_v40  ;;  %v4399_v9 = vunpack.i.l.bf16 %v4398_v40 }
 0xefb   : > { %v3079_v5 = vsel %vm1267_vm1, %v3077_v22, %v4399_v9  ;;  %v3080_v19 = vsel %vm1267_vm1, %v3078_v2, %v4400_v41  ;;  %v4276_v22 = vld [vmem:[%s5717_s5 + $0x30] sm:$0xff] }
 0xf3b   : > { %v4403_v11 = vpop.permute.xlu1 %4402 }
 0xf3c   : > { %v4405_v33 = vunpack.i.h.bf16 %v4403_v11  ;;  %v4404_v39 = vunpack.i.l.bf16 %v4403_v11 }
 0xf3e   : > { %v3081_v31 = vsel %vm1649_vm15, %v3079_v5, %v4404_v39  ;;  %v3082_v47 = vsel %vm1649_vm15, %v3080_v19, %v4405_v33  ;;  %v4277_v33 = vld [vmem:[%s5717_s5 + $0x38] sm:$0xff]  ;;  %v4274_v19 = vld [vmem:[%s5717_s5 + $0x20] sm:$0xff] }
 0xf3f   : > { %v3497_v23 = vpack.c.bf16 %v3082_v47, %v3081_v31  ;;  %v3653_v5 = vpack.c.bf16 %v4277_v33, %v4276_v22  ;;  %v4275_v31 = vld [vmem:[%s5717_s5 + $0x28] sm:$0xff] }
 0xf40   : > { %v3652_v47 = vpack.c.bf16 %v4275_v31, %v4274_v19 }
 0xf41   : > { %4269 = vmatmul.msk.bf16.vlgmr.msra.gmra.mxu0 %vm1023_vm2, %v3497_v23  ;;  %3671 = vmatpush.bf16.msra.mxu1 %v3653_v5 }
 0xf43   : > { %v4408_v13 = vpop.permute.xlu1 %4407 }
 0xf44   : > { %v4410_v35 = vunpack.i.h.bf16 %v4408_v13  ;;  %v4409_v61 = vunpack.i.l.bf16 %v4408_v13 }
 0xf45   : > { %3672 = vmatpush.bf16.msra.mxu1 %v3652_v47 }
 0xf4b   : > { %v4413_v20 = vpop.permute.xlu0 %4412 }
 0xf4c   : > { %v4415_v0 = vunpack.i.h.bf16 %v4413_v20  ;;  %v4414_v28 = vunpack.i.l.bf16 %v4413_v20 }
 0xf4e   : > { %v3487_v30 = vsel %vm1244_vm0, %v3173_v48, %v4415_v0  ;;  %v3486_v4 = vsel %vm1244_vm0, %v3171_v32, %v4414_v28 }
 0xf4f   : > { %v3488_v36 = vsel %vm1267_vm1, %v3486_v4, %v4409_v61  ;;  %v3489_v53 = vsel %vm1267_vm1, %v3487_v30, %v4410_v35 }
 0xf5b   : > { %v4418_v58 = vpop.permute.xlu0 %4417 }
 0xf5c   : > { %v4420_v57 = vunpack.i.h.bf16 %v4418_v58  ;;  %v4419_v27 = vunpack.i.l.bf16 %v4418_v58 }
 0xf5e   : > { %v3490_v34 = vsel %vm1649_vm15, %v3488_v36, %v4419_v27  ;;  %v3491_v49 = vsel %vm1649_vm15, %v3489_v53, %v4420_v57 }
 0xf5f   : > { %v3498_v45 = vpack.c.bf16 %v3491_v49, %v3490_v34  ;;  %v4436_v49 = vld [vmem:[%s5683_s18 + $0x1] ss:$0 sm:$0xff] }
 0xf61   : > { %4270 = vmatmul.msk.bf16.gmra.mxu0 %vm1023_vm2, %v3498_v45 }
 0xfbe   : > { %v3516_v43 = vpop.f32.mrf.mxu0 }
 0xfbf   : > { %v3526_v3 = vadd.f32 %v3516_v43, %v5802_v6 }
 0xfc1   : > { %v6205_v59 = vadd.f32 %v4435_v18, %v3526_v3  ;;  %v4437_v3 = vld [vmem:[%s5689_s25 + $0x1] ss:$0 sm:$0xff]  ;;  %s6481_s25 = sld [smem:[#allocation24_spill]] }
 0xfc3   : > { %v3543_v60 = vsel %vm1023_vm2, %v6205_v59, 0.0 }
 0xfc4   : > { %3544 = vadd.xlane.f32.xlu2 %v3543_v60 }
 0xfc6   : > { %v3518_v44 = vpop.f32.mrf.mxu0 }
 0xfc7   : > { %v3527_v14 = vadd.f32 %v3518_v44, %v5807_v25  ;;  %s964_s18 = scalar_lea.vmem %s6481_s25, %s6480_s6 }
 0xfc9   : > { %v6210_v32 = vadd.f32 %v4435_v18, %v3527_v14 }
 0xfcb   : > { %v3546_v48 = vsel %vm1023_vm2, %v6210_v32, 0.0 }
 0xfcc   : > { %3547 = vadd.xlane.f32.xlu1 %v3546_v48 }
 0xfde   : > { %v3521_v15 = vpop.f32.mrf.mxu0 }
 0xfdf   : > { %v3528_v54 = vadd.f32 %v3521_v15, %v5816_v52 }
 0xfe1   : > { %v6215_v51 = vadd.f32 %v4435_v18, %v3528_v54 }
 0xfe3   : > { %v3549_v6 = vsel %vm1023_vm2, %v6215_v51, 0.0 }
 0xfe4   : > { %3550 = vadd.xlane.f32.xlu0 %v3549_v6 }
 0xfe6   : > { %v3523_v26 = vpop.f32.mrf.mxu0 }
 0xfe7   : > { %v3529_v42 = vadd.f32 %v3523_v26, %v5826_v7 }
 0xfe9   : > { %v6220_v62 = vadd.f32 %v4435_v18, %v3529_v42 }
 0xfeb   : > { %v3552_v25 = vsel %vm1023_vm2, %v6220_v62, 0.0 }
 0xfec   : > { %3553 = vadd.xlane.f32.xlu2 %v3552_v25 }
0x1037   : > { %v3545_v37 = vpop.xlane.xlu2 %3544 }
0x1038   : > { %v3555_v16 = vmul.f32 %v3545_v37, %v5012_v29 }
0x103a   : > { %v3559_v52 = vsub.f32 %v6205_v59, %v3555_v16 }
0x103c   : > { %v3563_v46 = vmul.f32 %v3559_v52, %v3559_v52 }
0x103e   : > { %v3567_v17 = vsel %vm1023_vm2, %v3563_v46, 0.0 }
0x103f   : > { %3568 = vadd.xlane.f32.xlu1 %v3567_v17  ;;  %v3548_v56 = vpop.xlane.xlu1 %3547 }
0x1040   : > { %v3556_v55 = vmul.f32 %v3548_v56, %v5012_v29 }
0x1042   : > { %v3560_v7 = vsub.f32 %v6210_v32, %v3556_v55 }
0x1044   : > { %v3564_v10 = vmul.f32 %v3560_v7, %v3560_v7 }
0x1046   : > { %v3570_v38 = vsel %vm1023_vm2, %v3564_v10, 0.0 }
0x1047   : > { %3571 = vadd.xlane.f32.xlu0 %v3570_v38 }
0x1057   : > { %v3551_v21 = vpop.xlane.xlu0 %3550 }
0x1058   : > { %v3557_v50 = vmul.f32 %v3551_v21, %v5012_v29 }
0x105a   : > { %v6232_v12 = vsub.f32 %v6215_v51, %v3557_v50 }
0x105c   : > { %v3565_v63 = vmul.f32 %v6232_v12, %v6232_v12 }
0x105e   : > { %v3573_v40 = vsel %vm1023_vm2, %v3565_v63, 0.0 }
0x105f   : > { %3574 = vadd.xlane.f32.xlu2 %v3573_v40  ;;  %v3554_v8 = vpop.xlane.xlu2 %3553 }
0x1060   : > { %v3558_v1 = vmul.f32 %v3554_v8, %v5012_v29 }
0x1062   : > { %v6239_v24 = vsub.f32 %v6220_v62, %v3558_v1 }
0x1064   : > { %v3566_v41 = vmul.f32 %v6239_v24, %v6239_v24 }
0x1066   : > { %v3576_v9 = vsel %vm1023_vm2, %v3566_v41, 0.0 }
0x1067   : > { %3577 = vadd.xlane.f32.xlu1 %v3576_v9 }
0x10b2   : > { %v3569_v11 = vpop.xlane.xlu1 %3568 }
0x10b3   : > { %v3579_v2 = vmul.f32 %v3569_v11, %v5012_v29 }
0x10b5   : > { %v3583_v39 = vadd.f32 1e-05, %v3579_v2 }
0x10b7   : > { %4610 = vrsqrt.f32 %v3583_v39  ;;  %vm3593_vm1 = vweird.f32 %v3583_v39 }
0x10ba   : > { %v3572_v23 = vpop.xlane.xlu0 %3571 }
0x10bb   : > { %v3580_v20 = vmul.f32 %v3572_v23, %v5012_v29 }
0x10bd   : > { %v4611_v0 = vpop.eup %4610  ;;  %v3584_v28 = vadd.f32 1e-05, %v3580_v20 }
0x10be   : > { %v3588_v13 = vmul.f32 %v4611_v0, %v3583_v39  ;;  %vm3594_vm0 = vweird.f32 %v4611_v0  ;;  %v6259_v39 = vld [vmem:[%s4966_s16 + $0x1] ss:$0 sm:$0xff] }
0x10bf   : > { %4612 = vrsqrt.f32 %v3584_v28  ;;  %vm3595_vm15 = vmor %vm3593_vm1, %vm3594_vm0  ;;  %vm3603_vm12 = vweird.f32 %v3584_v28 }
0x10c0   : > { %v3589_v30 = vmul.f32 %v4611_v0, %v3588_v13 }
0x10c2   : > { %v3590_v4 = vmul.f32 0.5, %v3589_v30 }
0x10c4   : > { %v3591_v35 = vsub.f32 1.5, %v3590_v4 }
0x10c5   : > { %v4613_v61 = vpop.eup %4612 }
0x10c6   : > { %v3592_v58 = vmul.f32 %v4611_v0, %v3591_v35  ;;  %v3598_v57 = vmul.f32 %v4613_v61, %v3584_v28  ;;  %vm3604_vm11 = vweird.f32 %v4613_v61 }
0x10c7   : > { %vm3605_vm14 = vmor %vm3603_vm12, %vm3604_vm11 }
0x10c8   : > { %v3599_v27 = vmul.f32 %v4613_v61, %v3598_v57  ;;  %v3596_v36 = vsel %vm3595_vm15, %v4611_v0, %v3592_v58 }
0x10c9   : > { %v3627_v45 = vmul.f32 %v3596_v36, %v3559_v52  ;;  %v4287_v36 = vld [vmem:[%s5764_s28 + $0x70] sm:$0xff] }
0x10ca   : > { %v3600_v53 = vmul.f32 0.5, %v3599_v27 }
0x10cb   : > { %v3634_v60 = vmul.f32 %v4436_v49, %v3627_v45 }
0x10cc   : > { %v3601_v34 = vsub.f32 1.5, %v3600_v53  ;;  %v4288_v53 = vld [vmem:[%s5764_s28 + $0x78] sm:$0xff] }
0x10cd   : > { %v3641_v54 = vadd.f32 %v4437_v3, %v3634_v60  ;;  %v4285_v60 = vld [vmem:[%s5764_s28 + $0x60] sm:$0xff] }
0x10ce   : > { %v3602_v18 = vmul.f32 %v4613_v61, %v3601_v34  ;;  %v3858_v34 = vpack.c.bf16 %v4288_v53, %v4287_v36 }
0x10d0   : > { %v3606_v43 = vsel %vm3605_vm14, %v4613_v61, %v3602_v18  ;;  %3869 = vmatpush.bf16.msrb.mxu2 %v3858_v34 }
0x10d1   : > { %v3628_v44 = vmul.f32 %v3606_v43, %v3560_v7 }
0x10d2   : > { %v3575_v14 = vpop.xlane.xlu2 %3574 }
0x10d3   : > { %v3635_v48 = vmul.f32 %v4436_v49, %v3628_v44  ;;  %v3581_v15 = vmul.f32 %v3575_v14, %v5012_v29  ;;  %v4286_v44 = vld [vmem:[%s5764_s28 + $0x68] sm:$0xff] }
0x10d5   : > { %v3642_v6 = vadd.f32 %v4437_v3, %v3635_v48  ;;  %v3585_v26 = vadd.f32 1e-05, %v3581_v15  ;;  %v3857_v15 = vpack.c.bf16 %v4286_v44, %v4285_v60 }
0x10d7   : > { %v3650_v42 = vpack.c.bf16 %v3642_v6, %v3641_v54  ;;  %4614 = vrsqrt.f32 %v3585_v26  ;;  %vm3613_vm4 = vweird.f32 %v3585_v26  ;;  %3870 = vmatpush.bf16.msrb.mxu2 %v3857_v15 }
0x10d9   : > { %4279 = vmatmul.msk.bf16.vlgmr.msra.gmra.mxu1 %vm1023_vm2, %v3650_v42 }
0x10da   : > { %v3578_v25 = vpop.xlane.xlu1 %3577 }
0x10db   : > { %v3582_v37 = vmul.f32 %v3578_v25, %v5012_v29 }
0x10dd   : > { %v4615_v16 = vpop.eup %4614  ;;  %v3586_v52 = vadd.f32 1e-05, %v3582_v37  ;;  %v4283_v37 = vld [vmem:[%s5764_s28 + $0x50] sm:$0xff] }
0x10de   : > { %v3608_v46 = vmul.f32 %v4615_v16, %v3585_v26  ;;  %vm3614_vm3 = vweird.f32 %v4615_v16 }
0x10df   : > { %4616 = vrsqrt.f32 %v3586_v52  ;;  %vm3615_vm6 = vmor %vm3613_vm4, %vm3614_vm3  ;;  %vm3623_vm7 = vweird.f32 %v3586_v52 }
0x10e0   : > { %v3609_v17 = vmul.f32 %v4615_v16, %v3608_v46 }
0x10e2   : > { %v3610_v56 = vmul.f32 0.5, %v3609_v17 }
0x10e4   : > { %v3611_v55 = vsub.f32 1.5, %v3610_v56 }
0x10e5   : > { %v4617_v7 = vpop.eup %4616 }
0x10e6   : > { %v3612_v10 = vmul.f32 %v4615_v16, %v3611_v55  ;;  %v3618_v38 = vmul.f32 %v4617_v7, %v3586_v52  ;;  %vm3624_vm5 = vweird.f32 %v4617_v7 }
0x10e7   : > { %vm3625_vm8 = vmor %vm3623_vm7, %vm3624_vm5 }
0x10e8   : > { %v3619_v21 = vmul.f32 %v4617_v7, %v3618_v38  ;;  %v3616_v50 = vsel %vm3615_vm6, %v4615_v16, %v3612_v10  ;;  %v4284_v16 = vld [vmem:[%s5764_s28 + $0x58] sm:$0xff] }
0x10e9   : > { %v3629_v29 = vmul.f32 %v3616_v50, %v6232_v12  ;;  %v3856_v17 = vpack.c.bf16 %v4284_v16, %v4283_v37 }
0x10ea   : > { %v3620_v63 = vmul.f32 0.5, %v3619_v21 }
0x10eb   : > { %v3636_v9 = vmul.f32 %v4436_v49, %v3629_v29  ;;  %3871 = vmatpush.bf16.msrb.mxu2 %v3856_v17 }
0x10ec   : > { %v3621_v40 = vsub.f32 1.5, %v3620_v63  ;;  %v4281_v63 = vld [vmem:[%s5764_s28 + $0x40] sm:$0xff] }
0x10ed   : > { %v3643_v2 = vadd.f32 %v4437_v3, %v3636_v9 }
0x10ee   : > { %v3622_v8 = vmul.f32 %v4617_v7, %v3621_v40  ;;  %v4282_v40 = vld [vmem:[%s5764_s28 + $0x48] sm:$0xff] }
0x10f0   : > { %v3626_v1 = vsel %vm3625_vm8, %v4617_v7, %v3622_v8 }
0x10f1   : > { %v3630_v41 = vmul.f32 %v3626_v1, %v6239_v24  ;;  %v3855_v1 = vpack.c.bf16 %v4282_v40, %v4281_v63 }
0x10f3   : > { %v3637_v11 = vmul.f32 %v4436_v49, %v3630_v41  ;;  %3872 = vmatpush.bf16.msrb.mxu2 %v3855_v1 }
0x10f5   : > { %v3644_v22 = vadd.f32 %v4437_v3, %v3637_v11 }
0x10f7   : > { %v3651_v33 = vpack.c.bf16 %v3644_v22, %v3643_v2 }
0x10f9   : > { %4280 = vmatmul.msk.bf16.gmra.mxu1 %vm1023_vm2, %v3651_v33 }
0x1156   : > { %v3674_v5 = vpop.f32.mrf.mxu1 }
0x1157   : > { %v6262_v19 = vadd.f32 %v6259_v39, %v3674_v5 }
0x1159   : > { %v6265_v12 = vmul.f32 0.70710677, %v6262_v19 }
0x115b   : > { %v3692_v31 = vand.u32 2147483647, %v6265_v12  ;;  %vm3824_vm4 = vcmp.ge.f32.partialorder %v6265_v12, 0.0  ;;  %v3684_v12 = vmul.f32 0.5, %v6262_v19 }
0x115d   : > { %v3696_v47 = vmul.f32 0.3275911, %v3692_v31  ;;  %v3800_v18 = vsub.f32 0.0, %v3692_v31 }
0x115e   : > { %v3676_v24 = vpop.f32.mrf.mxu1 }
0x115f   : > { %v3700_v23 = vadd.f32 1.0, %v3696_v47  ;;  %v6269_v20 = vadd.f32 %v6259_v39, %v3676_v24  ;;  %v3804_v6 = vmul.f32 %v3800_v18, %v3692_v31 }
0x1161   : > { %4618 = vrcp.f32 %v3700_v23  ;;  %v6272_v0 = vmul.f32 0.70710677, %v6269_v20  ;;  %v3715_v58 = vand.u32 2147483648, %v3700_v23  ;;  %v3713_v27 = vand.u32 2147483647, %v3700_v23 }
0x1162   : > { %vm3709_vm10 = vweird.f32 %v3700_v23  ;;  %v3808_v7 = vmul.f32 1.442695, %v3804_v6 }
0x1163   : > { %v6275_v28 = vand.u32 2147483647, %v6272_v0  ;;  %v3716_v45 = vor.u32 1.1754944e-38, %v3715_v58  ;;  %vm3714_vm1 = vcmp.eq.f32.partialorder %v3713_v27, 8.507059e+37  ;;  %vm3825_vm8 = vcmp.ge.f32.partialorder %v6272_v0, 0.0 }
0x1165   : > { %v3697_v13 = vmul.f32 0.3275911, %v6275_v28  ;;  %v3801_v11 = vsub.f32 0.0, %v6275_v28 }
0x1167   : > { %v4619_v30 = vpop.eup %4618  ;;  %v3701_v35 = vadd.f32 1.0, %v3697_v13  ;;  %v3805_v24 = vmul.f32 %v3801_v11, %v6275_v28 }
0x1168   : > { %v3705_v4 = vmul.f32 %v4619_v30, %v3700_v23  ;;  %vm3710_vm9 = vweird.f32 %v4619_v30 }
0x1169   : > { %4620 = vrcp.f32 %v3701_v35  ;;  %vm3711_vm0 = vmor %vm3709_vm10, %vm3710_vm9  ;;  %v3730_v25 = vand.u32 2147483648, %v3701_v35  ;;  %v3728_v46 = vand.u32 2147483647, %v3701_v35  ;;  %vm3724_vm11 = vweird.f32 %v3701_v35 }
0x116a   : > { %v3706_v61 = vsub.f32 1.0, %v3705_v4  ;;  %4622 = vpow2.f32 %v3808_v7 }
0x116b   : > { %v3731_v50 = vor.u32 1.1754944e-38, %v3730_v25  ;;  %vm3729_vm14 = vcmp.eq.f32.partialorder %v3728_v46, 8.507059e+37 }
0x116c   : > { %v3707_v57 = vmul.f32 %v4619_v30, %v3706_v61 }
0x116e   : > { %v3708_v49 = vadd.f32 %v4619_v30, %v3707_v57  ;;  %v3810_v57 = vmul.f32 1.442695, %v3805_v24 }
0x116f   : > { %v4621_v43 = vpop.eup %4620 }
0x1170   : > { %v3712_v3 = vsel %vm3711_vm0, %v4619_v30, %v3708_v49  ;;  %v3720_v48 = vmul.f32 %v4621_v43, %v3701_v35  ;;  %vm3725_vm15 = vweird.f32 %v4621_v43  ;;  %v4623_v27 = vpop.eup %4622 }
0x1171   : > { %v3717_v14 = vsel %vm3714_vm1, %v3716_v45, %v3712_v3  ;;  %vm3726_vm12 = vmor %vm3724_vm11, %vm3725_vm15 }
0x1172   : > { %v3764_v54 = vmul.f32 1.0614054, %v3717_v14  ;;  %v3721_v26 = vsub.f32 1.0, %v3720_v48 }
0x1174   : > { %v3768_v42 = vadd.f32 -1.4531521, %v3764_v54  ;;  %v3722_v52 = vmul.f32 %v4621_v43, %v3721_v26 }
0x1176   : > { %v3772_v56 = vmul.f32 %v3768_v42, %v3717_v14  ;;  %v3679_v55 = vpop.f32.mrf.mxu1  ;;  %v3723_v10 = vadd.f32 %v4621_v43, %v3722_v52 }
0x1177   : > { %v6285_v38 = vadd.f32 %v6259_v39, %v3679_v55 }
0x1178   : > { %v3776_v21 = vadd.f32 1.4214138, %v3772_v56  ;;  %v3727_v29 = vsel %vm3726_vm12, %v4621_v43, %v3723_v10 }
0x1179   : > { %v6290_v8 = vmul.f32 0.70710677, %v6285_v38  ;;  %v3732_v9 = vsel %vm3729_vm14, %v3731_v50, %v3727_v29  ;;  %v3685_v29 = vmul.f32 0.5, %v6269_v20 }
0x117a   : > { %v3780_v41 = vmul.f32 %v3776_v21, %v3717_v14  ;;  %v3765_v2 = vmul.f32 1.0614054, %v3732_v9 }
0x117b   : > { %v6294_v22 = vand.u32 2147483647, %v6290_v8  ;;  %vm3826_vm15 = vcmp.ge.f32.partialorder %v6290_v8, 0.0 }
0x117c   : > { %v3784_v33 = vadd.f32 -0.28449672, %v3780_v41  ;;  %v3769_v5 = vadd.f32 -1.4531521, %v3765_v2 }
0x117d   : > { %v3698_v31 = vmul.f32 0.3275911, %v6294_v22  ;;  %v3802_v21 = vsub.f32 0.0, %v6294_v22 }
0x117e   : > { %v3788_v47 = vmul.f32 %v3784_v33, %v3717_v14  ;;  %v3681_v23 = vpop.f32.mrf.mxu1  ;;  %v3773_v13 = vmul.f32 %v3769_v5, %v3732_v9 }
0x117f   : > { %v3702_v30 = vadd.f32 1.0, %v3698_v31  ;;  %v6299_v4 = vadd.f32 %v6259_v39, %v3681_v23  ;;  %v3806_v2 = vmul.f32 %v3802_v21, %v6294_v22 }
0x1180   : > { %v3792_v35 = vadd.f32 0.2548296, %v3788_v47  ;;  %v3777_v61 = vadd.f32 1.4214138, %v3773_v13 }
0x1181   : > { %4624 = vrcp.f32 %v3702_v30  ;;  %v6302_v53 = vmul.f32 0.70710677, %v6299_v4  ;;  %v3745_v54 = vand.u32 2147483648, %v3702_v30  ;;  %v3743_v42 = vand.u32 2147483647, %v3702_v30 }
0x1182   : > { %v3796_v58 = vmul.f32 %v3792_v35, %v3717_v14  ;;  %v3781_v36 = vmul.f32 %v3777_v61, %v3732_v9  ;;  %4626 = vpow2.f32 %v3810_v57  ;;  %vm3739_vm6 = vweird.f32 %v3702_v30 }
0x1183   : > { %v6305_v28 = vand.u32 2147483647, %v6302_v53  ;;  %v3746_v46 = vor.u32 1.1754944e-38, %v3745_v54  ;;  %vm3744_vm7 = vcmp.eq.f32.partialorder %v3743_v42, 8.507059e+37  ;;  %v3812_v19 = vmul.f32 1.442695, %v3806_v2 }
0x1184   : > { %v3816_v34 = vmul.f32 %v4623_v27, %v3796_v58  ;;  %v3785_v49 = vadd.f32 -0.28449672, %v3781_v36  ;;  %vm3827_vm11 = vcmp.ge.f32.partialorder %v6302_v53, 0.0 }
0x1185   : > { %v3699_v43 = vmul.f32 0.3275911, %v6305_v28  ;;  %v3803_v22 = vsub.f32 0.0, %v6305_v28 }
0x1186   : > { %v3820_v45 = vsub.f32 1.0, %v3816_v34  ;;  %v3789_v39 = vmul.f32 %v3785_v49, %v3732_v9 }
0x1187   : > { %v4625_v18 = vpop.eup %4624  ;;  %v3703_v44 = vadd.f32 1.0, %v3699_v43  ;;  %v3807_v34 = vmul.f32 %v3803_v22, %v6305_v28 }
0x1188   : > { %v3735_v3 = vmul.f32 %v4625_v18, %v3702_v30  ;;  %v3793_v60 = vadd.f32 0.2548296, %v3789_v39  ;;  %v3828_v14 = vsub.f32 0.0, %v3820_v45  ;;  %v4627_v6 = vpop.eup %4626  ;;  %vm3740_vm3 = vweird.f32 %v4625_v18 }
0x1189   : > { %4628 = vrcp.f32 %v3703_v44  ;;  %vm3741_vm5 = vmor %vm3739_vm6, %vm3740_vm3  ;;  %v3758_v33 = vand.u32 2147483647, %v3703_v44  ;;  %v3760_v5 = vand.u32 2147483648, %v3703_v44  ;;  %vm3754_vm10 = vweird.f32 %v3703_v44 }
0x118a   : > { %v3736_v48 = vsub.f32 1.0, %v3735_v3  ;;  %v3797_v15 = vmul.f32 %v3793_v60, %v3732_v9  ;;  %v3832_v37 = vsel %vm3824_vm4, %v3820_v45, %v3828_v14  ;;  %4630 = vpow2.f32 %v3812_v19 }
0x118b   : > { %v3836_v55 = vadd.f32 1.0, %v3832_v37  ;;  %v3761_v30 = vor.u32 1.1754944e-38, %v3760_v5  ;;  %vm3759_vm1 = vcmp.eq.f32.partialorder %v3758_v33, 8.507059e+37  ;;  %v3814_v3 = vmul.f32 1.442695, %v3807_v34 }
0x118c   : > { %v3737_v26 = vmul.f32 %v4625_v18, %v3736_v48  ;;  %v3817_v25 = vmul.f32 %v4627_v6, %v3797_v15 }
0x118d   : > { %v3840_v11 = vmul.f32 %v3836_v55, %v3684_v12  ;;  %4632 = vpow2.f32 %v3814_v3 }
0x118e   : > { %v3738_v16 = vadd.f32 %v4625_v18, %v3737_v26  ;;  %v3821_v52 = vsub.f32 1.0, %v3817_v25 }
0x118f   : > { %v4629_v56 = vpop.eup %4628 }
0x1190   : > { %v3742_v17 = vsel %vm3741_vm5, %v4625_v18, %v3738_v16  ;;  %v3829_v7 = vsub.f32 0.0, %v3821_v52  ;;  %v3750_v63 = vmul.f32 %v4629_v56, %v3703_v44  ;;  %vm3755_vm9 = vweird.f32 %v4629_v56  ;;  %v4631_v43 = vpop.eup %4630 }
0x1191   : > { %v3747_v10 = vsel %vm3744_vm7, %v3746_v46, %v3742_v17  ;;  %vm3756_vm0 = vmor %vm3754_vm10, %vm3755_vm9  ;;  %v3686_v17 = vmul.f32 0.5, %v6285_v38 }
0x1192   : > { %v3766_v50 = vmul.f32 1.0614054, %v3747_v10  ;;  %v3833_v40 = vsel %vm3825_vm8, %v3821_v52, %v3829_v7  ;;  %v3751_v9 = vsub.f32 1.0, %v3750_v63 }
0x1193   : > { %v3837_v1 = vadd.f32 1.0, %v3833_v40  ;;  %v4633_v42 = vpop.eup %4632 }
0x1194   : > { %v3770_v41 = vadd.f32 -1.4531521, %v3766_v50  ;;  %v3752_v24 = vmul.f32 %v4629_v56, %v3751_v9  ;;  %v4439_v50 = vld [vmem:[%s4972_s26 + $0x1] ss:$0 sm:$0xff] }
0x1195   : > { %v3841_v31 = vmul.f32 %v3837_v1, %v3685_v29 }
0x1196   : > { %v3774_v47 = vmul.f32 %v3770_v41, %v3747_v10  ;;  %v3753_v13 = vadd.f32 %v4629_v56, %v3752_v24 }
0x1197   : > { %v3853_v0 = vpack.c.bf16 %v3841_v31, %v3840_v11 }
0x1198   : > { %v3778_v23 = vadd.f32 1.4214138, %v3774_v47  ;;  %v3757_v35 = vsel %vm3756_vm0, %v4629_v56, %v3753_v13  ;;  %v3687_v56 = vmul.f32 0.5, %v6299_v4 }
0x1199   : > { %4289 = vmatmul.msk.bf16.vlgmr.msrb.gmra.mxu2 %vm2421_vm13, %v3853_v0  ;;  %v3762_v61 = vsel %vm3759_vm1, %v3761_v30, %v3757_v35 }
0x119a   : > { %v3782_v20 = vmul.f32 %v3778_v23, %v3747_v10  ;;  %v3767_v57 = vmul.f32 1.0614054, %v3762_v61 }
0x119c   : > { %v3786_v58 = vadd.f32 -0.28449672, %v3782_v20  ;;  %v3771_v36 = vadd.f32 -1.4531521, %v3767_v57 }
0x119e   : > { %v3790_v27 = vmul.f32 %v3786_v58, %v3747_v10  ;;  %v3775_v45 = vmul.f32 %v3771_v36, %v3762_v61 }
0x11a0   : > { %v3794_v49 = vadd.f32 0.2548296, %v3790_v27  ;;  %v3779_v39 = vadd.f32 1.4214138, %v3775_v45 }
0x11a2   : > { %v3798_v18 = vmul.f32 %v3794_v49, %v3747_v10  ;;  %v3783_v44 = vmul.f32 %v3779_v39, %v3762_v61 }
0x11a4   : > { %v3818_v60 = vmul.f32 %v4631_v43, %v3798_v18  ;;  %v3787_v14 = vadd.f32 -0.28449672, %v3783_v44 }
0x11a6   : > { %v3822_v48 = vsub.f32 1.0, %v3818_v60  ;;  %v3791_v15 = vmul.f32 %v3787_v14, %v3762_v61 }
0x11a8   : > { %v3795_v54 = vadd.f32 0.2548296, %v3791_v15  ;;  %v3830_v6 = vsub.f32 0.0, %v3822_v48 }
0x11aa   : > { %v3799_v26 = vmul.f32 %v3795_v54, %v3762_v61  ;;  %v3834_v28 = vsel %vm3826_vm15, %v3822_v48, %v3830_v6 }
0x11ab   : > { %v3838_v52 = vadd.f32 1.0, %v3834_v28 }
0x11ac   : > { %v3819_v25 = vmul.f32 %v4633_v42, %v3799_v26 }
0x11ad   : > { %v3842_v7 = vmul.f32 %v3838_v52, %v3686_v17 }
0x11ae   : > { %v3823_v37 = vsub.f32 1.0, %v3819_v25 }
0x11b0   : > { %v3831_v16 = vsub.f32 0.0, %v3823_v37 }
0x11b2   : > { %v3835_v46 = vsel %vm3827_vm11, %v3823_v37, %v3831_v16 }
0x11b3   : > { %v3839_v55 = vadd.f32 1.0, %v3835_v46 }
0x11b5   : > { %v3843_v10 = vmul.f32 %v3839_v55, %v3687_v56 }
0x11b7   : > { %v3854_v21 = vpack.c.bf16 %v3843_v10, %v3842_v7 }
0x11b9   : > { %4290 = vmatmul.msk.bf16.gmra.mxu2 %vm2421_vm13, %v3854_v21 }
0x121c   : > { %v3874_v8 = vpop.f32.mrf.mxu2 }
0x121d   : > { %v3884_v63 = vadd.f32 %v3874_v8, %v6205_v59 }
0x121f   : > { %v3893_v53 = vadd.f32 %v4439_v50, %v3884_v63 }
0x1221   : > { %3897 = vst.msk [vmem:[%s964_s18] sm:$0xff] %vm1023_vm2, %v3893_v53 }
0x1224   : > { %v3876_v38 = vpop.f32.mrf.mxu2 }
0x1225   : > { %v3885_v4 = vadd.f32 %v3876_v38, %v6210_v32 }
0x1227   : > { %v3894_v12 = vadd.f32 %v4439_v50, %v3885_v4 }
0x1229   : > { %3898 = vst.msk [vmem:[%s964_s18 + $0x8] sm:$0xff] %vm1023_vm2, %v3894_v12 }
0x123c   : > { %v3879_v40 = vpop.f32.mrf.mxu2 }
0x123d   : > { %v3886_v29 = vadd.f32 %v3879_v40, %v6215_v51 }
0x123f   : > { %v3895_v1 = vadd.f32 %v4439_v50, %v3886_v29 }
0x1241   : > { %3899 = vst.msk [vmem:[%s964_s18 + $0x10] sm:$0xff] %vm1023_vm2, %v3895_v1 }
0x1244   : > { %v3881_v59 = vpop.f32.mrf.mxu2 }
0x1245   : > { %v3887_v41 = vadd.f32 %v3881_v59, %v6220_v62 }
0x1247   : > { %v3896_v9 = vadd.f32 %v4439_v50, %v3887_v41 }
0x1249   : > { %3900 = vst.msk [vmem:[%s964_s18 + $0x18] sm:$0xff] %vm1023_vm2, %v3896_v9 }
0x124a PF: > { %s6482_s24 = sld [smem:[#allocation9_spill]]  ;;  %s6485_s1 = smov %s4732_s22 }
0x124b   : > { %s6483_s2 = sld [smem:[#allocation8_spill]] }
0x124c   : > { %s6484_s23 = sld [smem:[#allocation10_spill]] }
0x1250   : > { %p33_p7 = scmp.ge.s32.totalorder %s6482_s24, 4  }
0x1251   : > { %s6486_s22 = smov %s6483_s2 }
0x1252   :  { %35 = sbr.rel (!%p33_p7) target bundleno = 20 (0x14), region = 212 }
0x1257   :  { %3922 = vsyncpa [#allocation3], 1 }
0x1258   :  { %3924 = vsyncpa [#allocation3 + $0x1], 1 }
0x1259   :  { %3925 = vsyncpa [#allocation5], 1 }
0x125a   :  { %3927 = vsyncpa [#allocation5 + $0x1], 1 }

</bundles_post_ra>
